<compile_context>
chip_gen: v6e
topology: v6e:2x2x1
jax: 0.10.0
libtpu: 0.0.40
codegen_flags: <defaults>
</compile_context>

<pallas_src>
import math

import jax
import jax.numpy as jnp
from jax import lax
from jax.experimental import pallas as pl
from jax.experimental.pallas import tpu as pltpu


# SacConvModel defaults (rlpyt Conv2dModel: paddings default to 0 => VALID).
CHANNELS = (32, 32, 32, 32)
KERNEL_SIZES = (3, 3, 3, 3)
STRIDES = (2, 1, 1, 1)

_VMEM_BUDGET = 24 * 1024 * 1024     # conservative per-step budget (v7x: 64 MiB)


def _round_up(x, m):
    return ((x + m - 1) // m) * m


def _phys_bytes(rows, cols, dtype):
    """Physical VMEM bytes of a (rows, cols) buffer after (sublane, 128-lane)
    tile padding.  bf16 packs 2 rows per sublane word -> sublane tile 16."""
    it = jnp.dtype(dtype).itemsize
    sub = max(8, 32 // it)
    return _round_up(max(rows, 1), sub) * _round_up(max(cols, 1), 128) * it


# ---------------------------------------------------------------------------
# Fused Pallas kernel: 4x (conv + bias + ReLU), everything resident in VMEM.
# ---------------------------------------------------------------------------
def _make_fused_kernel(n_layers, cin0, shifts1, shifts_rest, rows1, m2_blk,
                       tile_n, h1, img_w, hw, s1, relu_last, couts):
    """shifts1: row shifts of layer-1 taps in the flat (h*w) input geometry.
    shifts_rest: per later layer, tap shifts in the height-compacted
    (h1 x img_w) geometry (width dilated by the layer-1 stride s1)."""

    def kernel(*refs):
        x_ref = refs[0]
        w_refs = refs[1:1 + 2 * n_layers:2]          # (k*k*cin, cout) each
        b_refs = refs[2:1 + 2 * n_layers:2]          # (1, cout) each, f32
        o_ref = refs[1 + 2 * n_layers]               # (m2_blk, cout_last)
        p1 = refs[2 + 2 * n_layers]                  # layer-1 im2col
        act_full = refs[3 + 2 * n_layers]            # layer-1 out, full H x W
        p2 = refs[4 + 2 * n_layers]                  # shared later im2col
        acts = refs[5 + 2 * n_layers:]               # compact activations

        # One-time zero of the scratch buffers.  Their tails only ever feed
        # output positions the wrapper discards; zeroing keeps them finite and
        # deterministic.  Scratch persists across grid steps -> first step only.
        @pl.when(pl.program_id(0) == 0)
        def _init():
            p1[...] = jnp.zeros_like(p1)
            p2[...] = jnp.zeros_like(p2)
            for a_ref in acts:
                a_ref[...] = jnp.zeros_like(a_ref)

        # ---- Layer 1 (stride s1): K-packed im2col built straight from the
        # pipelined input block, then ONE MXU matmul over K = k*k*Cin.
        for t, s in enumerate(shifts1):
            n = rows1 - s
            p1[pl.ds(0, n), t * cin0:(t + 1) * cin0] = x_ref[pl.ds(s, n), :]
        a = jnp.dot(p1[...], w_refs[0][...], preferred_element_type=jnp.float32)
        a = jnp.maximum(a + b_refs[0][...], 0.0)
        act_full[...] = a.astype(act_full.dtype)

        # ---- Height-compact the stride-s1 output: keep rows s1*oh only.
        # Contiguous row copies; offsets are multiples of img_w (aligned).
        for m in range(tile_n):
            for oh in range(h1):
                src = m * hw + s1 * oh * img_w
                dst = (m * h1 + oh) * img_w
                acts[0][pl.ds(dst, img_w), :] = act_full[pl.ds(src, img_w), :]

        # ---- Layers 2..n: K-packed im2col + single MXU matmul each, on the
        # compact (h1 x img_w) geometry (width shifts dilated by s1).
        for li in range(1, n_layers):
            src_ref = acts[li - 1]
            cin = couts[li - 1]
            shifts = shifts_rest[li - 1]
            for t, s in enumerate(shifts):
                n = m2_blk - s
                p2[pl.ds(0, n), t * cin:(t + 1) * cin] = src_ref[pl.ds(s, n), :]
            k_cols = len(shifts) * cin
            a = jnp.dot(p2[:, 0:k_cols], w_refs[li][...],
                        preferred_element_type=jnp.float32)
            a = a + b_refs[li][...]
            if li < n_layers - 1 or relu_last:
                a = jnp.maximum(a, 0.0)
            if li < n_layers - 1:
                acts[li][...] = a.astype(acts[li].dtype)
            else:
                o_ref[...] = a.astype(o_ref.dtype)

    return kernel


# ---------------------------------------------------------------------------
# Parameters (HWIO weights) for the default [32,32,32,32] / k=3 stack.
# ---------------------------------------------------------------------------
def init_sac_conv_params(key, in_channels, channels=CHANNELS,
                         kernel_sizes=KERNEL_SIZES):
    params = []
    cin = in_channels
    for cout, ks in zip(channels, kernel_sizes):
        key, wk, bk = jax.random.split(key, 3)
        fan_in = ks * ks * cin
        wgt = jax.random.normal(wk, (ks, ks, cin, cout), jnp.float32) / jnp.sqrt(
            float(fan_in))
        b = jax.random.normal(bk, (cout,), jnp.float32) * 0.01
        params.append((wgt, b))
        cin = cout
    return params


# ---------------------------------------------------------------------------
# SacConvModel.forward equivalent.
# ---------------------------------------------------------------------------
def sac_conv_forward(observation, params, strides=STRIDES,
                     final_nonlinearity=True, compute_dtype=jnp.bfloat16):
    """uint8 -> float/255, leading-dim handling, fused 4-layer conv stack."""
    img = observation
    if img.dtype == jnp.uint8:
        img = img.astype(jnp.float32) * (1.0 / 255.0)
    else:
        img = img.astype(jnp.float32)

    # infer_leading_dims(img, 3): supports 0, 1, or 2 leading dims.
    lead = img.ndim - 3
    assert lead in (0, 1, 2), "expected (C,H,W), (B,C,H,W) or (T,B,C,H,W)"
    c, h, w = img.shape[-3:]
    tb = 1
    for d in img.shape[:lead]:
        tb *= int(d)
    x = img.reshape(tb, c, h, w)
    x = jnp.transpose(x, (0, 2, 3, 1))                 # NCHW -> NHWC

    n_layers = len(params)
    assert n_layers >= 2
    ks = [p[0].shape[0] for p in params]
    couts = [p[0].shape[-1] for p in params]
    s1 = int(strides[0])
    # TODO(synk): general per-layer strides would need per-layer compaction;
    # SacConvModel's default is stride only on the first layer.
    assert all(int(s) == 1 for s in strides[1:n_layers]), \
        "fused kernel assumes stride > 1 only on the first layer"

    h1 = (h - ks[0]) // s1 + 1
    w1 = (w - ks[0]) // s1 + 1
    shrink = sum(k - 1 for k in ks[1:])
    h_out, w_out = h1 - shrink, w1 - shrink
    assert h_out >= 1 and w_out >= 1, "image too small for conv stack"

    hw = h * w
    taps1 = ks[0] * ks[0]
    shifts1 = tuple(i * w + j for i in range(ks[0]) for j in range(ks[0]))
    shifts_rest = [tuple(i * w + s1 * j for i in range(k) for j in range(k))
                   for k in ks[1:]]
    k2cin_max = max(k * k * ci for k, ci in zip(ks[1:], couts[:-1]))

    # ----- batch tiling with a lane-padding-aware VMEM estimate -------------
    def _vmem_est(tn):
        r1 = tn * hw
        m2b = _round_up(tn * h1 * w, 8)
        est = 2 * _phys_bytes(r1, c, compute_dtype)                 # in block
        est += 2 * _phys_bytes(m2b, couts[-1], jnp.float32)         # out block
        est += 2 * sum(_phys_bytes(k * k * ci, co, compute_dtype)
                       + _phys_bytes(1, co, jnp.float32)
                       for k, ci, co in zip(ks, [c] + couts[:-1], couts))
        est += _phys_bytes(r1, taps1 * c, compute_dtype)            # p1
        est += _phys_bytes(r1, couts[0], compute_dtype)             # act_full
        est += _phys_bytes(m2b, k2cin_max, compute_dtype)           # p2
        est += sum(_phys_bytes(m2b, co, compute_dtype) for co in couts[:-1])
        return est

    align = 8 // math.gcd(hw, 8)
    if tb <= 1:
        tile_n = align
    else:
        # ~2 parallel grid steps so v7x's two TensorCores both get work; the
        # extra ~0.35us step is negligible on single-TC v5e/v6e.
        tile_n = _round_up((tb + 1) // 2, align)
    max_unroll = max(align, ((192 // max(h1, 1)) // align) * align)
    tile_n = max(align, min(tile_n, max_unroll))
    while tile_n > align and _vmem_est(tile_n) > _VMEM_BUDGET:
        tile_n -= align
    grid_n = -(-tb // tile_n)
    n_pad = grid_n * tile_n

    rows1 = tile_n * hw
    m2 = tile_n * h1 * w
    m2_blk = _round_up(m2, 8)
    assert rows1 > max(shifts1) and m2_blk > max(max(s) for s in shifts_rest)

    if n_pad > tb:
        x = jnp.pad(x, ((0, n_pad - tb), (0, 0), (0, 0), (0, 0)))
    x2d = x.reshape(n_pad * hw, c).astype(compute_dtype)

    # K-packed weights (k*k*cin, cout); biases (1, cout) in f32.
    flat_params = []
    for wgt, bias in params:
        kh, kw_, ci, co = wgt.shape
        flat_params.append(wgt.reshape(kh * kw_ * ci, co).astype(compute_dtype))
        flat_params.append(bias.reshape(1, co).astype(jnp.float32))

    in_specs = [pl.BlockSpec((rows1, c), lambda i: (i, 0))]
    for arr in flat_params:
        in_specs.append(pl.BlockSpec(arr.shape, lambda i: (0, 0)))

    scratch_shapes = [
        pltpu.VMEM((rows1, taps1 * c), compute_dtype),       # layer-1 im2col
        pltpu.VMEM((rows1, couts[0]), compute_dtype),        # layer-1 full out
        pltpu.VMEM((m2_blk, k2cin_max), compute_dtype),      # shared im2col
    ] + [pltpu.VMEM((m2_blk, co), compute_dtype) for co in couts[:-1]]

    kernel = _make_fused_kernel(
        n_layers=n_layers, cin0=c, shifts1=shifts1, shifts_rest=shifts_rest,
        rows1=rows1, m2_blk=m2_blk, tile_n=tile_n, h1=h1, img_w=w, hw=hw,
        s1=s1, relu_last=final_nonlinearity, couts=couts)

    flops = 2 * grid_n * (rows1 * taps1 * c * couts[0]
                          + sum(m2_blk * k * k * ci * co
                                for k, ci, co in zip(ks[1:], couts[:-1],
                                                     couts[1:])))
    bytes_accessed = int(
        x2d.size * x2d.dtype.itemsize
        + grid_n * m2_blk * couts[-1] * 4
        + sum(a.size * a.dtype.itemsize for a in flat_params))

    out_flat = pl.pallas_call(
        kernel,
        out_shape=jax.ShapeDtypeStruct((grid_n * m2_blk, couts[-1]),
                                       jnp.float32),
        grid=(grid_n,),
        in_specs=in_specs,
        out_specs=pl.BlockSpec((m2_blk, couts[-1]), lambda i: (i, 0)),
        scratch_shapes=scratch_shapes,
        compiler_params=pltpu.CompilerParams(
            dimension_semantics=("parallel",),
            vmem_limit_bytes=32 * 1024 * 1024),
        cost_estimate=pl.CostEstimate(flops=flops, transcendentals=0,
                                      bytes_accessed=bytes_accessed),
    )(x2d, *flat_params)

    # Kernel output geometry per image: (h1, w) with valid features at
    # rows < h_out and columns s1*ow (ow < w_out).
    feat = out_flat.reshape(grid_n, m2_blk, couts[-1])[:, :m2, :]
    feat = feat.reshape(n_pad, h1, w, couts[-1])[:tb]
    feat = feat[:, :h_out, ::s1, :][:, :, :w_out, :]
    feat = jnp.transpose(feat, (0, 3, 1, 2))           # NHWC -> NCHW
    return feat.reshape(*observation.shape[:lead], *feat.shape[1:])


# ---------------------------------------------------------------------------
# Pure-JAX reference (lax.conv, HIGHEST precision) for verification.
# ---------------------------------------------------------------------------
def ref_forward(observation, params, strides=STRIDES, final_nonlinearity=True):
    img = observation
    if img.dtype == jnp.uint8:
        img = img.astype(jnp.float32) * (1.0 / 255.0)
    else:
        img = img.astype(jnp.float32)
    lead = img.ndim - 3
    c, h, w = img.shape[-3:]
    tb = 1
    for d in img.shape[:lead]:
        tb *= int(d)
    x = jnp.transpose(img.reshape(tb, c, h, w), (0, 2, 3, 1))
    n_layers = len(params)
    for li, ((wgt, bias), s) in enumerate(zip(params, strides)):
        x = lax.conv_general_dilated(
            x, wgt, (s, s), "VALID",
            dimension_numbers=("NHWC", "HWIO", "NHWC"),
            precision=lax.Precision.HIGHEST)
        x = x + bias
        if final_nonlinearity or li < n_layers - 1:
            x = jnp.maximum(x, 0.0)
    x = jnp.transpose(x, (0, 3, 1, 2))
    return x.reshape(*observation.shape[:lead], *x.shape[1:])


if __name__ == "__main__":
    key = jax.random.PRNGKey(0)
    key, pkey, xkey = jax.random.split(key, 3)

    B, C, H, W = 2, 4, 16, 16  # image_shape=(4,16,16), batch leading dim
    obs = jax.random.randint(xkey, (B, C, H, W), 0, 256,
                             dtype=jnp.int32).astype(jnp.uint8)
    params = init_sac_conv_params(pkey, C)

    ref = ref_forward(obs, params)

    # f32-operand path: near-exact check vs the lax.conv reference.
    fwd_f32 = jax.jit(
        lambda o: sac_conv_forward(o, params, compute_dtype=jnp.float32))
    out_f32 = jax.block_until_ready(fwd_f32(obs))
    # strides (2,1,1,1), k=3, p=0 on 16x16 -> 7 -> 5 -> 3 -> 1
    assert out_f32.shape == (B, 32, 1, 1), out_f32.shape
    err_f32 = float(jnp.max(jnp.abs(out_f32 - ref)))

    # bf16-operand default path (f32 accumulate): loose tolerance.
    fwd_bf16 = jax.jit(lambda o: sac_conv_forward(o, params))
    out_bf16 = jax.block_until_ready(fwd_bf16(obs))
    assert out_bf16.shape == (B, 32, 1, 1), out_bf16.shape
    err_bf16 = float(jnp.max(jnp.abs(out_bf16 - ref)))

    bf16_tol = 5e-2 + 5e-2 * float(jnp.max(jnp.abs(ref)))
    if err_f32 < 5e-3 and err_bf16 < bf16_tol:
        print("KERNEL_OK")
    else:
        print(f"MISMATCH f32_err={err_f32} bf16_err={err_bf16}")
</pallas_src>

<mosaic_0001>
module attributes {stable_mosaic.version = 11 : i64} {
  func.func @kernel(%arg0: i32, %arg1: memref<256x4xf32, #tpu.memory_space<vmem>>, %arg2: memref<36x32xf32, #tpu.memory_space<vmem>>, %arg3: memref<1x32xf32, #tpu.memory_space<vmem>>, %arg4: memref<288x32xf32, #tpu.memory_space<vmem>>, %arg5: memref<1x32xf32, #tpu.memory_space<vmem>>, %arg6: memref<288x32xf32, #tpu.memory_space<vmem>>, %arg7: memref<1x32xf32, #tpu.memory_space<vmem>>, %arg8: memref<288x32xf32, #tpu.memory_space<vmem>>, %arg9: memref<1x32xf32, #tpu.memory_space<vmem>>, %arg10: memref<112x32xf32, #tpu.memory_space<vmem>>, %arg11: memref<256x36xf32, #tpu.memory_space<vmem>>, %arg12: memref<256x32xf32, #tpu.memory_space<vmem>>, %arg13: memref<112x288xf32, #tpu.memory_space<vmem>>, %arg14: memref<112x32xf32, #tpu.memory_space<vmem>>, %arg15: memref<112x32xf32, #tpu.memory_space<vmem>>, %arg16: memref<112x32xf32, #tpu.memory_space<vmem>>) attributes {dimension_semantics = [#tpu.dimension_semantics<parallel>], iteration_bounds = array<i64: 2>, scalar_prefetch = 0 : i64, scratch_operands = 6 : i64, tpu.core_type = #tpu.core_type<tc>, window_params = [{transform_indices = @transform_0, window_bounds = array<i64: 256, 4>}, {pipeline_mode = #tpu.pipeline_mode<synchronous>, transform_indices = @transform_1, window_bounds = array<i64: 36, 32>}, {pipeline_mode = #tpu.pipeline_mode<synchronous>, transform_indices = @transform_2, window_bounds = array<i64: 1, 32>}, {pipeline_mode = #tpu.pipeline_mode<synchronous>, transform_indices = @transform_3, window_bounds = array<i64: 288, 32>}, {pipeline_mode = #tpu.pipeline_mode<synchronous>, transform_indices = @transform_4, window_bounds = array<i64: 1, 32>}, {pipeline_mode = #tpu.pipeline_mode<synchronous>, transform_indices = @transform_5, window_bounds = array<i64: 288, 32>}, {pipeline_mode = #tpu.pipeline_mode<synchronous>, transform_indices = @transform_6, window_bounds = array<i64: 1, 32>}, {pipeline_mode = #tpu.pipeline_mode<synchronous>, transform_indices = @transform_7, window_bounds = array<i64: 288, 32>}, {pipeline_mode = #tpu.pipeline_mode<synchronous>, transform_indices = @transform_8, window_bounds = array<i64: 1, 32>}, {transform_indices = @transform_9, window_bounds = array<i64: 112, 32>}]} {
    %c0_i32 = arith.constant 0 : i32
    %0 = arith.cmpi eq, %arg0, %c0_i32 : i32
    %1 = arith.extui %0 : i1 to i32
    %c0_i32_0 = arith.constant 0 : i32
    %2 = arith.cmpi ne, %1, %c0_i32_0 : i32
    scf.if %2 {
      %cst_187 = arith.constant 0.000000e+00 : f32
      %125 = vector.broadcast %cst_187 : f32 to vector<256x36xf32>
      %c0_188 = arith.constant 0 : index
      %c0_189 = arith.constant 0 : index
      %126 = vector.load %arg11[%c0_188, %c0_189] : memref<256x36xf32, #tpu.memory_space<vmem>>, vector<256x36xf32>
      tpu.vector_store %arg11[%c0_188, %c0_189], %125 {strides = array<i32>} : memref<256x36xf32, #tpu.memory_space<vmem>>, vector<256x36xf32>,
      %cst_190 = arith.constant 0.000000e+00 : f32
      %127 = vector.broadcast %cst_190 : f32 to vector<112x288xf32>
      %c0_191 = arith.constant 0 : index
      %c0_192 = arith.constant 0 : index
      %128 = vector.load %arg13[%c0_191, %c0_192] : memref<112x288xf32, #tpu.memory_space<vmem>>, vector<112x288xf32>
      tpu.vector_store %arg13[%c0_191, %c0_192], %127 {strides = array<i32>} : memref<112x288xf32, #tpu.memory_space<vmem>>, vector<112x288xf32>,
      %cst_193 = arith.constant 0.000000e+00 : f32
      %129 = vector.broadcast %cst_193 : f32 to vector<112x32xf32>
      %c0_194 = arith.constant 0 : index
      %c0_195 = arith.constant 0 : index
      %130 = vector.load %arg14[%c0_194, %c0_195] : memref<112x32xf32, #tpu.memory_space<vmem>>, vector<112x32xf32>
      tpu.vector_store %arg14[%c0_194, %c0_195], %129 {strides = array<i32>} : memref<112x32xf32, #tpu.memory_space<vmem>>, vector<112x32xf32>,
      %cst_196 = arith.constant 0.000000e+00 : f32
      %131 = vector.broadcast %cst_196 : f32 to vector<112x32xf32>
      %c0_197 = arith.constant 0 : index
      %c0_198 = arith.constant 0 : index
      %132 = vector.load %arg15[%c0_197, %c0_198] : memref<112x32xf32, #tpu.memory_space<vmem>>, vector<112x32xf32>
      tpu.vector_store %arg15[%c0_197, %c0_198], %131 {strides = array<i32>} : memref<112x32xf32, #tpu.memory_space<vmem>>, vector<112x32xf32>,
      %cst_199 = arith.constant 0.000000e+00 : f32
      %133 = vector.broadcast %cst_199 : f32 to vector<112x32xf32>
      %c0_200 = arith.constant 0 : index
      %c0_201 = arith.constant 0 : index
      %134 = vector.load %arg16[%c0_200, %c0_201] : memref<112x32xf32, #tpu.memory_space<vmem>>, vector<112x32xf32>
      tpu.vector_store %arg16[%c0_200, %c0_201], %133 {strides = array<i32>} : memref<112x32xf32, #tpu.memory_space<vmem>>, vector<112x32xf32>,
    } else {
    }
    %c0 = arith.constant 0 : index
    %c0_1 = arith.constant 0 : index
    %3 = vector.load %arg1[%c0, %c0_1] : memref<256x4xf32, #tpu.memory_space<vmem>>, vector<256x4xf32>
    %c0_2 = arith.constant 0 : index
    %c0_3 = arith.constant 0 : index
    %4 = vector.load %arg11[%c0_2, %c0_3] : memref<256x36xf32, #tpu.memory_space<vmem>>, vector<256x4xf32>
    tpu.vector_store %arg11[%c0_2, %c0_3], %3 {strides = array<i32>} : memref<256x36xf32, #tpu.memory_space<vmem>>, vector<256x4xf32>,
    %c1 = arith.constant 1 : index
    %c0_4 = arith.constant 0 : index
    %5 = vector.load %arg1[%c1, %c0_4] : memref<256x4xf32, #tpu.memory_space<vmem>>, vector<255x4xf32>
    %c0_5 = arith.constant 0 : index
    %c4 = arith.constant 4 : index
    %6 = vector.load %arg11[%c0_5, %c4] : memref<256x36xf32, #tpu.memory_space<vmem>>, vector<255x4xf32>
    tpu.vector_store %arg11[%c0_5, %c4], %5 {strides = array<i32>} : memref<256x36xf32, #tpu.memory_space<vmem>>, vector<255x4xf32>,
    %c2 = arith.constant 2 : index
    %c0_6 = arith.constant 0 : index
    %7 = vector.load %arg1[%c2, %c0_6] : memref<256x4xf32, #tpu.memory_space<vmem>>, vector<254x4xf32>
    %c0_7 = arith.constant 0 : index
    %c8 = arith.constant 8 : index
    %8 = vector.load %arg11[%c0_7, %c8] : memref<256x36xf32, #tpu.memory_space<vmem>>, vector<254x4xf32>
    tpu.vector_store %arg11[%c0_7, %c8], %7 {strides = array<i32>} : memref<256x36xf32, #tpu.memory_space<vmem>>, vector<254x4xf32>,
    %c16 = arith.constant 16 : index
    %c0_8 = arith.constant 0 : index
    %9 = vector.load %arg1[%c16, %c0_8] : memref<256x4xf32, #tpu.memory_space<vmem>>, vector<240x4xf32>
    %c0_9 = arith.constant 0 : index
    %c12 = arith.constant 12 : index
    %10 = vector.load %arg11[%c0_9, %c12] : memref<256x36xf32, #tpu.memory_space<vmem>>, vector<240x4xf32>
    tpu.vector_store %arg11[%c0_9, %c12], %9 {strides = array<i32>} : memref<256x36xf32, #tpu.memory_space<vmem>>, vector<240x4xf32>,
    %c17 = arith.constant 17 : index
    %c0_10 = arith.constant 0 : index
    %11 = vector.load %arg1[%c17, %c0_10] : memref<256x4xf32, #tpu.memory_space<vmem>>, vector<239x4xf32>
    %c0_11 = arith.constant 0 : index
    %c16_12 = arith.constant 16 : index
    %12 = vector.load %arg11[%c0_11, %c16_12] : memref<256x36xf32, #tpu.memory_space<vmem>>, vector<239x4xf32>
    tpu.vector_store %arg11[%c0_11, %c16_12], %11 {strides = array<i32>} : memref<256x36xf32, #tpu.memory_space<vmem>>, vector<239x4xf32>,
    %c18 = arith.constant 18 : index
    %c0_13 = arith.constant 0 : index
    %13 = vector.load %arg1[%c18, %c0_13] : memref<256x4xf32, #tpu.memory_space<vmem>>, vector<238x4xf32>
    %c0_14 = arith.constant 0 : index
    %c20 = arith.constant 20 : index
    %14 = vector.load %arg11[%c0_14, %c20] : memref<256x36xf32, #tpu.memory_space<vmem>>, vector<238x4xf32>
    tpu.vector_store %arg11[%c0_14, %c20], %13 {strides = array<i32>} : memref<256x36xf32, #tpu.memory_space<vmem>>, vector<238x4xf32>,
    %c32 = arith.constant 32 : index
    %c0_15 = arith.constant 0 : index
    %15 = vector.load %arg1[%c32, %c0_15] : memref<256x4xf32, #tpu.memory_space<vmem>>, vector<224x4xf32>
    %c0_16 = arith.constant 0 : index
    %c24 = arith.constant 24 : index
    %16 = vector.load %arg11[%c0_16, %c24] : memref<256x36xf32, #tpu.memory_space<vmem>>, vector<224x4xf32>
    tpu.vector_store %arg11[%c0_16, %c24], %15 {strides = array<i32>} : memref<256x36xf32, #tpu.memory_space<vmem>>, vector<224x4xf32>,
    %c33 = arith.constant 33 : index
    %c0_17 = arith.constant 0 : index
    %17 = vector.load %arg1[%c33, %c0_17] : memref<256x4xf32, #tpu.memory_space<vmem>>, vector<223x4xf32>
    %c0_18 = arith.constant 0 : index
    %c28 = arith.constant 28 : index
    %18 = vector.load %arg11[%c0_18, %c28] : memref<256x36xf32, #tpu.memory_space<vmem>>, vector<223x4xf32>
    tpu.vector_store %arg11[%c0_18, %c28], %17 {strides = array<i32>} : memref<256x36xf32, #tpu.memory_space<vmem>>, vector<223x4xf32>,
    %c34 = arith.constant 34 : index
    %c0_19 = arith.constant 0 : index
    %19 = vector.load %arg1[%c34, %c0_19] : memref<256x4xf32, #tpu.memory_space<vmem>>, vector<222x4xf32>
    %c0_20 = arith.constant 0 : index
    %c32_21 = arith.constant 32 : index
    %20 = vector.load %arg11[%c0_20, %c32_21] : memref<256x36xf32, #tpu.memory_space<vmem>>, vector<222x4xf32>
    tpu.vector_store %arg11[%c0_20, %c32_21], %19 {strides = array<i32>} : memref<256x36xf32, #tpu.memory_space<vmem>>, vector<222x4xf32>,
    %c0_22 = arith.constant 0 : index
    %c0_23 = arith.constant 0 : index
    %21 = vector.load %arg11[%c0_22, %c0_23] : memref<256x36xf32, #tpu.memory_space<vmem>>, vector<256x36xf32>
    %c0_24 = arith.constant 0 : index
    %c0_25 = arith.constant 0 : index
    %22 = vector.load %arg2[%c0_24, %c0_25] : memref<36x32xf32, #tpu.memory_space<vmem>>, vector<36x32xf32>
    %cst = arith.constant dense<0.000000e+00> : vector<256x32xf32>
    %23 = tpu.matmul %21, %22, %cst {dimension_numbers = #tpu.dot_dimension_numbers<[1], [0], [0], [1], [0, 0, 1, 1], [], []>} : vector<256x36xf32>, vector<36x32xf32>, vector<256x32xf32> -> vector<256x32xf32>
    %c0_26 = arith.constant 0 : index
    %c0_27 = arith.constant 0 : index
    %24 = vector.load %arg3[%c0_26, %c0_27] : memref<1x32xf32, #tpu.memory_space<vmem>>, vector<1x32xf32>
    %25 = vector.broadcast %24 : vector<1x32xf32> to vector<256x32xf32>
    %26 = arith.addf %23, %25 : vector<256x32xf32>
    %cst_28 = arith.constant 0.000000e+00 : f32
    %27 = vector.broadcast %cst_28 : f32 to vector<256x32xf32>
    %28 = arith.maximumf %26, %27 : vector<256x32xf32>
    %c0_29 = arith.constant 0 : index
    %c0_30 = arith.constant 0 : index
    %29 = vector.load %arg12[%c0_29, %c0_30] : memref<256x32xf32, #tpu.memory_space<vmem>>, vector<256x32xf32>
    tpu.vector_store %arg12[%c0_29, %c0_30], %28 {strides = array<i32>} : memref<256x32xf32, #tpu.memory_space<vmem>>, vector<256x32xf32>,
    %c0_31 = arith.constant 0 : index
    %c0_32 = arith.constant 0 : index
    %30 = vector.load %arg12[%c0_31, %c0_32] : memref<256x32xf32, #tpu.memory_space<vmem>>, vector<16x32xf32>
    %c0_33 = arith.constant 0 : index
    %c0_34 = arith.constant 0 : index
    %31 = vector.load %arg14[%c0_33, %c0_34] : memref<112x32xf32, #tpu.memory_space<vmem>>, vector<16x32xf32>
    tpu.vector_store %arg14[%c0_33, %c0_34], %30 {strides = array<i32>} : memref<112x32xf32, #tpu.memory_space<vmem>>, vector<16x32xf32>,
    %c32_35 = arith.constant 32 : index
    %c0_36 = arith.constant 0 : index
    %32 = vector.load %arg12[%c32_35, %c0_36] : memref<256x32xf32, #tpu.memory_space<vmem>>, vector<16x32xf32>
    %c16_37 = arith.constant 16 : index
    %c0_38 = arith.constant 0 : index
    %33 = vector.load %arg14[%c16_37, %c0_38] : memref<112x32xf32, #tpu.memory_space<vmem>>, vector<16x32xf32>
    tpu.vector_store %arg14[%c16_37, %c0_38], %32 {strides = array<i32>} : memref<112x32xf32, #tpu.memory_space<vmem>>, vector<16x32xf32>,
    %c64 = arith.constant 64 : index
    %c0_39 = arith.constant 0 : index
    %34 = vector.load %arg12[%c64, %c0_39] : memref<256x32xf32, #tpu.memory_space<vmem>>, vector<16x32xf32>
    %c32_40 = arith.constant 32 : index
    %c0_41 = arith.constant 0 : index
    %35 = vector.load %arg14[%c32_40, %c0_41] : memref<112x32xf32, #tpu.memory_space<vmem>>, vector<16x32xf32>
    tpu.vector_store %arg14[%c32_40, %c0_41], %34 {strides = array<i32>} : memref<112x32xf32, #tpu.memory_space<vmem>>, vector<16x32xf32>,
    %c96 = arith.constant 96 : index
    %c0_42 = arith.constant 0 : index
    %36 = vector.load %arg12[%c96, %c0_42] : memref<256x32xf32, #tpu.memory_space<vmem>>, vector<16x32xf32>
    %c48 = arith.constant 48 : index
    %c0_43 = arith.constant 0 : index
    %37 = vector.load %arg14[%c48, %c0_43] : memref<112x32xf32, #tpu.memory_space<vmem>>, vector<16x32xf32>
    tpu.vector_store %arg14[%c48, %c0_43], %36 {strides = array<i32>} : memref<112x32xf32, #tpu.memory_space<vmem>>, vector<16x32xf32>,
    %c128 = arith.constant 128 : index
    %c0_44 = arith.constant 0 : index
    %38 = vector.load %arg12[%c128, %c0_44] : memref<256x32xf32, #tpu.memory_space<vmem>>, vector<16x32xf32>
    %c64_45 = arith.constant 64 : index
    %c0_46 = arith.constant 0 : index
    %39 = vector.load %arg14[%c64_45, %c0_46] : memref<112x32xf32, #tpu.memory_space<vmem>>, vector<16x32xf32>
    tpu.vector_store %arg14[%c64_45, %c0_46], %38 {strides = array<i32>} : memref<112x32xf32, #tpu.memory_space<vmem>>, vector<16x32xf32>,
    %c160 = arith.constant 160 : index
    %c0_47 = arith.constant 0 : index
    %40 = vector.load %arg12[%c160, %c0_47] : memref<256x32xf32, #tpu.memory_space<vmem>>, vector<16x32xf32>
    %c80 = arith.constant 80 : index
    %c0_48 = arith.constant 0 : index
    %41 = vector.load %arg14[%c80, %c0_48] : memref<112x32xf32, #tpu.memory_space<vmem>>, vector<16x32xf32>
    tpu.vector_store %arg14[%c80, %c0_48], %40 {strides = array<i32>} : memref<112x32xf32, #tpu.memory_space<vmem>>, vector<16x32xf32>,
    %c192 = arith.constant 192 : index
    %c0_49 = arith.constant 0 : index
    %42 = vector.load %arg12[%c192, %c0_49] : memref<256x32xf32, #tpu.memory_space<vmem>>, vector<16x32xf32>
    %c96_50 = arith.constant 96 : index
    %c0_51 = arith.constant 0 : index
    %43 = vector.load %arg14[%c96_50, %c0_51] : memref<112x32xf32, #tpu.memory_space<vmem>>, vector<16x32xf32>
    tpu.vector_store %arg14[%c96_50, %c0_51], %42 {strides = array<i32>} : memref<112x32xf32, #tpu.memory_space<vmem>>, vector<16x32xf32>,
    %c0_52 = arith.constant 0 : index
    %c0_53 = arith.constant 0 : index
    %44 = vector.load %arg14[%c0_52, %c0_53] : memref<112x32xf32, #tpu.memory_space<vmem>>, vector<112x32xf32>
    %c0_54 = arith.constant 0 : index
    %c0_55 = arith.constant 0 : index
    %45 = vector.load %arg13[%c0_54, %c0_55] : memref<112x288xf32, #tpu.memory_space<vmem>>, vector<112x32xf32>
    tpu.vector_store %arg13[%c0_54, %c0_55], %44 {strides = array<i32>} : memref<112x288xf32, #tpu.memory_space<vmem>>, vector<112x32xf32>,
    %c2_56 = arith.constant 2 : index
    %c0_57 = arith.constant 0 : index
    %46 = vector.load %arg14[%c2_56, %c0_57] : memref<112x32xf32, #tpu.memory_space<vmem>>, vector<110x32xf32>
    %c0_58 = arith.constant 0 : index
    %c32_59 = arith.constant 32 : index
    %47 = vector.load %arg13[%c0_58, %c32_59] : memref<112x288xf32, #tpu.memory_space<vmem>>, vector<110x32xf32>
    tpu.vector_store %arg13[%c0_58, %c32_59], %46 {strides = array<i32>} : memref<112x288xf32, #tpu.memory_space<vmem>>, vector<110x32xf32>,
    %c4_60 = arith.constant 4 : index
    %c0_61 = arith.constant 0 : index
    %48 = vector.load %arg14[%c4_60, %c0_61] : memref<112x32xf32, #tpu.memory_space<vmem>>, vector<108x32xf32>
    %c0_62 = arith.constant 0 : index
    %c64_63 = arith.constant 64 : index
    %49 = vector.load %arg13[%c0_62, %c64_63] : memref<112x288xf32, #tpu.memory_space<vmem>>, vector<108x32xf32>
    tpu.vector_store %arg13[%c0_62, %c64_63], %48 {strides = array<i32>} : memref<112x288xf32, #tpu.memory_space<vmem>>, vector<108x32xf32>,
    %c16_64 = arith.constant 16 : index
    %c0_65 = arith.constant 0 : index
    %50 = vector.load %arg14[%c16_64, %c0_65] : memref<112x32xf32, #tpu.memory_space<vmem>>, vector<96x32xf32>
    %c0_66 = arith.constant 0 : index
    %c96_67 = arith.constant 96 : index
    %51 = vector.load %arg13[%c0_66, %c96_67] : memref<112x288xf32, #tpu.memory_space<vmem>>, vector<96x32xf32>
    tpu.vector_store %arg13[%c0_66, %c96_67], %50 {strides = array<i32>} : memref<112x288xf32, #tpu.memory_space<vmem>>, vector<96x32xf32>,
    %c18_68 = arith.constant 18 : index
    %c0_69 = arith.constant 0 : index
    %52 = vector.load %arg14[%c18_68, %c0_69] : memref<112x32xf32, #tpu.memory_space<vmem>>, vector<94x32xf32>
    %c0_70 = arith.constant 0 : index
    %c128_71 = arith.constant 128 : index
    %53 = vector.load %arg13[%c0_70, %c128_71] : memref<112x288xf32, #tpu.memory_space<vmem>>, vector<94x32xf32>
    tpu.vector_store %arg13[%c0_70, %c128_71], %52 {strides = array<i32>} : memref<112x288xf32, #tpu.memory_space<vmem>>, vector<94x32xf32>,
    %c20_72 = arith.constant 20 : index
    %c0_73 = arith.constant 0 : index
    %54 = vector.load %arg14[%c20_72, %c0_73] : memref<112x32xf32, #tpu.memory_space<vmem>>, vector<92x32xf32>
    %c0_74 = arith.constant 0 : index
    %c160_75 = arith.constant 160 : index
    %55 = vector.load %arg13[%c0_74, %c160_75] : memref<112x288xf32, #tpu.memory_space<vmem>>, vector<92x32xf32>
    tpu.vector_store %arg13[%c0_74, %c160_75], %54 {strides = array<i32>} : memref<112x288xf32, #tpu.memory_space<vmem>>, vector<92x32xf32>,
    %c32_76 = arith.constant 32 : index
    %c0_77 = arith.constant 0 : index
    %56 = vector.load %arg14[%c32_76, %c0_77] : memref<112x32xf32, #tpu.memory_space<vmem>>, vector<80x32xf32>
    %c0_78 = arith.constant 0 : index
    %c192_79 = arith.constant 192 : index
    %57 = vector.load %arg13[%c0_78, %c192_79] : memref<112x288xf32, #tpu.memory_space<vmem>>, vector<80x32xf32>
    tpu.vector_store %arg13[%c0_78, %c192_79], %56 {strides = array<i32>} : memref<112x288xf32, #tpu.memory_space<vmem>>, vector<80x32xf32>,
    %c34_80 = arith.constant 34 : index
    %c0_81 = arith.constant 0 : index
    %58 = vector.load %arg14[%c34_80, %c0_81] : memref<112x32xf32, #tpu.memory_space<vmem>>, vector<78x32xf32>
    %c0_82 = arith.constant 0 : index
    %c224 = arith.constant 224 : index
    %59 = vector.load %arg13[%c0_82, %c224] : memref<112x288xf32, #tpu.memory_space<vmem>>, vector<78x32xf32>
    tpu.vector_store %arg13[%c0_82, %c224], %58 {strides = array<i32>} : memref<112x288xf32, #tpu.memory_space<vmem>>, vector<78x32xf32>,
    %c36 = arith.constant 36 : index
    %c0_83 = arith.constant 0 : index
    %60 = vector.load %arg14[%c36, %c0_83] : memref<112x32xf32, #tpu.memory_space<vmem>>, vector<76x32xf32>
    %c0_84 = arith.constant 0 : index
    %c256 = arith.constant 256 : index
    %61 = vector.load %arg13[%c0_84, %c256] : memref<112x288xf32, #tpu.memory_space<vmem>>, vector<76x32xf32>
    tpu.vector_store %arg13[%c0_84, %c256], %60 {strides = array<i32>} : memref<112x288xf32, #tpu.memory_space<vmem>>, vector<76x32xf32>,
    %c0_85 = arith.constant 0 : index
    %c0_86 = arith.constant 0 : index
    %62 = vector.load %arg13[%c0_85, %c0_86] : memref<112x288xf32, #tpu.memory_space<vmem>>, vector<112x288xf32>
    %c0_87 = arith.constant 0 : index
    %c0_88 = arith.constant 0 : index
    %63 = vector.load %arg4[%c0_87, %c0_88] : memref<288x32xf32, #tpu.memory_space<vmem>>, vector<288x32xf32>
    %cst_89 = arith.constant dense<0.000000e+00> : vector<112x32xf32>
    %64 = tpu.matmul %62, %63, %cst_89 {dimension_numbers = #tpu.dot_dimension_numbers<[1], [0], [0], [1], [0, 0, 1, 1], [], []>} : vector<112x288xf32>, vector<288x32xf32>, vector<112x32xf32> -> vector<112x32xf32>
    %c0_90 = arith.constant 0 : index
    %c0_91 = arith.constant 0 : index
    %65 = vector.load %arg5[%c0_90, %c0_91] : memref<1x32xf32, #tpu.memory_space<vmem>>, vector<1x32xf32>
    %66 = vector.broadcast %65 : vector<1x32xf32> to vector<112x32xf32>
    %67 = arith.addf %64, %66 : vector<112x32xf32>
    %cst_92 = arith.constant 0.000000e+00 : f32
    %68 = vector.broadcast %cst_92 : f32 to vector<112x32xf32>
    %69 = arith.maximumf %67, %68 : vector<112x32xf32>
    %c0_93 = arith.constant 0 : index
    %c0_94 = arith.constant 0 : index
    %70 = vector.load %arg15[%c0_93, %c0_94] : memref<112x32xf32, #tpu.memory_space<vmem>>, vector<112x32xf32>
    tpu.vector_store %arg15[%c0_93, %c0_94], %69 {strides = array<i32>} : memref<112x32xf32, #tpu.memory_space<vmem>>, vector<112x32xf32>,
    %c0_95 = arith.constant 0 : index
    %c0_96 = arith.constant 0 : index
    %71 = vector.load %arg15[%c0_95, %c0_96] : memref<112x32xf32, #tpu.memory_space<vmem>>, vector<112x32xf32>
    %c0_97 = arith.constant 0 : index
    %c0_98 = arith.constant 0 : index
    %72 = vector.load %arg13[%c0_97, %c0_98] : memref<112x288xf32, #tpu.memory_space<vmem>>, vector<112x32xf32>
    tpu.vector_store %arg13[%c0_97, %c0_98], %71 {strides = array<i32>} : memref<112x288xf32, #tpu.memory_space<vmem>>, vector<112x32xf32>,
    %c2_99 = arith.constant 2 : index
    %c0_100 = arith.constant 0 : index
    %73 = vector.load %arg15[%c2_99, %c0_100] : memref<112x32xf32, #tpu.memory_space<vmem>>, vector<110x32xf32>
    %c0_101 = arith.constant 0 : index
    %c32_102 = arith.constant 32 : index
    %74 = vector.load %arg13[%c0_101, %c32_102] : memref<112x288xf32, #tpu.memory_space<vmem>>, vector<110x32xf32>
    tpu.vector_store %arg13[%c0_101, %c32_102], %73 {strides = array<i32>} : memref<112x288xf32, #tpu.memory_space<vmem>>, vector<110x32xf32>,
    %c4_103 = arith.constant 4 : index
    %c0_104 = arith.constant 0 : index
    %75 = vector.load %arg15[%c4_103, %c0_104] : memref<112x32xf32, #tpu.memory_space<vmem>>, vector<108x32xf32>
    %c0_105 = arith.constant 0 : index
    %c64_106 = arith.constant 64 : index
    %76 = vector.load %arg13[%c0_105, %c64_106] : memref<112x288xf32, #tpu.memory_space<vmem>>, vector<108x32xf32>
    tpu.vector_store %arg13[%c0_105, %c64_106], %75 {strides = array<i32>} : memref<112x288xf32, #tpu.memory_space<vmem>>, vector<108x32xf32>,
    %c16_107 = arith.constant 16 : index
    %c0_108 = arith.constant 0 : index
    %77 = vector.load %arg15[%c16_107, %c0_108] : memref<112x32xf32, #tpu.memory_space<vmem>>, vector<96x32xf32>
    %c0_109 = arith.constant 0 : index
    %c96_110 = arith.constant 96 : index
    %78 = vector.load %arg13[%c0_109, %c96_110] : memref<112x288xf32, #tpu.memory_space<vmem>>, vector<96x32xf32>
    tpu.vector_store %arg13[%c0_109, %c96_110], %77 {strides = array<i32>} : memref<112x288xf32, #tpu.memory_space<vmem>>, vector<96x32xf32>,
    %c18_111 = arith.constant 18 : index
    %c0_112 = arith.constant 0 : index
    %79 = vector.load %arg15[%c18_111, %c0_112] : memref<112x32xf32, #tpu.memory_space<vmem>>, vector<94x32xf32>
    %c0_113 = arith.constant 0 : index
    %c128_114 = arith.constant 128 : index
    %80 = vector.load %arg13[%c0_113, %c128_114] : memref<112x288xf32, #tpu.memory_space<vmem>>, vector<94x32xf32>
    tpu.vector_store %arg13[%c0_113, %c128_114], %79 {strides = array<i32>} : memref<112x288xf32, #tpu.memory_space<vmem>>, vector<94x32xf32>,
    %c20_115 = arith.constant 20 : index
    %c0_116 = arith.constant 0 : index
    %81 = vector.load %arg15[%c20_115, %c0_116] : memref<112x32xf32, #tpu.memory_space<vmem>>, vector<92x32xf32>
    %c0_117 = arith.constant 0 : index
    %c160_118 = arith.constant 160 : index
    %82 = vector.load %arg13[%c0_117, %c160_118] : memref<112x288xf32, #tpu.memory_space<vmem>>, vector<92x32xf32>
    tpu.vector_store %arg13[%c0_117, %c160_118], %81 {strides = array<i32>} : memref<112x288xf32, #tpu.memory_space<vmem>>, vector<92x32xf32>,
    %c32_119 = arith.constant 32 : index
    %c0_120 = arith.constant 0 : index
    %83 = vector.load %arg15[%c32_119, %c0_120] : memref<112x32xf32, #tpu.memory_space<vmem>>, vector<80x32xf32>
    %c0_121 = arith.constant 0 : index
    %c192_122 = arith.constant 192 : index
    %84 = vector.load %arg13[%c0_121, %c192_122] : memref<112x288xf32, #tpu.memory_space<vmem>>, vector<80x32xf32>
    tpu.vector_store %arg13[%c0_121, %c192_122], %83 {strides = array<i32>} : memref<112x288xf32, #tpu.memory_space<vmem>>, vector<80x32xf32>,
    %c34_123 = arith.constant 34 : index
    %c0_124 = arith.constant 0 : index
    %85 = vector.load %arg15[%c34_123, %c0_124] : memref<112x32xf32, #tpu.memory_space<vmem>>, vector<78x32xf32>
    %c0_125 = arith.constant 0 : index
    %c224_126 = arith.constant 224 : index
    %86 = vector.load %arg13[%c0_125, %c224_126] : memref<112x288xf32, #tpu.memory_space<vmem>>, vector<78x32xf32>
    tpu.vector_store %arg13[%c0_125, %c224_126], %85 {strides = array<i32>} : memref<112x288xf32, #tpu.memory_space<vmem>>, vector<78x32xf32>,
    %c36_127 = arith.constant 36 : index
    %c0_128 = arith.constant 0 : index
    %87 = vector.load %arg15[%c36_127, %c0_128] : memref<112x32xf32, #tpu.memory_space<vmem>>, vector<76x32xf32>
    %c0_129 = arith.constant 0 : index
    %c256_130 = arith.constant 256 : index
    %88 = vector.load %arg13[%c0_129, %c256_130] : memref<112x288xf32, #tpu.memory_space<vmem>>, vector<76x32xf32>
    tpu.vector_store %arg13[%c0_129, %c256_130], %87 {strides = array<i32>} : memref<112x288xf32, #tpu.memory_space<vmem>>, vector<76x32xf32>,
    %c0_131 = arith.constant 0 : index
    %c0_132 = arith.constant 0 : index
    %89 = vector.load %arg13[%c0_131, %c0_132] : memref<112x288xf32, #tpu.memory_space<vmem>>, vector<112x288xf32>
    %c0_133 = arith.constant 0 : index
    %c0_134 = arith.constant 0 : index
    %90 = vector.load %arg6[%c0_133, %c0_134] : memref<288x32xf32, #tpu.memory_space<vmem>>, vector<288x32xf32>
    %cst_135 = arith.constant dense<0.000000e+00> : vector<112x32xf32>
    %91 = tpu.matmul %89, %90, %cst_135 {dimension_numbers = #tpu.dot_dimension_numbers<[1], [0], [0], [1], [0, 0, 1, 1], [], []>} : vector<112x288xf32>, vector<288x32xf32>, vector<112x32xf32> -> vector<112x32xf32>
    %c0_136 = arith.constant 0 : index
    %c0_137 = arith.constant 0 : index
    %92 = vector.load %arg7[%c0_136, %c0_137] : memref<1x32xf32, #tpu.memory_space<vmem>>, vector<1x32xf32>
    %93 = vector.broadcast %92 : vector<1x32xf32> to vector<112x32xf32>
    %94 = arith.addf %91, %93 : vector<112x32xf32>
    %cst_138 = arith.constant 0.000000e+00 : f32
    %95 = vector.broadcast %cst_138 : f32 to vector<112x32xf32>
    %96 = arith.maximumf %94, %95 : vector<112x32xf32>
    %c0_139 = arith.constant 0 : index
    %c0_140 = arith.constant 0 : index
    %97 = vector.load %arg16[%c0_139, %c0_140] : memref<112x32xf32, #tpu.memory_space<vmem>>, vector<112x32xf32>
    tpu.vector_store %arg16[%c0_139, %c0_140], %96 {strides = array<i32>} : memref<112x32xf32, #tpu.memory_space<vmem>>, vector<112x32xf32>,
    %c0_141 = arith.constant 0 : index
    %c0_142 = arith.constant 0 : index
    %98 = vector.load %arg16[%c0_141, %c0_142] : memref<112x32xf32, #tpu.memory_space<vmem>>, vector<112x32xf32>
    %c0_143 = arith.constant 0 : index
    %c0_144 = arith.constant 0 : index
    %99 = vector.load %arg13[%c0_143, %c0_144] : memref<112x288xf32, #tpu.memory_space<vmem>>, vector<112x32xf32>
    tpu.vector_store %arg13[%c0_143, %c0_144], %98 {strides = array<i32>} : memref<112x288xf32, #tpu.memory_space<vmem>>, vector<112x32xf32>,
    %c2_145 = arith.constant 2 : index
    %c0_146 = arith.constant 0 : index
    %100 = vector.load %arg16[%c2_145, %c0_146] : memref<112x32xf32, #tpu.memory_space<vmem>>, vector<110x32xf32>
    %c0_147 = arith.constant 0 : index
    %c32_148 = arith.constant 32 : index
    %101 = vector.load %arg13[%c0_147, %c32_148] : memref<112x288xf32, #tpu.memory_space<vmem>>, vector<110x32xf32>
    tpu.vector_store %arg13[%c0_147, %c32_148], %100 {strides = array<i32>} : memref<112x288xf32, #tpu.memory_space<vmem>>, vector<110x32xf32>,
    %c4_149 = arith.constant 4 : index
    %c0_150 = arith.constant 0 : index
    %102 = vector.load %arg16[%c4_149, %c0_150] : memref<112x32xf32, #tpu.memory_space<vmem>>, vector<108x32xf32>
    %c0_151 = arith.constant 0 : index
    %c64_152 = arith.constant 64 : index
    %103 = vector.load %arg13[%c0_151, %c64_152] : memref<112x288xf32, #tpu.memory_space<vmem>>, vector<108x32xf32>
    tpu.vector_store %arg13[%c0_151, %c64_152], %102 {strides = array<i32>} : memref<112x288xf32, #tpu.memory_space<vmem>>, vector<108x32xf32>,
    %c16_153 = arith.constant 16 : index
    %c0_154 = arith.constant 0 : index
    %104 = vector.load %arg16[%c16_153, %c0_154] : memref<112x32xf32, #tpu.memory_space<vmem>>, vector<96x32xf32>
    %c0_155 = arith.constant 0 : index
    %c96_156 = arith.constant 96 : index
    %105 = vector.load %arg13[%c0_155, %c96_156] : memref<112x288xf32, #tpu.memory_space<vmem>>, vector<96x32xf32>
    tpu.vector_store %arg13[%c0_155, %c96_156], %104 {strides = array<i32>} : memref<112x288xf32, #tpu.memory_space<vmem>>, vector<96x32xf32>,
    %c18_157 = arith.constant 18 : index
    %c0_158 = arith.constant 0 : index
    %106 = vector.load %arg16[%c18_157, %c0_158] : memref<112x32xf32, #tpu.memory_space<vmem>>, vector<94x32xf32>
    %c0_159 = arith.constant 0 : index
    %c128_160 = arith.constant 128 : index
    %107 = vector.load %arg13[%c0_159, %c128_160] : memref<112x288xf32, #tpu.memory_space<vmem>>, vector<94x32xf32>
    tpu.vector_store %arg13[%c0_159, %c128_160], %106 {strides = array<i32>} : memref<112x288xf32, #tpu.memory_space<vmem>>, vector<94x32xf32>,
    %c20_161 = arith.constant 20 : index
    %c0_162 = arith.constant 0 : index
    %108 = vector.load %arg16[%c20_161, %c0_162] : memref<112x32xf32, #tpu.memory_space<vmem>>, vector<92x32xf32>
    %c0_163 = arith.constant 0 : index
    %c160_164 = arith.constant 160 : index
    %109 = vector.load %arg13[%c0_163, %c160_164] : memref<112x288xf32, #tpu.memory_space<vmem>>, vector<92x32xf32>
    tpu.vector_store %arg13[%c0_163, %c160_164], %108 {strides = array<i32>} : memref<112x288xf32, #tpu.memory_space<vmem>>, vector<92x32xf32>,
    %c32_165 = arith.constant 32 : index
    %c0_166 = arith.constant 0 : index
    %110 = vector.load %arg16[%c32_165, %c0_166] : memref<112x32xf32, #tpu.memory_space<vmem>>, vector<80x32xf32>
    %c0_167 = arith.constant 0 : index
    %c192_168 = arith.constant 192 : index
    %111 = vector.load %arg13[%c0_167, %c192_168] : memref<112x288xf32, #tpu.memory_space<vmem>>, vector<80x32xf32>
    tpu.vector_store %arg13[%c0_167, %c192_168], %110 {strides = array<i32>} : memref<112x288xf32, #tpu.memory_space<vmem>>, vector<80x32xf32>,
    %c34_169 = arith.constant 34 : index
    %c0_170 = arith.constant 0 : index
    %112 = vector.load %arg16[%c34_169, %c0_170] : memref<112x32xf32, #tpu.memory_space<vmem>>, vector<78x32xf32>
    %c0_171 = arith.constant 0 : index
    %c224_172 = arith.constant 224 : index
    %113 = vector.load %arg13[%c0_171, %c224_172] : memref<112x288xf32, #tpu.memory_space<vmem>>, vector<78x32xf32>
    tpu.vector_store %arg13[%c0_171, %c224_172], %112 {strides = array<i32>} : memref<112x288xf32, #tpu.memory_space<vmem>>, vector<78x32xf32>,
    %c36_173 = arith.constant 36 : index
    %c0_174 = arith.constant 0 : index
    %114 = vector.load %arg16[%c36_173, %c0_174] : memref<112x32xf32, #tpu.memory_space<vmem>>, vector<76x32xf32>
    %c0_175 = arith.constant 0 : index
    %c256_176 = arith.constant 256 : index
    %115 = vector.load %arg13[%c0_175, %c256_176] : memref<112x288xf32, #tpu.memory_space<vmem>>, vector<76x32xf32>
    tpu.vector_store %arg13[%c0_175, %c256_176], %114 {strides = array<i32>} : memref<112x288xf32, #tpu.memory_space<vmem>>, vector<76x32xf32>,
    %c0_177 = arith.constant 0 : index
    %c0_178 = arith.constant 0 : index
    %116 = vector.load %arg13[%c0_177, %c0_178] : memref<112x288xf32, #tpu.memory_space<vmem>>, vector<112x288xf32>
    %c0_179 = arith.constant 0 : index
    %c0_180 = arith.constant 0 : index
    %117 = vector.load %arg8[%c0_179, %c0_180] : memref<288x32xf32, #tpu.memory_space<vmem>>, vector<288x32xf32>
    %cst_181 = arith.constant dense<0.000000e+00> : vector<112x32xf32>
    %118 = tpu.matmul %116, %117, %cst_181 {dimension_numbers = #tpu.dot_dimension_numbers<[1], [0], [0], [1], [0, 0, 1, 1], [], []>} : vector<112x288xf32>, vector<288x32xf32>, vector<112x32xf32> -> vector<112x32xf32>
    %c0_182 = arith.constant 0 : index
    %c0_183 = arith.constant 0 : index
    %119 = vector.load %arg9[%c0_182, %c0_183] : memref<1x32xf32, #tpu.memory_space<vmem>>, vector<1x32xf32>
    %120 = vector.broadcast %119 : vector<1x32xf32> to vector<112x32xf32>
    %121 = arith.addf %118, %120 : vector<112x32xf32>
    %cst_184 = arith.constant 0.000000e+00 : f32
    %122 = vector.broadcast %cst_184 : f32 to vector<112x32xf32>
    %123 = arith.maximumf %121, %122 : vector<112x32xf32>
    %c0_185 = arith.constant 0 : index
    %c0_186 = arith.constant 0 : index
    %124 = vector.load %arg10[%c0_185, %c0_186] : memref<112x32xf32, #tpu.memory_space<vmem>>, vector<112x32xf32>
    tpu.vector_store %arg10[%c0_185, %c0_186], %123 {strides = array<i32>} : memref<112x32xf32, #tpu.memory_space<vmem>>, vector<112x32xf32>,
    return
  }
  func.func @transform_0(%arg0: i32) -> (i32, i32) {
    %c0_i32 = arith.constant 0 : i32
    %c0_i32_0 = arith.constant 0 : i32
    return %arg0, %c0_i32 : i32, i32
  }
  func.func @transform_1(%arg0: i32) -> (i32, i32) {
    %c0_i32 = arith.constant 0 : i32
    %c0_i32_0 = arith.constant 0 : i32
    %c0_i32_1 = arith.constant 0 : i32
    return %c0_i32, %c0_i32_0 : i32, i32
  }
  func.func @transform_2(%arg0: i32) -> (i32, i32) {
    %c0_i32 = arith.constant 0 : i32
    %c0_i32_0 = arith.constant 0 : i32
    %c0_i32_1 = arith.constant 0 : i32
    return %c0_i32, %c0_i32_0 : i32, i32
  }
  func.func @transform_3(%arg0: i32) -> (i32, i32) {
    %c0_i32 = arith.constant 0 : i32
    %c0_i32_0 = arith.constant 0 : i32
    %c0_i32_1 = arith.constant 0 : i32
    return %c0_i32, %c0_i32_0 : i32, i32
  }
  func.func @transform_4(%arg0: i32) -> (i32, i32) {
    %c0_i32 = arith.constant 0 : i32
    %c0_i32_0 = arith.constant 0 : i32
    %c0_i32_1 = arith.constant 0 : i32
    return %c0_i32, %c0_i32_0 : i32, i32
  }
  func.func @transform_5(%arg0: i32) -> (i32, i32) {
    %c0_i32 = arith.constant 0 : i32
    %c0_i32_0 = arith.constant 0 : i32
    %c0_i32_1 = arith.constant 0 : i32
    return %c0_i32, %c0_i32_0 : i32, i32
  }
  func.func @transform_6(%arg0: i32) -> (i32, i32) {
    %c0_i32 = arith.constant 0 : i32
    %c0_i32_0 = arith.constant 0 : i32
    %c0_i32_1 = arith.constant 0 : i32
    return %c0_i32, %c0_i32_0 : i32, i32
  }
  func.func @transform_7(%arg0: i32) -> (i32, i32) {
    %c0_i32 = arith.constant 0 : i32
    %c0_i32_0 = arith.constant 0 : i32
    %c0_i32_1 = arith.constant 0 : i32
    return %c0_i32, %c0_i32_0 : i32, i32
  }
  func.func @transform_8(%arg0: i32) -> (i32, i32) {
    %c0_i32 = arith.constant 0 : i32
    %c0_i32_0 = arith.constant 0 : i32
    %c0_i32_1 = arith.constant 0 : i32
    return %c0_i32, %c0_i32_0 : i32, i32
  }
  func.func @transform_9(%arg0: i32) -> (i32, i32) {
    %c0_i32 = arith.constant 0 : i32
    %c0_i32_0 = arith.constant 0 : i32
    return %arg0, %c0_i32 : i32, i32
  }
}

</mosaic_0001>

<bundles_post_ra>
// kernel: _lambda_.1
= control target key start
LH: loop header
LB: loop body
LE: loop exit
PB: predicated region body
PF: predicated region fallthrough
CT: control target
= control target key end

     0   :  { %14 = vsyncpa [#allocation9], 0  ;;  %s6024_s30 = smov 0   ;;  %s8211_s0 = inlined_call_operand.vmem [shape: f32[512,4], index: 0, kind: input, shape index: {}]   ;;  %s8212_s1 = inlined_call_operand.vmem [shape: f32[36,32], index: 1, kind: input, shape index: {}]   ;;  %s8213_s2 = inlined_call_operand.vmem [shape: f32[1,32], index: 2, kind: input, shape index: {}]   ;;  %s8214_s3 = inlined_call_operand.vmem [shape: f32[288,32], index: 3, kind: input, shape index: {}]   ;;  %s8215_s4 = inlined_call_operand.vmem [shape: f32[1,32], index: 4, kind: input, shape index: {}]   ;;  %s8216_s5 = inlined_call_operand.vmem [shape: f32[288,32], index: 5, kind: input, shape index: {}]   ;;  %s8217_s6 = inlined_call_operand.vmem [shape: f32[1,32], index: 6, kind: input, shape index: {}]   ;;  %s8218_s7 = inlined_call_operand.hbm [shape: f32[288,32], index: 7, kind: input, shape index: {}]   ;;  %s8219_s8 = inlined_call_operand.vmem [shape: f32[1,32], index: 8, kind: input, shape index: {}]   ;;  %s8220_s9 = inlined_call_operand.vmem [shape: f32[224,32], index: 9, kind: output, shape index: {}]  }
   0x1 LB: > { %s6030_s10 = sadd.s32 4294967295, %s5958_s30   ;;  %p5309_p0 = scmp.ge.s32.totalorder %s5958_s30, 1  ;;  %s5958_s30 = sphi %s6024_s30, %s20_s30  }
   0x2   : > { %p245_p1 = scmp.lt.s32.totalorder %s5958_s30, 3  ;;  %s5960_s11 = smov [#allocation8]  }
   0x3   : > { %s275_s12 = sshll.u32 %s5960_s11, 4  ;;  %p5897_p4 = scmp.eq.s32.totalorder %s6030_s10, 0  ;;  %s276_s12 = int_to_ptr.vmem [resolvable:$true] %s275_s12 }
   0x4   : > { %p6035_p3 = pnand %p5309_p0, %p245_p1  ;;  %s5933_s14 = scalar_lea.vmem %s276_s12, 4608 }
   0x5   : > { %p5934_p8 = scmp.ne.s32.totalorder %s276_s12, %s5933_s14  ;;  %p5941_p11 = scmp.lt.s32.totalorder %s276_s12, %s276_s12 }
   0x6   : > { %p5893_p5 = pneg %p6035_p3  ;;  %p5942_p12 = scmp.lt.s32.totalorder %s5933_s14, %s5933_s14 }
   0x8   : > { %p5894_p6 = pnand %p5897_p4, %p5893_p5  ;;  %p5943_p13 = por %p5942_p12, %p5941_p11 }
   0xa   : > { %p5924_p7 = pneg %p5894_p6 }
   0xc   : > { %p5936_p9 = pnand %p5934_p8, %p5924_p7 }
   0xe   : > { %p5937_p10 = pneg %p5936_p9 }
  0x10   : > { %p5944_p2 = pnand %p5943_p13, %p5937_p10 }
  0x12   : > { %5947 = shalt.err (!%p5944_p2)
}
  0x13   : > { %s5961_s15 = smov 128   ;;  %s5962_s16 = smov 8  }
  0x14   : > { %5896 = dma.hbm_to_vmem [thread:$0]  (!%p5894_p6), %s8218_s7, 4608, %s276_s12, [#allocation9], %s5961_s15, %s5961_s15, %s5962_s16  }
  0x15   : > { %303 = sbr.rel (%p6035_p3) target bundleno = 2012 (0x7dc), region = 56 }
  0x1a   : > { %5953 = dma.done.wait (%p5897_p4), [#allocation9], 4608  }
  0x1b   : > { %5955 = vsyncadd (%p5897_p4), [#allocation9], 4294962688  ;;  %s5314_s19 = sshll.u32 %s6030_s10, 5  ;;  %s345_s20 = smul.u32 14, %s6030_s10 }
  0x1c   : > { %p340_p0 = scmp.lt.s32.totalorder %s5314_s19, 63  ;;  %p8222_p2 = scmp.ne.s32.totalorder %s6030_s10, 0 }
  0x1d   : > { %p346_p1 = scmp.lt.s32.totalorder %s345_s20, 27 }
  0x1e   : > { %s8224_s19 = smov (!%p340_p0, %s5314_s19), 63  ;;  %354 = sbr.rel (%p8222_p2) target bundleno = 94 (0x5e), region = 64 }
  0x1f   : > { %s8226_s20 = smov (!%p346_p1, %s345_s20), 27  ;;  %s5315_s21 = sshll.u32 %s8224_s19, 3 }
  0x20   : > { %s6058_s24 = scalar_lea.vmem %s8211_s0, %s5315_s21  ;;  %s5316_s25 = sshll.u32 %s8226_s20, 3 }
  0x21   : > { %s6063_s28 = scalar_lea.vmem %s8220_s9, %s5316_s25 }
  0x23   : > { %vm355_vm0 = vcmask 293888   ;;  %vm390_vm1 = vcmask 261120   ;;  %v5963_v0 = vmov 0.0  }
  0x24   : > { %356 = vst.msk [vmem:[#allocation2] sm:$0xff] %vm355_vm0, %v5963_v0  ;;  %357 = vst.msk [vmem:[#allocation2 + $0x8] sm:$0xff] %vm355_vm0, %v5963_v0 }
  0x25   : > { %358 = vst.msk [vmem:[#allocation2 + $0x10] sm:$0xff] %vm355_vm0, %v5963_v0  ;;  %359 = vst.msk [vmem:[#allocation2 + $0x18] sm:$0xff] %vm355_vm0, %v5963_v0 }
  0x26   : > { %360 = vst.msk [vmem:[#allocation2 + $0x20] sm:$0xff] %vm355_vm0, %v5963_v0  ;;  %361 = vst.msk [vmem:[#allocation2 + $0x28] sm:$0xff] %vm355_vm0, %v5963_v0 }
  0x27   : > { %362 = vst.msk [vmem:[#allocation2 + $0x30] sm:$0xff] %vm355_vm0, %v5963_v0  ;;  %363 = vst.msk [vmem:[#allocation2 + $0x38] sm:$0xff] %vm355_vm0, %v5963_v0 }
  0x28   : > { %364 = vst.msk [vmem:[#allocation2 + $0x40] sm:$0xff] %vm355_vm0, %v5963_v0  ;;  %365 = vst.msk [vmem:[#allocation2 + $0x48] sm:$0xff] %vm355_vm0, %v5963_v0 }
  0x29   : > { %366 = vst.msk [vmem:[#allocation2 + $0x50] sm:$0xff] %vm355_vm0, %v5963_v0  ;;  %367 = vst.msk [vmem:[#allocation2 + $0x58] sm:$0xff] %vm355_vm0, %v5963_v0 }
  0x2a   : > { %368 = vst.msk [vmem:[#allocation2 + $0x60] sm:$0xff] %vm355_vm0, %v5963_v0  ;;  %369 = vst.msk [vmem:[#allocation2 + $0x68] sm:$0xff] %vm355_vm0, %v5963_v0 }
  0x2b   : > { %370 = vst.msk [vmem:[#allocation2 + $0x70] sm:$0xff] %vm355_vm0, %v5963_v0  ;;  %371 = vst.msk [vmem:[#allocation2 + $0x78] sm:$0xff] %vm355_vm0, %v5963_v0 }
  0x2c   : > { %372 = vst.msk [vmem:[#allocation2 + $0x80] sm:$0xff] %vm355_vm0, %v5963_v0  ;;  %373 = vst.msk [vmem:[#allocation2 + $0x88] sm:$0xff] %vm355_vm0, %v5963_v0 }
  0x2d   : > { %374 = vst.msk [vmem:[#allocation2 + $0x90] sm:$0xff] %vm355_vm0, %v5963_v0  ;;  %375 = vst.msk [vmem:[#allocation2 + $0x98] sm:$0xff] %vm355_vm0, %v5963_v0 }
  0x2e   : > { %376 = vst.msk [vmem:[#allocation2 + $0xa0] sm:$0xff] %vm355_vm0, %v5963_v0  ;;  %377 = vst.msk [vmem:[#allocation2 + $0xa8] sm:$0xff] %vm355_vm0, %v5963_v0 }
  0x2f   : > { %378 = vst.msk [vmem:[#allocation2 + $0xb0] sm:$0xff] %vm355_vm0, %v5963_v0  ;;  %379 = vst.msk [vmem:[#allocation2 + $0xb8] sm:$0xff] %vm355_vm0, %v5963_v0 }
  0x30   : > { %380 = vst.msk [vmem:[#allocation2 + $0xc0] sm:$0xff] %vm355_vm0, %v5963_v0  ;;  %381 = vst.msk [vmem:[#allocation2 + $0xc8] sm:$0xff] %vm355_vm0, %v5963_v0 }
  0x31   : > { %382 = vst.msk [vmem:[#allocation2 + $0xd0] sm:$0xff] %vm355_vm0, %v5963_v0  ;;  %383 = vst.msk [vmem:[#allocation2 + $0xd8] sm:$0xff] %vm355_vm0, %v5963_v0 }
  0x32   : > { %384 = vst.msk [vmem:[#allocation2 + $0xe0] sm:$0xff] %vm355_vm0, %v5963_v0  ;;  %385 = vst.msk [vmem:[#allocation2 + $0xe8] sm:$0xff] %vm355_vm0, %v5963_v0 }
  0x33   : > { %386 = vst.msk [vmem:[#allocation2 + $0xf0] sm:$0xff] %vm355_vm0, %v5963_v0  ;;  %387 = vst.msk [vmem:[#allocation2 + $0xf8] sm:$0xff] %vm355_vm0, %v5963_v0 }
  0x34   : > { %388 = vst [vmem:[#allocation4] sm:$0xff] %v5963_v0  ;;  %389 = vst [vmem:[#allocation4 + $0x8] sm:$0xff] %v5963_v0 }
  0x35   : > { %392 = vst [vmem:[#allocation4 + $0x18] sm:$0xff] %v5963_v0  ;;  %393 = vst [vmem:[#allocation4 + $0x20] sm:$0xff] %v5963_v0 }
  0x36   : > { %395 = vst [vmem:[#allocation4 + $0x30] sm:$0xff] %v5963_v0  ;;  %396 = vst [vmem:[#allocation4 + $0x38] sm:$0xff] %v5963_v0 }
  0x37   : > { %398 = vst [vmem:[#allocation4 + $0x48] sm:$0xff] %v5963_v0  ;;  %399 = vst [vmem:[#allocation4 + $0x50] sm:$0xff] %v5963_v0 }
  0x38   : > { %401 = vst [vmem:[#allocation4 + $0x60] sm:$0xff] %v5963_v0  ;;  %402 = vst [vmem:[#allocation4 + $0x68] sm:$0xff] %v5963_v0 }
  0x39   : > { %404 = vst [vmem:[#allocation4 + $0x78] sm:$0xff] %v5963_v0  ;;  %405 = vst [vmem:[#allocation4 + $0x80] sm:$0xff] %v5963_v0 }
  0x3a   : > { %407 = vst [vmem:[#allocation4 + $0x90] sm:$0xff] %v5963_v0  ;;  %408 = vst [vmem:[#allocation4 + $0x98] sm:$0xff] %v5963_v0 }
  0x3b   : > { %410 = vst [vmem:[#allocation4 + $0xa8] sm:$0xff] %v5963_v0  ;;  %411 = vst [vmem:[#allocation4 + $0xb0] sm:$0xff] %v5963_v0 }
  0x3c   : > { %413 = vst [vmem:[#allocation4 + $0xc0] sm:$0xff] %v5963_v0  ;;  %414 = vst [vmem:[#allocation4 + $0xc8] sm:$0xff] %v5963_v0 }
  0x3d   : > { %416 = vst [vmem:[#allocation4 + $0xd8] sm:$0xff] %v5963_v0  ;;  %417 = vst [vmem:[#allocation4 + $0xe0] sm:$0xff] %v5963_v0 }
  0x3e   : > { %419 = vst [vmem:[#allocation4 + $0xf0] sm:$0xff] %v5963_v0  ;;  %420 = vst [vmem:[#allocation4 + $0xf8] sm:$0xff] %v5963_v0 }
  0x3f   : > { %422 = vst [vmem:[#allocation4 + $0x108] sm:$0xff] %v5963_v0  ;;  %423 = vst [vmem:[#allocation4 + $0x110] sm:$0xff] %v5963_v0 }
  0x40   : > { %425 = vst [vmem:[#allocation4 + $0x120] sm:$0xff] %v5963_v0  ;;  %426 = vst [vmem:[#allocation4 + $0x128] sm:$0xff] %v5963_v0 }
  0x41   : > { %428 = vst [vmem:[#allocation4 + $0x138] sm:$0xff] %v5963_v0  ;;  %429 = vst [vmem:[#allocation4 + $0x140] sm:$0xff] %v5963_v0 }
  0x42   : > { %391 = vst.msk [vmem:[#allocation4 + $0x10] sm:$0xff] %vm390_vm1, %v5963_v0  ;;  %394 = vst.msk [vmem:[#allocation4 + $0x28] sm:$0xff] %vm390_vm1, %v5963_v0 }
  0x43   : > { %397 = vst.msk [vmem:[#allocation4 + $0x40] sm:$0xff] %vm390_vm1, %v5963_v0  ;;  %400 = vst.msk [vmem:[#allocation4 + $0x58] sm:$0xff] %vm390_vm1, %v5963_v0 }
  0x44   : > { %403 = vst.msk [vmem:[#allocation4 + $0x70] sm:$0xff] %vm390_vm1, %v5963_v0  ;;  %406 = vst.msk [vmem:[#allocation4 + $0x88] sm:$0xff] %vm390_vm1, %v5963_v0 }
  0x45   : > { %409 = vst.msk [vmem:[#allocation4 + $0xa0] sm:$0xff] %vm390_vm1, %v5963_v0  ;;  %412 = vst.msk [vmem:[#allocation4 + $0xb8] sm:$0xff] %vm390_vm1, %v5963_v0 }
  0x46   : > { %415 = vst.msk [vmem:[#allocation4 + $0xd0] sm:$0xff] %vm390_vm1, %v5963_v0  ;;  %418 = vst.msk [vmem:[#allocation4 + $0xe8] sm:$0xff] %vm390_vm1, %v5963_v0 }
  0x47   : > { %421 = vst.msk [vmem:[#allocation4 + $0x100] sm:$0xff] %vm390_vm1, %v5963_v0  ;;  %424 = vst.msk [vmem:[#allocation4 + $0x118] sm:$0xff] %vm390_vm1, %v5963_v0 }
  0x48   : > { %427 = vst.msk [vmem:[#allocation4 + $0x130] sm:$0xff] %vm390_vm1, %v5963_v0  ;;  %430 = vst.msk [vmem:[#allocation4 + $0x148] sm:$0xff] %vm390_vm1, %v5963_v0 }
  0x49   : > { %431 = vst.msk [vmem:[#allocation5] sm:$0xff] %vm390_vm1, %v5963_v0  ;;  %432 = vst.msk [vmem:[#allocation5 + $0x8] sm:$0xff] %vm390_vm1, %v5963_v0 }
  0x4a   : > { %433 = vst.msk [vmem:[#allocation5 + $0x10] sm:$0xff] %vm390_vm1, %v5963_v0  ;;  %434 = vst.msk [vmem:[#allocation5 + $0x18] sm:$0xff] %vm390_vm1, %v5963_v0 }
  0x4b   : > { %435 = vst.msk [vmem:[#allocation5 + $0x20] sm:$0xff] %vm390_vm1, %v5963_v0  ;;  %436 = vst.msk [vmem:[#allocation5 + $0x28] sm:$0xff] %vm390_vm1, %v5963_v0 }
  0x4c   : > { %437 = vst.msk [vmem:[#allocation5 + $0x30] sm:$0xff] %vm390_vm1, %v5963_v0  ;;  %438 = vst.msk [vmem:[#allocation5 + $0x38] sm:$0xff] %vm390_vm1, %v5963_v0 }
  0x4d   : > { %439 = vst.msk [vmem:[#allocation5 + $0x40] sm:$0xff] %vm390_vm1, %v5963_v0  ;;  %440 = vst.msk [vmem:[#allocation5 + $0x48] sm:$0xff] %vm390_vm1, %v5963_v0 }
  0x4e   : > { %441 = vst.msk [vmem:[#allocation5 + $0x50] sm:$0xff] %vm390_vm1, %v5963_v0  ;;  %442 = vst.msk [vmem:[#allocation5 + $0x58] sm:$0xff] %vm390_vm1, %v5963_v0 }
  0x4f   : > { %443 = vst.msk [vmem:[#allocation5 + $0x60] sm:$0xff] %vm390_vm1, %v5963_v0  ;;  %444 = vst.msk [vmem:[#allocation5 + $0x68] sm:$0xff] %vm390_vm1, %v5963_v0 }
  0x50   : > { %445 = vst.msk [vmem:[#allocation6] sm:$0xff] %vm390_vm1, %v5963_v0  ;;  %446 = vst.msk [vmem:[#allocation6 + $0x8] sm:$0xff] %vm390_vm1, %v5963_v0 }
  0x51   : > { %447 = vst.msk [vmem:[#allocation6 + $0x10] sm:$0xff] %vm390_vm1, %v5963_v0  ;;  %448 = vst.msk [vmem:[#allocation6 + $0x18] sm:$0xff] %vm390_vm1, %v5963_v0 }
  0x52   : > { %449 = vst.msk [vmem:[#allocation6 + $0x20] sm:$0xff] %vm390_vm1, %v5963_v0  ;;  %450 = vst.msk [vmem:[#allocation6 + $0x28] sm:$0xff] %vm390_vm1, %v5963_v0 }
  0x53   : > { %451 = vst.msk [vmem:[#allocation6 + $0x30] sm:$0xff] %vm390_vm1, %v5963_v0  ;;  %452 = vst.msk [vmem:[#allocation6 + $0x38] sm:$0xff] %vm390_vm1, %v5963_v0 }
  0x54   : > { %453 = vst.msk [vmem:[#allocation6 + $0x40] sm:$0xff] %vm390_vm1, %v5963_v0  ;;  %454 = vst.msk [vmem:[#allocation6 + $0x48] sm:$0xff] %vm390_vm1, %v5963_v0 }
  0x55   : > { %455 = vst.msk [vmem:[#allocation6 + $0x50] sm:$0xff] %vm390_vm1, %v5963_v0  ;;  %456 = vst.msk [vmem:[#allocation6 + $0x58] sm:$0xff] %vm390_vm1, %v5963_v0 }
  0x56   : > { %457 = vst.msk [vmem:[#allocation6 + $0x60] sm:$0xff] %vm390_vm1, %v5963_v0  ;;  %458 = vst.msk [vmem:[#allocation6 + $0x68] sm:$0xff] %vm390_vm1, %v5963_v0 }
  0x57   : > { %459 = vst.msk [vmem:[#allocation7] sm:$0xff] %vm390_vm1, %v5963_v0  ;;  %460 = vst.msk [vmem:[#allocation7 + $0x8] sm:$0xff] %vm390_vm1, %v5963_v0 }
  0x58   : > { %461 = vst.msk [vmem:[#allocation7 + $0x10] sm:$0xff] %vm390_vm1, %v5963_v0  ;;  %462 = vst.msk [vmem:[#allocation7 + $0x18] sm:$0xff] %vm390_vm1, %v5963_v0 }
  0x59   : > { %463 = vst.msk [vmem:[#allocation7 + $0x20] sm:$0xff] %vm390_vm1, %v5963_v0  ;;  %464 = vst.msk [vmem:[#allocation7 + $0x28] sm:$0xff] %vm390_vm1, %v5963_v0 }
  0x5a   : > { %465 = vst.msk [vmem:[#allocation7 + $0x30] sm:$0xff] %vm390_vm1, %v5963_v0  ;;  %466 = vst.msk [vmem:[#allocation7 + $0x38] sm:$0xff] %vm390_vm1, %v5963_v0 }
  0x5b   : > { %467 = vst.msk [vmem:[#allocation7 + $0x40] sm:$0xff] %vm390_vm1, %v5963_v0  ;;  %468 = vst.msk [vmem:[#allocation7 + $0x48] sm:$0xff] %vm390_vm1, %v5963_v0 }
  0x5c   : > { %469 = vst.msk [vmem:[#allocation7 + $0x50] sm:$0xff] %vm390_vm1, %v5963_v0  ;;  %470 = vst.msk [vmem:[#allocation7 + $0x58] sm:$0xff] %vm390_vm1, %v5963_v0 }
  0x5d   : > { %471 = vst.msk [vmem:[#allocation7 + $0x60] sm:$0xff] %vm390_vm1, %v5963_v0  ;;  %472 = vst.msk [vmem:[#allocation7 + $0x68] sm:$0xff] %vm390_vm1, %v5963_v0 }
  0x5e PF: > { %v732_v1 = vld [vmem:[%s6058_s24 + $0x2] sm:$0xff]  ;;  %s5964_s29 = smov 8   ;;  %s5965_s10 = smov 4   ;;  %v927_v3 = vld [vmem:[%s6058_s24 + $0x18] sm:$0xff]  ;;  %vm505_vm2 = vcmask 31744   ;;  %v733_v4 = vld [vmem:[%s6058_s24 + $0xa] sm:$0xff] }
  0x5f   : > { %v538_v2 = vld [vmem:[%s6058_s24 + $0x1] sm:$0xff]  ;;  %796 = vrot.lane.b32.xlu1 %v732_v1, %s5964_s29  ;;  %v539_v5 = vld [vmem:[%s6058_s24 + $0x9] sm:$0xff]  ;;  %509 = vst.msk [vmem:[#allocation2 + $0x18] sm:$0xff] %vm505_vm2, %v927_v3  ;;  %v6291_v10 = vld [vmem:[%s6058_s24 + $0x38] sm:$0xff]  ;;  %s5966_s11 = smov 12   ;;  %s5967_s12 = smov 16  }
  0x60   : > { %602 = vrot.lane.b32.xlu0 %v538_v2, %s5965_s10  ;;  %v926_v6 = vld [vmem:[%s6058_s24 + $0x10] sm:$0xff]  ;;  %v1471_v7 = vld [vmem:[%s6058_s24 + $0x20] sm:$0xff]  ;;  %v1472_v8 = vld [vmem:[%s6058_s24 + $0x28] sm:$0xff]  ;;  %513 = vst.msk [vmem:[#allocation2 + $0x38] sm:$0xff] %vm505_vm2, %v6291_v10  ;;  %s5968_s13 = smov 20   ;;  %s5969_s14 = smov 24  }
  0x61   : > { %508 = vst.msk [vmem:[#allocation2 + $0x10] sm:$0xff] %vm505_vm2, %v926_v6  ;;  %510 = vst.msk [vmem:[#allocation2 + $0x20] sm:$0xff] %vm505_vm2, %v1471_v7  ;;  %v6288_v9 = vld [vmem:[%s6058_s24 + $0x30] sm:$0xff]  ;;  %v6298_v11 = vld [vmem:[%s6058_s24 + $0x40] sm:$0xff]  ;;  %s5970_s15 = smov 28   ;;  %vm2121_vm3 = vcmask 1043456  }
  0x62   : > { %511 = vst.msk [vmem:[#allocation2 + $0x28] sm:$0xff] %vm505_vm2, %v1472_v8  ;;  %512 = vst.msk [vmem:[#allocation2 + $0x30] sm:$0xff] %vm505_vm2, %v6288_v9  ;;  %v6301_v12 = vld [vmem:[%s6058_s24 + $0x48] sm:$0xff]  ;;  %v540_v13 = vld [vmem:[%s6058_s24 + $0x11] sm:$0xff]  ;;  %s5971_s25 = smov 32   ;;  %vm698_vm4 = vcmask 64544  }
  0x63   : > { %798 = vrot.lane.b32.xlu1 %v733_v4, %s5964_s29  ;;  %514 = vst.msk [vmem:[#allocation2 + $0x40] sm:$0xff] %vm505_vm2, %v6298_v11  ;;  %515 = vst.msk [vmem:[#allocation2 + $0x48] sm:$0xff] %vm505_vm2, %v6301_v12  ;;  %v473_v14 = vld [vmem:[%s6058_s24] sm:$0xff]  ;;  %v474_v15 = vld [vmem:[%s6058_s24 + $0x8] sm:$0xff]  ;;  %vm892_vm5 = vcmask 97344   ;;  %vm1076_vm6 = vcmask 130144  }
  0x64   : > { %604 = vrot.lane.b32.xlu0 %v539_v5, %s5965_s10  ;;  %506 = vst.msk [vmem:[#allocation2] sm:$0xff] %vm505_vm2, %v473_v14  ;;  %507 = vst.msk [vmem:[#allocation2 + $0x8] sm:$0xff] %vm505_vm2, %v474_v15  ;;  %v6315_v16 = vld [vmem:[%s6058_s24 + $0x50] sm:$0xff]  ;;  %v6318_v17 = vld [vmem:[%s6058_s24 + $0x58] sm:$0xff]  ;;  %vm1257_vm7 = vcmask 162944   ;;  %vm1439_vm8 = vcmask 195744  }
  0x65   : > { %516 = vst.msk [vmem:[#allocation2 + $0x50] sm:$0xff] %vm505_vm2, %v6315_v16  ;;  %517 = vst.msk [vmem:[#allocation2 + $0x58] sm:$0xff] %vm505_vm2, %v6318_v17  ;;  %v1289_v18 = vld [vmem:[%s6058_s24 + $0x12] sm:$0xff]  ;;  %v1290_v20 = vld [vmem:[%s6058_s24 + $0x1a] sm:$0xff]  ;;  %vm1611_vm9 = vcmask 228544   ;;  %vm1780_vm10 = vcmask 261344  }
  0x66   : > { %v1108_v19 = vld [vmem:[%s6058_s24 + $0x19] sm:$0xff]  ;;  %v1640_v22 = vld [vmem:[%s6058_s24 + $0x21] sm:$0xff]  ;;  %v2014_v26 = vld [vmem:[%s8212_s1 + $0x10] sm:$0xff]  ;;  %vm1950_vm11 = vcmask 294144   ;;  %vm2024_vm12 = vcmask 293888   ;;  %vm2382_vm13 = vcmask 261120  }
  0x67   : > { %988 = vrot.lane.b32.xlu1 %v927_v3, %s5966_s11  ;;  %v6334_v21 = vld [vmem:[%s6058_s24 + $0x60] sm:$0xff]  ;;  %v6344_v23 = vld [vmem:[%s6058_s24 + $0x68] sm:$0xff]  ;;  %v2015_v25 = vld [vmem:[%s8212_s1 + $0x18] sm:$0xff]  ;;  %s5972_s18 = smov 64   ;;  %s5973_s19 = smov 96   ;;  %vm2541_vm14 = vcmask 523520  }
  0x68   : > { %986 = vrot.lane.b32.xlu0 %v926_v6, %s5966_s11  ;;  %518 = vst.msk [vmem:[#allocation2 + $0x60] sm:$0xff] %vm505_vm2, %v6334_v21  ;;  %v2016_v24 = vld [vmem:[%s8212_s1 + $0x20] sm:$0xf]  ;;  %519 = vst.msk [vmem:[#allocation2 + $0x68] sm:$0xff] %vm505_vm2, %v6344_v23  ;;  %v1641_v28 = vld [vmem:[%s6058_s24 + $0x29] sm:$0xff]  ;;  %vm2627_vm15 = vcmask 785920  }
  0x69   : > { %5712 = vmatprep.subr.msk.mxu0 %vm2121_vm3, %v2016_v24  ;;  %v1810_v27 = vld [vmem:[%s6058_s24 + $0x22] sm:$0xff]  ;;  %v1811_v31 = vld [vmem:[%s6058_s24 + $0x2a] sm:$0xff]  ;;  %v6391_v34 = vld [vmem:[%s6058_s24 + $0x78] sm:$0xff]  ;;  %vm2703_vm0 = vcmask 1048320   ;;  %vm1808_vm1 = vcmask 260320  }
  0x6a   : > { %5713 = vmatpush3.msk.msra.mxu0 %vm2121_vm3, %v2016_v24  ;;  %v2013_v29 = vld [vmem:[%s8212_s1 + $0x8] sm:$0xff]  ;;  %v2012_v30 = vld [vmem:[%s8212_s1] sm:$0xff]  ;;  %v6379_v32 = vld [vmem:[%s6058_s24 + $0x70] sm:$0xff]  ;;  %521 = vst.msk [vmem:[#allocation2 + $0x78] sm:$0xff] %vm505_vm2, %v6391_v34  ;;  %vm730_vm3 = vcmask 63520  }
  0x6b   : > { %606 = vrot.lane.b32.xlu1 %v540_v13, %s5965_s10  ;;  %5714 = vmatprep.subr.mxu0 %v2015_v25  ;;  %520 = vst.msk [vmem:[#allocation2 + $0x70] sm:$0xff] %vm505_vm2, %v6379_v32  ;;  %v1642_v33 = vld [vmem:[%s6058_s24 + $0x31] sm:$0xff]  ;;  %v1643_v36 = vld [vmem:[%s6058_s24 + $0x39] sm:$0xff]  ;;  %v1644_v39 = vld [vmem:[%s6058_s24 + $0x41] sm:$0xff] }
  0x6c   : > { %1167 = vrot.lane.b32.xlu0 %v540_v13, %s5967_s12  ;;  %5715 = vmatpush3.msra.mxu0 %v2015_v25  ;;  %v1812_v35 = vld [vmem:[%s6058_s24 + $0x32] sm:$0xff]  ;;  %v1813_v37 = vld [vmem:[%s6058_s24 + $0x3a] sm:$0xff]  ;;  %v6425_v40 = vld [vmem:[%s6058_s24 + $0x88] sm:$0xff] }
  0x6d   : > { %5716 = vmatprep.subr.mxu0 %v2014_v26  ;;  %v6413_v38 = vld [vmem:[%s6058_s24 + $0x80] sm:$0xff]  ;;  %523 = vst.msk [vmem:[#allocation2 + $0x88] sm:$0xff] %vm505_vm2, %v6425_v40  ;;  %v1645_v42 = vld [vmem:[%s6058_s24 + $0x49] sm:$0xff]  ;;  %v1646_v51 = vld [vmem:[%s6058_s24 + $0x51] sm:$0xff] }
  0x6e   : > { %5717 = vmatpush3.msra.mxu0 %v2014_v26  ;;  %522 = vst.msk [vmem:[#allocation2 + $0x80] sm:$0xff] %vm505_vm2, %v6413_v38  ;;  %v1814_v41 = vld [vmem:[%s6058_s24 + $0x42] sm:$0xff]  ;;  %v1815_v43 = vld [vmem:[%s6058_s24 + $0x4a] sm:$0xff]  ;;  %v6467_v54 = vld [vmem:[%s6058_s24 + $0x98] sm:$0xff] }
  0x6f   : > { %1349 = vrot.lane.b32.xlu1 %v1289_v18, %s5968_s13  ;;  %5718 = vmatprep.subr.mxu0 %v2013_v29  ;;  %v6450_v48 = vld [vmem:[%s6058_s24 + $0x90] sm:$0xff]  ;;  %525 = vst.msk [vmem:[#allocation2 + $0x98] sm:$0xff] %vm505_vm2, %v6467_v54  ;;  %v1647_v58 = vld [vmem:[%s6058_s24 + $0x59] sm:$0xff] }
  0x70   : > { %1169 = vrot.lane.b32.xlu0 %v1108_v19, %s5967_s12  ;;  %5719 = vmatpush3.msra.mxu0 %v2013_v29  ;;  %524 = vst.msk [vmem:[#allocation2 + $0x90] sm:$0xff] %vm505_vm2, %v6450_v48  ;;  %v1816_v57 = vld [vmem:[%s6058_s24 + $0x52] sm:$0xff]  ;;  %v1817_v63 = vld [vmem:[%s6058_s24 + $0x5a] sm:$0xff] }
  0x71   : > { %5720 = vmatprep.subr.mxu0 %v2012_v30  ;;  %v6501_v6 = vld [vmem:[%s6058_s24 + $0xa0] sm:$0xff] }
  0x72   : > { %5721 = vmatpush3.msra.mxu0 %v2012_v30  ;;  %526 = vst.msk [vmem:[#allocation2 + $0xa0] sm:$0xff] %vm505_vm2, %v6501_v6  ;;  %v6553_v30 = vld [vmem:[%s6058_s24 + $0xb0] sm:$0xff] }
  0x73   : > { %800 = vrot.lane.b32.xlu1 %v1289_v18, %s5964_s29  ;;  %528 = vst.msk [vmem:[#allocation2 + $0xb0] sm:$0xff] %vm505_vm2, %v6553_v30 }
  0x74   : > { %608 = vrot.lane.b32.xlu0 %v1108_v19, %s5965_s10 }
  0x77   : > { %1527 = vrot.lane.b32.xlu1 %v1471_v7, %s5969_s14 }
  0x78   : > { %1351 = vrot.lane.b32.xlu0 %v1290_v20, %s5968_s13 }
  0x7b   : > { %990 = vrot.lane.b32.xlu1 %v1471_v7, %s5966_s11 }
  0x7c   : > { %802 = vrot.lane.b32.xlu0 %v1290_v20, %s5964_s29 }
  0x7f   : > { %1696 = vrot.lane.b32.xlu1 %v1640_v22, %s5970_s15 }
  0x80   : > { %1529 = vrot.lane.b32.xlu0 %v1472_v8, %s5969_s14 }
  0x83   : > { %1171 = vrot.lane.b32.xlu1 %v1640_v22, %s5967_s12 }
  0x84   : > { %992 = vrot.lane.b32.xlu0 %v1472_v8, %s5966_s11 }
  0x87   : > { %1866 = vrot.lane.b32.xlu1 %v1810_v27, %s5971_s25 }
  0x88   : > { %1698 = vrot.lane.b32.xlu0 %v1641_v28, %s5970_s15 }
  0x8b   : > { %1173 = vrot.lane.b32.xlu1 %v1641_v28, %s5967_s12 }
  0x8c   : > { %610 = vrot.lane.b32.xlu0 %v1640_v22, %s5965_s10 }
  0x8f   : > { %1868 = vrot.lane.b32.xlu1 %v1811_v31, %s5971_s25 }
  0x90   : > { %1353 = vrot.lane.b32.xlu0 %v1810_v27, %s5968_s13 }
  0x93   : > { %804 = vrot.lane.b32.xlu1 %v1810_v27, %s5964_s29 }
  0x94   : > { %612 = vrot.lane.b32.xlu0 %v1641_v28, %s5965_s10 }
  0x97   : > { %1531 = vrot.lane.b32.xlu1 %v6288_v9, %s5969_s14 }
  0x98   : > { %1355 = vrot.lane.b32.xlu0 %v1811_v31, %s5968_s13 }
  0x9b   : > { %994 = vrot.lane.b32.xlu1 %v6288_v9, %s5966_s11  ;;  %v1648_v9 = vld [vmem:[%s6058_s24 + $0x61] sm:$0xff] }
  0x9c   : > { %806 = vrot.lane.b32.xlu0 %v1811_v31, %s5964_s29 }
  0x9f   : > { %1700 = vrot.lane.b32.xlu1 %v1642_v33, %s5970_s15 }
  0xa0   : > { %1533 = vrot.lane.b32.xlu0 %v6291_v10, %s5969_s14 }
  0xa3   : > { %1175 = vrot.lane.b32.xlu1 %v1642_v33, %s5967_s12 }
  0xa4   : > { %996 = vrot.lane.b32.xlu0 %v6291_v10, %s5966_s11 }
  0xa7   : > { %1870 = vrot.lane.b32.xlu1 %v1812_v35, %s5971_s25 }
  0xa8   : > { %1702 = vrot.lane.b32.xlu0 %v1643_v36, %s5970_s15 }
  0xab   : > { %1177 = vrot.lane.b32.xlu1 %v1643_v36, %s5967_s12 }
  0xac   : > { %614 = vrot.lane.b32.xlu0 %v1642_v33, %s5965_s10 }
  0xaf   : > { %1872 = vrot.lane.b32.xlu1 %v1813_v37, %s5971_s25 }
  0xb0   : > { %1357 = vrot.lane.b32.xlu0 %v1812_v35, %s5968_s13 }
  0xb3   : > { %808 = vrot.lane.b32.xlu1 %v1812_v35, %s5964_s29  ;;  %v1650_v35 = vld [vmem:[%s6058_s24 + $0x71] sm:$0xff] }
  0xb4   : > { %616 = vrot.lane.b32.xlu0 %v1643_v36, %s5965_s10 }
  0xb7   : > { %1535 = vrot.lane.b32.xlu1 %v6298_v11, %s5969_s14 }
  0xb8   : > { %1359 = vrot.lane.b32.xlu0 %v1813_v37, %s5968_s13 }
  0xbb   : > { %998 = vrot.lane.b32.xlu1 %v6298_v11, %s5966_s11 }
  0xbc   : > { %810 = vrot.lane.b32.xlu0 %v1813_v37, %s5964_s29 }
  0xbf   : > { %1704 = vrot.lane.b32.xlu1 %v1644_v39, %s5970_s15 }
  0xc0   : > { %1537 = vrot.lane.b32.xlu0 %v6301_v12, %s5969_s14 }
  0xc3   : > { %1179 = vrot.lane.b32.xlu1 %v1644_v39, %s5967_s12 }
  0xc4   : > { %1000 = vrot.lane.b32.xlu0 %v6301_v12, %s5966_s11  ;;  %v6517_v12 = vld [vmem:[%s6058_s24 + $0xa8] sm:$0xff] }
  0xc5   : > { %527 = vst.msk [vmem:[#allocation2 + $0xa8] sm:$0xff] %vm505_vm2, %v6517_v12 }
  0xc7   : > { %1874 = vrot.lane.b32.xlu1 %v1814_v41, %s5971_s25 }
  0xc8   : > { %1706 = vrot.lane.b32.xlu0 %v1645_v42, %s5970_s15 }
  0xcb   : > { %1181 = vrot.lane.b32.xlu1 %v1645_v42, %s5967_s12 }
  0xcc   : > { %618 = vrot.lane.b32.xlu0 %v1644_v39, %s5965_s10  ;;  %v6569_v39 = vld [vmem:[%s6058_s24 + $0xb8] sm:$0xff] }
  0xcd   : > { %529 = vst.msk [vmem:[#allocation2 + $0xb8] sm:$0xff] %vm505_vm2, %v6569_v39 }
  0xcf   : > { %1876 = vrot.lane.b32.xlu1 %v1815_v43, %s5971_s25 }
  0xd0   : > { %1361 = vrot.lane.b32.xlu0 %v1814_v41, %s5968_s13 }
  0xd1   : > { %v797_v44 = vpop.permute.xlu1 %796 }
  0xd2   : > { %v603_v45 = vpop.permute.xlu0 %602 }
  0xd3   : > { %699 = vst.msk [vmem:[#allocation2] sm:$0xff] %vm698_vm4, %v603_v45  ;;  %812 = vrot.lane.b32.xlu1 %v1814_v41, %s5964_s29 }
  0xd4   : > { %620 = vrot.lane.b32.xlu0 %v1645_v42, %s5965_s10  ;;  %893 = vst.msk [vmem:[#allocation2] sm:$0xff] %vm892_vm5, %v797_v44  ;;  %v1651_v44 = vld [vmem:[%s6058_s24 + $0x79] sm:$0xff] }
  0xd5   : > { %v799_v46 = vpop.permute.xlu1 %798 }
  0xd6   : > { %v605_v47 = vpop.permute.xlu0 %604 }
  0xd7   : > { %700 = vst.msk [vmem:[#allocation2 + $0x8] sm:$0xff] %vm698_vm4, %v605_v47  ;;  %1539 = vrot.lane.b32.xlu1 %v6315_v16, %s5969_s14 }
  0xd8   : > { %1363 = vrot.lane.b32.xlu0 %v1815_v43, %s5968_s13  ;;  %894 = vst.msk [vmem:[#allocation2 + $0x8] sm:$0xff] %vm892_vm5, %v799_v46 }
  0xd9   : > { %v989_v49 = vpop.permute.xlu1 %988 }
  0xda   : > { %v987_v50 = vpop.permute.xlu0 %986  ;;  %1078 = vst.msk [vmem:[#allocation2 + $0x8] sm:$0xff] %vm1076_vm6, %v989_v49 }
  0xdb   : > { %1077 = vst.msk [vmem:[#allocation2] sm:$0xff] %vm1076_vm6, %v987_v50  ;;  %1002 = vrot.lane.b32.xlu1 %v6315_v16, %s5966_s11  ;;  %v1818_v16 = vld [vmem:[%s6058_s24 + $0x62] sm:$0xff] }
  0xdc   : > { %814 = vrot.lane.b32.xlu0 %v1815_v43, %s5964_s29  ;;  %v1820_v43 = vld [vmem:[%s6058_s24 + $0x72] sm:$0xff] }
  0xdd   : > { %v607_v52 = vpop.permute.xlu1 %606 }
  0xde   : > { %v1168_v53 = vpop.permute.xlu0 %1167  ;;  %701 = vst.msk [vmem:[#allocation2 + $0x10] sm:$0xff] %vm698_vm4, %v607_v52 }
  0xdf   : > { %1258 = vst.msk [vmem:[#allocation2] sm:$0xff] %vm1257_vm7, %v1168_v53  ;;  %1708 = vrot.lane.b32.xlu1 %v1646_v51, %s5970_s15 }
  0xe0   : > { %1541 = vrot.lane.b32.xlu0 %v6318_v17, %s5969_s14 }
  0xe1   : > { %v1350_v55 = vpop.permute.xlu1 %1349 }
  0xe2   : > { %v1170_v56 = vpop.permute.xlu0 %1169  ;;  %1440 = vst.msk [vmem:[#allocation2] sm:$0xff] %vm1439_vm8, %v1350_v55 }
  0xe3   : > { %1259 = vst.msk [vmem:[#allocation2 + $0x8] sm:$0xff] %vm1257_vm7, %v1170_v56  ;;  %1183 = vrot.lane.b32.xlu1 %v1646_v51, %s5967_s12 }
  0xe4   : > { %1004 = vrot.lane.b32.xlu0 %v6318_v17, %s5966_s11  ;;  %v1649_v17 = vld [vmem:[%s6058_s24 + $0x69] sm:$0xff] }
  0xe5   : > { %v801_v59 = vpop.permute.xlu1 %800 }
  0xe6   : > { %v609_v60 = vpop.permute.xlu0 %608  ;;  %895 = vst.msk [vmem:[#allocation2 + $0x10] sm:$0xff] %vm892_vm5, %v801_v59 }
  0xe7   : > { %702 = vst.msk [vmem:[#allocation2 + $0x18] sm:$0xff] %vm698_vm4, %v609_v60  ;;  %1878 = vrot.lane.b32.xlu1 %v1816_v57, %s5971_s25 }
  0xe8   : > { %1710 = vrot.lane.b32.xlu0 %v1647_v58, %s5970_s15 }
  0xe9   : > { %v1528_v61 = vpop.permute.xlu1 %1527 }
  0xea   : > { %v1352_v62 = vpop.permute.xlu0 %1351  ;;  %1612 = vst.msk [vmem:[#allocation2] sm:$0xff] %vm1611_vm9, %v1528_v61  ;;  %v1652_v61 = vld [vmem:[%s6058_s24 + $0x81] sm:$0xff] }
  0xeb   : > { %1441 = vst.msk [vmem:[#allocation2 + $0x8] sm:$0xff] %vm1439_vm8, %v1352_v62  ;;  %1185 = vrot.lane.b32.xlu1 %v1647_v58, %s5967_s12 }
  0xec   : > { %622 = vrot.lane.b32.xlu0 %v1646_v51, %s5965_s10 }
  0xed   : > { %v991_v0 = vpop.permute.xlu1 %990 }
  0xee   : > { %v803_v1 = vpop.permute.xlu0 %802  ;;  %1079 = vst.msk [vmem:[#allocation2 + $0x10] sm:$0xff] %vm1076_vm6, %v991_v0  ;;  %v6621_v0 = vld [vmem:[%s6058_s24 + $0xc8] sm:$0xff] }
  0xef   : > { %896 = vst.msk [vmem:[#allocation2 + $0x18] sm:$0xff] %vm892_vm5, %v803_v1  ;;  %1880 = vrot.lane.b32.xlu1 %v1817_v63, %s5971_s25 }
  0xf0   : > { %1365 = vrot.lane.b32.xlu0 %v1816_v57, %s5968_s13  ;;  %531 = vst.msk [vmem:[#allocation2 + $0xc8] sm:$0xff] %vm505_vm2, %v6621_v0 }
  0xf1   : > { %v1697_v2 = vpop.permute.xlu1 %1696 }
  0xf2   : > { %v1530_v3 = vpop.permute.xlu0 %1529  ;;  %1781 = vst.msk [vmem:[#allocation2] sm:$0xff] %vm1780_vm10, %v1697_v2 }
  0xf3   : > { %1613 = vst.msk [vmem:[#allocation2 + $0x8] sm:$0xff] %vm1611_vm9, %v1530_v3  ;;  %816 = vrot.lane.b32.xlu1 %v1816_v57, %s5964_s29  ;;  %v1822_v3 = vld [vmem:[%s6058_s24 + $0x82] sm:$0xff] }
  0xf4   : > { %624 = vrot.lane.b32.xlu0 %v1647_v58, %s5965_s10  ;;  %v6605_v58 = vld [vmem:[%s6058_s24 + $0xc0] sm:$0xff] }
  0xf5   : > { %v1172_v4 = vpop.permute.xlu1 %1171  ;;  %530 = vst.msk [vmem:[#allocation2 + $0xc0] sm:$0xff] %vm505_vm2, %v6605_v58 }
  0xf6   : > { %v993_v5 = vpop.permute.xlu0 %992  ;;  %1260 = vst.msk [vmem:[#allocation2 + $0x10] sm:$0xff] %vm1257_vm7, %v1172_v4  ;;  %v1653_v4 = vld [vmem:[%s6058_s24 + $0x89] sm:$0xff] }
  0xf7   : > { %1080 = vst.msk [vmem:[#allocation2 + $0x18] sm:$0xff] %vm1076_vm6, %v993_v5  ;;  %1543 = vrot.lane.b32.xlu1 %v6334_v21, %s5969_s14 }
  0xf8   : > { %1367 = vrot.lane.b32.xlu0 %v1817_v63, %s5968_s13 }
  0xf9   : > { %v1867_v7 = vpop.permute.xlu1 %1866 }
  0xfa   : > { %v1699_v8 = vpop.permute.xlu0 %1698  ;;  %1951 = vst.msk [vmem:[#allocation2] sm:$0xff] %vm1950_vm11, %v1867_v7 }
  0xfb   : > { %1782 = vst.msk [vmem:[#allocation2 + $0x8] sm:$0xff] %vm1780_vm10, %v1699_v8  ;;  %1006 = vrot.lane.b32.xlu1 %v6334_v21, %s5966_s11 }
  0xfc   : > { %818 = vrot.lane.b32.xlu0 %v1817_v63, %s5964_s29 }
  0xfd   : > { %v1174_v10 = vpop.permute.xlu1 %1173 }
  0xfe   : > { %v611_v11 = vpop.permute.xlu0 %610  ;;  %1261 = vst.msk [vmem:[#allocation2 + $0x18] sm:$0xff] %vm1257_vm7, %v1174_v10 }
  0xff   : > { %703 = vst.msk [vmem:[#allocation2 + $0x20] sm:$0xff] %vm698_vm4, %v611_v11  ;;  %1712 = vrot.lane.b32.xlu1 %v1648_v9, %s5970_s15 }
 0x100   : > { %1545 = vrot.lane.b32.xlu0 %v6344_v23, %s5969_s14 }
 0x101   : > { %v1869_v13 = vpop.permute.xlu1 %1868  ;;  %v1980_v15 = vld [vmem:[#allocation2] sm:$0xff] }
 0x102   : > { %v1354_v14 = vpop.permute.xlu0 %1353  ;;  %1952 = vst.msk [vmem:[#allocation2 + $0x8] sm:$0xff] %vm1950_vm11, %v1869_v13  ;;  %5722 = vmatprep.mubr.msk.f32.mxu0 %vm2024_vm12, %v1980_v15 }
 0x103   : > { %1442 = vst.msk [vmem:[#allocation2 + $0x10] sm:$0xff] %vm1439_vm8, %v1354_v14  ;;  %1187 = vrot.lane.b32.xlu1 %v1648_v9, %s5967_s12 }
 0x104   : > { %1008 = vrot.lane.b32.xlu0 %v6344_v23, %s5966_s11  ;;  %v1819_v23 = vld [vmem:[%s6058_s24 + $0x6a] sm:$0xff] }
 0x105   : > { %v805_v18 = vpop.permute.xlu1 %804 }
 0x106   : > { %v613_v19 = vpop.permute.xlu0 %612  ;;  %897 = vst.msk [vmem:[#allocation2 + $0x20] sm:$0xff] %vm892_vm5, %v805_v18  ;;  %v6660_v18 = vld [vmem:[%s6058_s24 + $0xd0] sm:$0xff] }
 0x107   : > { %704 = vst.msk [vmem:[#allocation2 + $0x28] sm:$0xff] %vm698_vm4, %v613_v19  ;;  %1882 = vrot.lane.b32.xlu1 %v1818_v16, %s5971_s25 }
 0x108   : > { %1714 = vrot.lane.b32.xlu0 %v1649_v17, %s5970_s15  ;;  %532 = vst.msk [vmem:[#allocation2 + $0xd0] sm:$0xff] %vm505_vm2, %v6660_v18 }
 0x109   : > { %v1532_v20 = vpop.permute.xlu1 %1531  ;;  %v1981_v22 = vld [vmem:[#allocation2 + $0x8] sm:$0xff] }
 0x10a   : > { %v1356_v21 = vpop.permute.xlu0 %1355  ;;  %1614 = vst.msk [vmem:[#allocation2 + $0x10] sm:$0xff] %vm1611_vm9, %v1532_v20  ;;  %5723 = vmatmul.mubr.msk.f32.vlgmr.msra.gmra.mxu0 %vm2024_vm12, %v1981_v22 }
 0x10b   : > { %1443 = vst.msk [vmem:[#allocation2 + $0x18] sm:$0xff] %vm1439_vm8, %v1356_v21  ;;  %1189 = vrot.lane.b32.xlu1 %v1649_v17, %s5967_s12  ;;  %v1654_v21 = vld [vmem:[%s6058_s24 + $0x91] sm:$0xff] }
 0x10c   : > { %626 = vrot.lane.b32.xlu0 %v1648_v9, %s5965_s10 }
 0x10d   : > { %v995_v24 = vpop.permute.xlu1 %994 }
 0x10e   : > { %v807_v25 = vpop.permute.xlu0 %806  ;;  %1081 = vst.msk [vmem:[#allocation2 + $0x20] sm:$0xff] %vm1076_vm6, %v995_v24  ;;  %v6673_v24 = vld [vmem:[%s6058_s24 + $0xd8] sm:$0xff] }
 0x10f   : > { %898 = vst.msk [vmem:[#allocation2 + $0x28] sm:$0xff] %vm892_vm5, %v807_v25  ;;  %1884 = vrot.lane.b32.xlu1 %v1819_v23, %s5971_s25 }
 0x110   : > { %1369 = vrot.lane.b32.xlu0 %v1818_v16, %s5968_s13  ;;  %533 = vst.msk [vmem:[#allocation2 + $0xd8] sm:$0xff] %vm505_vm2, %v6673_v24 }
 0x111   : > { %v1701_v26 = vpop.permute.xlu1 %1700 }
 0x112   : > { %v1534_v27 = vpop.permute.xlu0 %1533  ;;  %1783 = vst.msk [vmem:[#allocation2 + $0x10] sm:$0xff] %vm1780_vm10, %v1701_v26 }
 0x113   : > { %1615 = vst.msk [vmem:[#allocation2 + $0x18] sm:$0xff] %vm1611_vm9, %v1534_v27  ;;  %820 = vrot.lane.b32.xlu1 %v1818_v16, %s5964_s29  ;;  %v1824_v27 = vld [vmem:[%s6058_s24 + $0x92] sm:$0xff] }
 0x114   : > { %628 = vrot.lane.b32.xlu0 %v1649_v17, %s5965_s10 }
 0x115   : > { %v1176_v28 = vpop.permute.xlu1 %1175 }
 0x116   : > { %v997_v29 = vpop.permute.xlu0 %996  ;;  %1262 = vst.msk [vmem:[#allocation2 + $0x20] sm:$0xff] %vm1257_vm7, %v1176_v28  ;;  %v1655_v28 = vld [vmem:[%s6058_s24 + $0x99] sm:$0xff] }
 0x117   : > { %1082 = vst.msk [vmem:[#allocation2 + $0x28] sm:$0xff] %vm1076_vm6, %v997_v29  ;;  %1547 = vrot.lane.b32.xlu1 %v6379_v32, %s5969_s14 }
 0x118   : > { %1371 = vrot.lane.b32.xlu0 %v1819_v23, %s5968_s13 }
 0x119   : > { %v1871_v31 = vpop.permute.xlu1 %1870 }
 0x11a   : > { %v1703_v33 = vpop.permute.xlu0 %1702  ;;  %1953 = vst.msk [vmem:[#allocation2 + $0x10] sm:$0xff] %vm1950_vm11, %v1871_v31 }
 0x11b   : > { %1784 = vst.msk [vmem:[#allocation2 + $0x18] sm:$0xff] %vm1780_vm10, %v1703_v33  ;;  %1010 = vrot.lane.b32.xlu1 %v6379_v32, %s5966_s11 }
 0x11c   : > { %822 = vrot.lane.b32.xlu0 %v1819_v23, %s5964_s29 }
 0x11d   : > { %v1178_v36 = vpop.permute.xlu1 %1177 }
 0x11e   : > { %v615_v37 = vpop.permute.xlu0 %614  ;;  %1263 = vst.msk [vmem:[#allocation2 + $0x28] sm:$0xff] %vm1257_vm7, %v1178_v36 }
 0x11f   : > { %705 = vst.msk [vmem:[#allocation2 + $0x30] sm:$0xff] %vm698_vm4, %v615_v37  ;;  %1716 = vrot.lane.b32.xlu1 %v1650_v35, %s5970_s15 }
 0x120   : > { %1549 = vrot.lane.b32.xlu0 %v6391_v34, %s5969_s14 }
 0x121   : > { %v1873_v32 = vpop.permute.xlu1 %1872  ;;  %v1982_v42 = vld [vmem:[#allocation2 + $0x10] sm:$0xff] }
 0x122   : > { %v1358_v41 = vpop.permute.xlu0 %1357  ;;  %1954 = vst.msk [vmem:[#allocation2 + $0x18] sm:$0xff] %vm1950_vm11, %v1873_v32  ;;  %5725 = vmatprep.mubr.msk.f32.mxu0 %vm2024_vm12, %v1982_v42 }
 0x123   : > { %1444 = vst.msk [vmem:[#allocation2 + $0x20] sm:$0xff] %vm1439_vm8, %v1358_v41  ;;  %1191 = vrot.lane.b32.xlu1 %v1650_v35, %s5967_s12 }
 0x124   : > { %1012 = vrot.lane.b32.xlu0 %v6391_v34, %s5966_s11  ;;  %v1821_v34 = vld [vmem:[%s6058_s24 + $0x7a] sm:$0xff] }
 0x125   : > { %v809_v45 = vpop.permute.xlu1 %808 }
 0x126   : > { %v617_v46 = vpop.permute.xlu0 %616  ;;  %899 = vst.msk [vmem:[#allocation2 + $0x30] sm:$0xff] %vm892_vm5, %v809_v45 }
 0x127   : > { %706 = vst.msk [vmem:[#allocation2 + $0x38] sm:$0xff] %vm698_vm4, %v617_v46  ;;  %1886 = vrot.lane.b32.xlu1 %v1820_v43, %s5971_s25 }
 0x128   : > { %1718 = vrot.lane.b32.xlu0 %v1651_v44, %s5970_s15 }
 0x129   : > { %v1536_v47 = vpop.permute.xlu1 %1535  ;;  %v1983_v50 = vld [vmem:[#allocation2 + $0x18] sm:$0xff] }
 0x12a   : > { %v1360_v49 = vpop.permute.xlu0 %1359  ;;  %1616 = vst.msk [vmem:[#allocation2 + $0x20] sm:$0xff] %vm1611_vm9, %v1536_v47  ;;  %5726 = vmatmul.mubr.msk.f32.gmra.mxu0 %vm2024_vm12, %v1983_v50 }
 0x12b   : > { %1445 = vst.msk [vmem:[#allocation2 + $0x28] sm:$0xff] %vm1439_vm8, %v1360_v49  ;;  %1193 = vrot.lane.b32.xlu1 %v1651_v44, %s5967_s12  ;;  %v1656_v49 = vld [vmem:[%s6058_s24 + $0xa1] sm:$0xff] }
 0x12c   : > { %630 = vrot.lane.b32.xlu0 %v1650_v35, %s5965_s10 }
 0x12d   : > { %v999_v51 = vpop.permute.xlu1 %998 }
 0x12e   : > { %v811_v52 = vpop.permute.xlu0 %810  ;;  %1083 = vst.msk [vmem:[#allocation2 + $0x30] sm:$0xff] %vm1076_vm6, %v999_v51 }
 0x12f   : > { %900 = vst.msk [vmem:[#allocation2 + $0x38] sm:$0xff] %vm892_vm5, %v811_v52  ;;  %1888 = vrot.lane.b32.xlu1 %v1821_v34, %s5971_s25 }
 0x130   : > { %1373 = vrot.lane.b32.xlu0 %v1820_v43, %s5968_s13 }
 0x131   : > { %v1705_v53 = vpop.permute.xlu1 %1704 }
 0x132   : > { %v1538_v55 = vpop.permute.xlu0 %1537  ;;  %1785 = vst.msk [vmem:[#allocation2 + $0x20] sm:$0xff] %vm1780_vm10, %v1705_v53 }
 0x133   : > { %1617 = vst.msk [vmem:[#allocation2 + $0x28] sm:$0xff] %vm1611_vm9, %v1538_v55  ;;  %824 = vrot.lane.b32.xlu1 %v1820_v43, %s5964_s29  ;;  %v6705_v43 = vld [vmem:[%s6058_s24 + $0xe0] sm:$0xff]  ;;  %v1657_v55 = vld [vmem:[%s6058_s24 + $0xa9] sm:$0xff] }
 0x134   : > { %632 = vrot.lane.b32.xlu0 %v1651_v44, %s5965_s10  ;;  %534 = vst.msk [vmem:[#allocation2 + $0xe0] sm:$0xff] %vm505_vm2, %v6705_v43 }
 0x135   : > { %v1180_v56 = vpop.permute.xlu1 %1179 }
 0x136   : > { %v1001_v57 = vpop.permute.xlu0 %1000  ;;  %1264 = vst.msk [vmem:[#allocation2 + $0x30] sm:$0xff] %vm1257_vm7, %v1180_v56 }
 0x137   : > { %1084 = vst.msk [vmem:[#allocation2 + $0x38] sm:$0xff] %vm1076_vm6, %v1001_v57  ;;  %1551 = vrot.lane.b32.xlu1 %v6413_v38, %s5969_s14 }
 0x138   : > { %1375 = vrot.lane.b32.xlu0 %v1821_v34, %s5968_s13 }
 0x139   : > { %v1875_v59 = vpop.permute.xlu1 %1874 }
 0x13a   : > { %v1707_v60 = vpop.permute.xlu0 %1706  ;;  %1955 = vst.msk [vmem:[#allocation2 + $0x20] sm:$0xff] %vm1950_vm11, %v1875_v59 }
 0x13b   : > { %1786 = vst.msk [vmem:[#allocation2 + $0x28] sm:$0xff] %vm1780_vm10, %v1707_v60  ;;  %1014 = vrot.lane.b32.xlu1 %v6413_v38, %s5966_s11 }
 0x13c   : > { %826 = vrot.lane.b32.xlu0 %v1821_v34, %s5964_s29 }
 0x13d   : > { %v1182_v62 = vpop.permute.xlu1 %1181 }
 0x13e   : > { %v619_v63 = vpop.permute.xlu0 %618  ;;  %1265 = vst.msk [vmem:[#allocation2 + $0x38] sm:$0xff] %vm1257_vm7, %v1182_v62 }
 0x13f   : > { %707 = vst.msk [vmem:[#allocation2 + $0x40] sm:$0xff] %vm698_vm4, %v619_v63  ;;  %1720 = vrot.lane.b32.xlu1 %v1652_v61, %s5970_s15 }
 0x140   : > { %1553 = vrot.lane.b32.xlu0 %v6425_v40, %s5969_s14 }
 0x141   : > { %v1877_v38 = vpop.permute.xlu1 %1876  ;;  %v1984_v2 = vld [vmem:[#allocation2 + $0x20] sm:$0xff] }
 0x142   : > { %v1362_v1 = vpop.permute.xlu0 %1361  ;;  %1956 = vst.msk [vmem:[#allocation2 + $0x28] sm:$0xff] %vm1950_vm11, %v1877_v38  ;;  %5728 = vmatprep.mubr.msk.f32.mxu0 %vm2024_vm12, %v1984_v2 }
 0x143   : > { %1446 = vst.msk [vmem:[#allocation2 + $0x30] sm:$0xff] %vm1439_vm8, %v1362_v1  ;;  %1195 = vrot.lane.b32.xlu1 %v1652_v61, %s5967_s12 }
 0x144   : > { %1016 = vrot.lane.b32.xlu0 %v6425_v40, %s5966_s11  ;;  %v1823_v40 = vld [vmem:[%s6058_s24 + $0x8a] sm:$0xff] }
 0x145   : > { %v813_v5 = vpop.permute.xlu1 %812 }
 0x146   : > { %v621_v7 = vpop.permute.xlu0 %620  ;;  %901 = vst.msk [vmem:[#allocation2 + $0x40] sm:$0xff] %vm892_vm5, %v813_v5 }
 0x147   : > { %708 = vst.msk [vmem:[#allocation2 + $0x48] sm:$0xff] %vm698_vm4, %v621_v7  ;;  %1890 = vrot.lane.b32.xlu1 %v1822_v3, %s5971_s25  ;;  %v1658_v7 = vld [vmem:[%s6058_s24 + $0xb1] sm:$0xff] }
 0x148   : > { %1722 = vrot.lane.b32.xlu0 %v1653_v4, %s5970_s15 }
 0x149   : > { %v1540_v8 = vpop.permute.xlu1 %1539  ;;  %v1985_v10 = vld [vmem:[#allocation2 + $0x28] sm:$0xff] }
 0x14a   : > { %v1364_v9 = vpop.permute.xlu0 %1363  ;;  %1618 = vst.msk [vmem:[#allocation2 + $0x30] sm:$0xff] %vm1611_vm9, %v1540_v8  ;;  %5729 = vmatmul.mubr.msk.f32.gmra.mxu0 %vm2024_vm12, %v1985_v10 }
 0x14b   : > { %1447 = vst.msk [vmem:[#allocation2 + $0x38] sm:$0xff] %vm1439_vm8, %v1364_v9  ;;  %1197 = vrot.lane.b32.xlu1 %v1653_v4, %s5967_s12 }
 0x14c   : > { %634 = vrot.lane.b32.xlu0 %v1652_v61, %s5965_s10 }
 0x14d   : > { %v1003_v11 = vpop.permute.xlu1 %1002 }
 0x14e   : > { %v815_v13 = vpop.permute.xlu0 %814  ;;  %1085 = vst.msk [vmem:[#allocation2 + $0x40] sm:$0xff] %vm1076_vm6, %v1003_v11 }
 0x14f   : > { %902 = vst.msk [vmem:[#allocation2 + $0x48] sm:$0xff] %vm892_vm5, %v815_v13  ;;  %1892 = vrot.lane.b32.xlu1 %v1823_v40, %s5971_s25  ;;  %v1659_v13 = vld [vmem:[%s6058_s24 + $0xb9] sm:$0xff] }
 0x150   : > { %1377 = vrot.lane.b32.xlu0 %v1822_v3, %s5968_s13 }
 0x151   : > { %v1709_v14 = vpop.permute.xlu1 %1708 }
 0x152   : > { %v1542_v15 = vpop.permute.xlu0 %1541  ;;  %1787 = vst.msk [vmem:[#allocation2 + $0x30] sm:$0xff] %vm1780_vm10, %v1709_v14 }
 0x153   : > { %1619 = vst.msk [vmem:[#allocation2 + $0x38] sm:$0xff] %vm1611_vm9, %v1542_v15  ;;  %828 = vrot.lane.b32.xlu1 %v1822_v3, %s5964_s29 }
 0x154   : > { %636 = vrot.lane.b32.xlu0 %v1653_v4, %s5965_s10 }
 0x155   : > { %v1184_v16 = vpop.permute.xlu1 %1183 }
 0x156   : > { %v1005_v17 = vpop.permute.xlu0 %1004  ;;  %1266 = vst.msk [vmem:[#allocation2 + $0x40] sm:$0xff] %vm1257_vm7, %v1184_v16 }
 0x157   : > { %1086 = vst.msk [vmem:[#allocation2 + $0x48] sm:$0xff] %vm1076_vm6, %v1005_v17  ;;  %1555 = vrot.lane.b32.xlu1 %v6450_v48, %s5969_s14 }
 0x158   : > { %1379 = vrot.lane.b32.xlu0 %v1823_v40, %s5968_s13 }
 0x159   : > { %v1879_v19 = vpop.permute.xlu1 %1878 }
 0x15a   : > { %v1711_v20 = vpop.permute.xlu0 %1710  ;;  %1957 = vst.msk [vmem:[#allocation2 + $0x30] sm:$0xff] %vm1950_vm11, %v1879_v19 }
 0x15b   : > { %1788 = vst.msk [vmem:[#allocation2 + $0x38] sm:$0xff] %vm1780_vm10, %v1711_v20  ;;  %1018 = vrot.lane.b32.xlu1 %v6450_v48, %s5966_s11 }
 0x15c   : > { %830 = vrot.lane.b32.xlu0 %v1823_v40, %s5964_s29 }
 0x15d   : > { %v1186_v22 = vpop.permute.xlu1 %1185 }
 0x15e   : > { %v623_v23 = vpop.permute.xlu0 %622  ;;  %1267 = vst.msk [vmem:[#allocation2 + $0x48] sm:$0xff] %vm1257_vm7, %v1186_v22 }
 0x15f   : > { %709 = vst.msk [vmem:[#allocation2 + $0x50] sm:$0xff] %vm698_vm4, %v623_v23  ;;  %1724 = vrot.lane.b32.xlu1 %v1654_v21, %s5970_s15 }
 0x160   : > { %1557 = vrot.lane.b32.xlu0 %v6467_v54, %s5969_s14 }
 0x161   : > { %v1881_v48 = vpop.permute.xlu1 %1880  ;;  %v1986_v26 = vld [vmem:[#allocation2 + $0x30] sm:$0xff] }
 0x162   : > { %v1366_v25 = vpop.permute.xlu0 %1365  ;;  %1958 = vst.msk [vmem:[#allocation2 + $0x38] sm:$0xff] %vm1950_vm11, %v1881_v48  ;;  %5731 = vmatprep.mubr.msk.f32.mxu0 %vm2024_vm12, %v1986_v26 }
 0x163   : > { %1448 = vst.msk [vmem:[#allocation2 + $0x40] sm:$0xff] %vm1439_vm8, %v1366_v25  ;;  %1199 = vrot.lane.b32.xlu1 %v1654_v21, %s5967_s12 }
 0x164   : > { %1020 = vrot.lane.b32.xlu0 %v6467_v54, %s5966_s11  ;;  %v1825_v54 = vld [vmem:[%s6058_s24 + $0x9a] sm:$0xff] }
 0x165   : > { %v817_v29 = vpop.permute.xlu1 %816 }
 0x166   : > { %v625_v31 = vpop.permute.xlu0 %624  ;;  %903 = vst.msk [vmem:[#allocation2 + $0x50] sm:$0xff] %vm892_vm5, %v817_v29 }
 0x167   : > { %710 = vst.msk [vmem:[#allocation2 + $0x58] sm:$0xff] %vm698_vm4, %v625_v31  ;;  %1894 = vrot.lane.b32.xlu1 %v1824_v27, %s5971_s25 }
 0x168   : > { %1726 = vrot.lane.b32.xlu0 %v1655_v28, %s5970_s15 }
 0x169   : > { %v1544_v33 = vpop.permute.xlu1 %1543  ;;  %v1987_v36 = vld [vmem:[#allocation2 + $0x38] sm:$0xff] }
 0x16a   : > { %v1368_v35 = vpop.permute.xlu0 %1367  ;;  %1620 = vst.msk [vmem:[#allocation2 + $0x40] sm:$0xff] %vm1611_vm9, %v1544_v33  ;;  %5732 = vmatmul.mubr.msk.f32.gmra.mxu0 %vm2024_vm12, %v1987_v36 }
 0x16b   : > { %1449 = vst.msk [vmem:[#allocation2 + $0x48] sm:$0xff] %vm1439_vm8, %v1368_v35  ;;  %1201 = vrot.lane.b32.xlu1 %v1655_v28, %s5967_s12 }
 0x16c   : > { %638 = vrot.lane.b32.xlu0 %v1654_v21, %s5965_s10 }
 0x16d   : > { %v1007_v37 = vpop.permute.xlu1 %1006 }
 0x16e   : > { %v819_v32 = vpop.permute.xlu0 %818  ;;  %1087 = vst.msk [vmem:[#allocation2 + $0x50] sm:$0xff] %vm1076_vm6, %v1007_v37 }
 0x16f   : > { %904 = vst.msk [vmem:[#allocation2 + $0x58] sm:$0xff] %vm892_vm5, %v819_v32  ;;  %1896 = vrot.lane.b32.xlu1 %v1825_v54, %s5971_s25 }
 0x170   : > { %1381 = vrot.lane.b32.xlu0 %v1824_v27, %s5968_s13 }
 0x171   : > { %v1713_v41 = vpop.permute.xlu1 %1712 }
 0x172   : > { %v1546_v42 = vpop.permute.xlu0 %1545  ;;  %1789 = vst.msk [vmem:[#allocation2 + $0x40] sm:$0xff] %vm1780_vm10, %v1713_v41  ;;  %v6826_v41 = vld [vmem:[%s8213_s2] ss:$0 sm:$0xff] }
 0x173   : > { %1621 = vst.msk [vmem:[#allocation2 + $0x48] sm:$0xff] %vm1611_vm9, %v1546_v42  ;;  %832 = vrot.lane.b32.xlu1 %v1824_v27, %s5964_s29 }
 0x174   : > { %640 = vrot.lane.b32.xlu0 %v1655_v28, %s5965_s10  ;;  %v1660_v28 = vld [vmem:[%s6058_s24 + $0xc1] sm:$0xff] }
 0x175   : > { %v1188_v44 = vpop.permute.xlu1 %1187 }
 0x176   : > { %v1009_v45 = vpop.permute.xlu0 %1008  ;;  %1268 = vst.msk [vmem:[#allocation2 + $0x50] sm:$0xff] %vm1257_vm7, %v1188_v44 }
 0x177   : > { %1088 = vst.msk [vmem:[#allocation2 + $0x58] sm:$0xff] %vm1076_vm6, %v1009_v45  ;;  %1559 = vrot.lane.b32.xlu1 %v6501_v6, %s5969_s14 }
 0x178   : > { %1383 = vrot.lane.b32.xlu0 %v1825_v54, %s5968_s13 }
 0x179   : > { %v1883_v46 = vpop.permute.xlu1 %1882 }
 0x17a   : > { %v1715_v47 = vpop.permute.xlu0 %1714  ;;  %1959 = vst.msk [vmem:[#allocation2 + $0x40] sm:$0xff] %vm1950_vm11, %v1883_v46 }
 0x17b   : > { %1790 = vst.msk [vmem:[#allocation2 + $0x48] sm:$0xff] %vm1780_vm10, %v1715_v47  ;;  %1022 = vrot.lane.b32.xlu1 %v6501_v6, %s5966_s11  ;;  %v1826_v6 = vld [vmem:[%s6058_s24 + $0xa2] sm:$0xff] }
 0x17c   : > { %834 = vrot.lane.b32.xlu0 %v1825_v54, %s5964_s29  ;;  %v1661_v54 = vld [vmem:[%s6058_s24 + $0xc9] sm:$0xff] }
 0x17d   : > { %v1190_v50 = vpop.permute.xlu1 %1189 }
 0x17e   : > { %v627_v34 = vpop.permute.xlu0 %626  ;;  %1269 = vst.msk [vmem:[#allocation2 + $0x58] sm:$0xff] %vm1257_vm7, %v1190_v50 }
 0x17f   : > { %711 = vst.msk [vmem:[#allocation2 + $0x60] sm:$0xff] %vm698_vm4, %v627_v34  ;;  %1728 = vrot.lane.b32.xlu1 %v1656_v49, %s5970_s15 }
 0x180   : > { %1561 = vrot.lane.b32.xlu0 %v6517_v12, %s5969_s14 }
 0x181   : > { %v1885_v51 = vpop.permute.xlu1 %1884  ;;  %v1988_v53 = vld [vmem:[#allocation2 + $0x40] sm:$0xff] }
 0x182   : > { %v1370_v52 = vpop.permute.xlu0 %1369  ;;  %1960 = vst.msk [vmem:[#allocation2 + $0x48] sm:$0xff] %vm1950_vm11, %v1885_v51  ;;  %5734 = vmatprep.mubr.msk.f32.mxu0 %vm2024_vm12, %v1988_v53 }
 0x183   : > { %1450 = vst.msk [vmem:[#allocation2 + $0x50] sm:$0xff] %vm1439_vm8, %v1370_v52  ;;  %1203 = vrot.lane.b32.xlu1 %v1656_v49, %s5967_s12 }
 0x184   : > { %1024 = vrot.lane.b32.xlu0 %v6517_v12, %s5966_s11  ;;  %v1827_v12 = vld [vmem:[%s6058_s24 + $0xaa] sm:$0xff] }
 0x185   : > { %v821_v56 = vpop.permute.xlu1 %820 }
 0x186   : > { %v629_v57 = vpop.permute.xlu0 %628  ;;  %905 = vst.msk [vmem:[#allocation2 + $0x60] sm:$0xff] %vm892_vm5, %v821_v56 }
 0x187   : > { %712 = vst.msk [vmem:[#allocation2 + $0x68] sm:$0xff] %vm698_vm4, %v629_v57  ;;  %1898 = vrot.lane.b32.xlu1 %v1826_v6, %s5971_s25 }
 0x188   : > { %1730 = vrot.lane.b32.xlu0 %v1657_v55, %s5970_s15 }
 0x189   : > { %v1548_v59 = vpop.permute.xlu1 %1547  ;;  %v1989_v61 = vld [vmem:[#allocation2 + $0x48] sm:$0xff] }
 0x18a   : > { %v1372_v60 = vpop.permute.xlu0 %1371  ;;  %1622 = vst.msk [vmem:[#allocation2 + $0x50] sm:$0xff] %vm1611_vm9, %v1548_v59  ;;  %5735 = vmatmul.mubr.msk.f32.gmra.mxu0 %vm2024_vm12, %v1989_v61 }
 0x18b   : > { %1451 = vst.msk [vmem:[#allocation2 + $0x58] sm:$0xff] %vm1439_vm8, %v1372_v60  ;;  %1205 = vrot.lane.b32.xlu1 %v1657_v55, %s5967_s12 }
 0x18c   : > { %642 = vrot.lane.b32.xlu0 %v1656_v49, %s5965_s10  ;;  %v1831_v49 = vld [vmem:[%s6058_s24 + $0xca] sm:$0xff] }
 0x18d   : > { %v1011_v62 = vpop.permute.xlu1 %1010 }
 0x18e   : > { %v823_v63 = vpop.permute.xlu0 %822  ;;  %1089 = vst.msk [vmem:[#allocation2 + $0x60] sm:$0xff] %vm1076_vm6, %v1011_v62  ;;  %v6859_v62 = vld [vmem:[%s6058_s24 + $0xd1] sm:$0xff] }
 0x18f   : > { %906 = vst.msk [vmem:[#allocation2 + $0x68] sm:$0xff] %vm892_vm5, %v823_v63  ;;  %1900 = vrot.lane.b32.xlu1 %v1827_v12, %s5971_s25 }
 0x190   : > { %1385 = vrot.lane.b32.xlu0 %v1826_v6, %s5968_s13 }
 0x191   : > { %v1717_v38 = vpop.permute.xlu1 %1716 }
 0x192   : > { %v1550_v1 = vpop.permute.xlu0 %1549  ;;  %1791 = vst.msk [vmem:[#allocation2 + $0x50] sm:$0xff] %vm1780_vm10, %v1717_v38 }
 0x193   : > { %1623 = vst.msk [vmem:[#allocation2 + $0x58] sm:$0xff] %vm1611_vm9, %v1550_v1  ;;  %836 = vrot.lane.b32.xlu1 %v1826_v6, %s5964_s29 }
 0x194   : > { %644 = vrot.lane.b32.xlu0 %v1657_v55, %s5965_s10 }
 0x195   : > { %v1192_v2 = vpop.permute.xlu1 %1191 }
 0x196   : > { %v1013_v3 = vpop.permute.xlu0 %1012  ;;  %1270 = vst.msk [vmem:[#allocation2 + $0x60] sm:$0xff] %vm1257_vm7, %v1192_v2 }
 0x197   : > { %1090 = vst.msk [vmem:[#allocation2 + $0x68] sm:$0xff] %vm1076_vm6, %v1013_v3  ;;  %1563 = vrot.lane.b32.xlu1 %v6553_v30, %s5969_s14 }
 0x198   : > { %1387 = vrot.lane.b32.xlu0 %v1827_v12, %s5968_s13 }
 0x199   : > { %v1887_v4 = vpop.permute.xlu1 %1886 }
 0x19a   : > { %v1719_v5 = vpop.permute.xlu0 %1718  ;;  %1961 = vst.msk [vmem:[#allocation2 + $0x50] sm:$0xff] %vm1950_vm11, %v1887_v4 }
 0x19b   : > { %1792 = vst.msk [vmem:[#allocation2 + $0x58] sm:$0xff] %vm1780_vm10, %v1719_v5  ;;  %1026 = vrot.lane.b32.xlu1 %v6553_v30, %s5966_s11  ;;  %v1828_v30 = vld [vmem:[%s6058_s24 + $0xb2] sm:$0xff] }
 0x19c   : > { %838 = vrot.lane.b32.xlu0 %v1827_v12, %s5964_s29  ;;  %v1663_v5 = vld [vmem:[%s6058_s24 + $0xd9] sm:$0xff] }
 0x19d   : > { %v1194_v8 = vpop.permute.xlu1 %1193 }
 0x19e   : > { %v631_v9 = vpop.permute.xlu0 %630  ;;  %1271 = vst.msk [vmem:[#allocation2 + $0x68] sm:$0xff] %vm1257_vm7, %v1194_v8 }
 0x19f   : > { %713 = vst.msk [vmem:[#allocation2 + $0x70] sm:$0xff] %vm698_vm4, %v631_v9  ;;  %1732 = vrot.lane.b32.xlu1 %v1658_v7, %s5970_s15 }
 0x1a0   : > { %1565 = vrot.lane.b32.xlu0 %v6569_v39, %s5969_s14 }
 0x1a1   : > { %v1889_v10 = vpop.permute.xlu1 %1888  ;;  %v1990_v11 = vld [vmem:[#allocation2 + $0x50] sm:$0xff] }
 0x1a2   : > { %v1374_v40 = vpop.permute.xlu0 %1373  ;;  %1962 = vst.msk [vmem:[#allocation2 + $0x58] sm:$0xff] %vm1950_vm11, %v1889_v10  ;;  %5737 = vmatprep.mubr.msk.f32.mxu0 %vm2024_vm12, %v1990_v11 }
 0x1a3   : > { %1452 = vst.msk [vmem:[#allocation2 + $0x60] sm:$0xff] %vm1439_vm8, %v1374_v40  ;;  %1207 = vrot.lane.b32.xlu1 %v1658_v7, %s5967_s12 }
 0x1a4   : > { %1028 = vrot.lane.b32.xlu0 %v6569_v39, %s5966_s11  ;;  %v1829_v39 = vld [vmem:[%s6058_s24 + $0xba] sm:$0xff] }
 0x1a5   : > { %v825_v14 = vpop.permute.xlu1 %824 }
 0x1a6   : > { %v633_v15 = vpop.permute.xlu0 %632  ;;  %907 = vst.msk [vmem:[#allocation2 + $0x70] sm:$0xff] %vm892_vm5, %v825_v14  ;;  %v6893_v14 = vld [vmem:[%s6058_s24 + $0xf0] sm:$0xff] }
 0x1a7   : > { %714 = vst.msk [vmem:[#allocation2 + $0x78] sm:$0xff] %vm698_vm4, %v633_v15  ;;  %1902 = vrot.lane.b32.xlu1 %v1828_v30, %s5971_s25 }
 0x1a8   : > { %1734 = vrot.lane.b32.xlu0 %v1659_v13, %s5970_s15  ;;  %536 = vst.msk [vmem:[#allocation2 + $0xf0] sm:$0xff] %vm505_vm2, %v6893_v14 }
 0x1a9   : > { %v1552_v16 = vpop.permute.xlu1 %1551  ;;  %v1991_v19 = vld [vmem:[#allocation2 + $0x58] sm:$0xff] }
 0x1aa   : > { %v1376_v17 = vpop.permute.xlu0 %1375  ;;  %1624 = vst.msk [vmem:[#allocation2 + $0x60] sm:$0xff] %vm1611_vm9, %v1552_v16  ;;  %5738 = vmatmul.mubr.msk.f32.gmra.mxu0 %vm2024_vm12, %v1991_v19  ;;  %v6903_v19 = vld [vmem:[%s6058_s24 + $0xf8] sm:$0xff] }
 0x1ab   : > { %1453 = vst.msk [vmem:[#allocation2 + $0x68] sm:$0xff] %vm1439_vm8, %v1376_v17  ;;  %1209 = vrot.lane.b32.xlu1 %v1659_v13, %s5967_s12  ;;  %v1496_v17 = vld [vmem:[%s6058_s24 + $0xe8] sm:$0xff] }
 0x1ac   : > { %646 = vrot.lane.b32.xlu0 %v1658_v7, %s5965_s10  ;;  %v6878_v7 = vld [vmem:[%s6058_s24 + $0xd2] sm:$0xff]  ;;  %537 = vst.msk [vmem:[#allocation2 + $0xf8] sm:$0xff] %vm505_vm2, %v6903_v19 }
 0x1ad   : > { %v1015_v20 = vpop.permute.xlu1 %1014 }
 0x1ae   : > { %v827_v21 = vpop.permute.xlu0 %826  ;;  %1091 = vst.msk [vmem:[#allocation2 + $0x70] sm:$0xff] %vm1076_vm6, %v1015_v20 }
 0x1af   : > { %908 = vst.msk [vmem:[#allocation2 + $0x78] sm:$0xff] %vm892_vm5, %v827_v21  ;;  %1904 = vrot.lane.b32.xlu1 %v1829_v39, %s5971_s25  ;;  %v6913_v21 = vld [vmem:[%s6058_s24 + $0xe1] sm:$0xff] }
 0x1b0   : > { %1389 = vrot.lane.b32.xlu0 %v1828_v30, %s5968_s13 }
 0x1b1   : > { %v1721_v22 = vpop.permute.xlu1 %1720 }
 0x1b2   : > { %v1554_v23 = vpop.permute.xlu0 %1553  ;;  %1793 = vst.msk [vmem:[#allocation2 + $0x60] sm:$0xff] %vm1780_vm10, %v1721_v22  ;;  %v6916_v22 = vld [vmem:[%s6058_s24 + $0xe9] sm:$0xff] }
 0x1b3   : > { %1625 = vst.msk [vmem:[#allocation2 + $0x68] sm:$0xff] %vm1611_vm9, %v1554_v23  ;;  %840 = vrot.lane.b32.xlu1 %v1828_v30, %s5964_s29 }
 0x1b4   : > { %648 = vrot.lane.b32.xlu0 %v1659_v13, %s5965_s10  ;;  %v1833_v13 = vld [vmem:[%s6058_s24 + $0xda] sm:$0xff] }
 0x1b5   : > { %v1196_v48 = vpop.permute.xlu1 %1195 }
 0x1b6   : > { %v1017_v25 = vpop.permute.xlu0 %1016  ;;  %1272 = vst.msk [vmem:[#allocation2 + $0x70] sm:$0xff] %vm1257_vm7, %v1196_v48 }
 0x1b7   : > { %1092 = vst.msk [vmem:[#allocation2 + $0x78] sm:$0xff] %vm1076_vm6, %v1017_v25  ;;  %1567 = vrot.lane.b32.xlu1 %v6605_v58, %s5969_s14  ;;  %v6925_v25 = vld [vmem:[%s6058_s24 + $0xe2] sm:$0xff] }
 0x1b8   : > { %1391 = vrot.lane.b32.xlu0 %v1829_v39, %s5968_s13 }
 0x1b9   : > { %v1891_v26 = vpop.permute.xlu1 %1890 }
 0x1ba   : > { %v1723_v27 = vpop.permute.xlu0 %1722  ;;  %1963 = vst.msk [vmem:[#allocation2 + $0x60] sm:$0xff] %vm1950_vm11, %v1891_v26  ;;  %v6928_v26 = vld [vmem:[%s6058_s24 + $0xea] sm:$0xff] }
 0x1bb   : > { %1794 = vst.msk [vmem:[#allocation2 + $0x68] sm:$0xff] %vm1780_vm10, %v1723_v27  ;;  %1030 = vrot.lane.b32.xlu1 %v6605_v58, %s5966_s11  ;;  %v1830_v58 = vld [vmem:[%s6058_s24 + $0xc2] sm:$0xff] }
 0x1bc   : > { %842 = vrot.lane.b32.xlu0 %v1829_v39, %s5964_s29 }
 0x1bd   : > { %v1198_v29 = vpop.permute.xlu1 %1197 }
 0x1be   : > { %v635_v31 = vpop.permute.xlu0 %634  ;;  %1273 = vst.msk [vmem:[#allocation2 + $0x78] sm:$0xff] %vm1257_vm7, %v1198_v29 }
 0x1bf   : > { %715 = vst.msk [vmem:[#allocation2 + $0x80] sm:$0xff] %vm698_vm4, %v635_v31  ;;  %1736 = vrot.lane.b32.xlu1 %v1660_v28, %s5970_s15 }
 0x1c0   : > { %1569 = vrot.lane.b32.xlu0 %v6621_v0, %s5969_s14 }
 0x1c1   : > { %v1893_v33 = vpop.permute.xlu1 %1892  ;;  %v1992_v36 = vld [vmem:[#allocation2 + $0x60] sm:$0xff] }
 0x1c2   : > { %v1378_v35 = vpop.permute.xlu0 %1377  ;;  %1964 = vst.msk [vmem:[#allocation2 + $0x68] sm:$0xff] %vm1950_vm11, %v1893_v33  ;;  %5740 = vmatprep.mubr.msk.f32.mxu0 %vm2024_vm12, %v1992_v36 }
 0x1c3   : > { %1454 = vst.msk [vmem:[#allocation2 + $0x70] sm:$0xff] %vm1439_vm8, %v1378_v35  ;;  %1211 = vrot.lane.b32.xlu1 %v1660_v28, %s5967_s12 }
 0x1c4   : > { %1032 = vrot.lane.b32.xlu0 %v6621_v0, %s5966_s11 }
 0x1c5   : > { %v829_v37 = vpop.permute.xlu1 %828 }
 0x1c6   : > { %v637_v32 = vpop.permute.xlu0 %636  ;;  %909 = vst.msk [vmem:[#allocation2 + $0x80] sm:$0xff] %vm892_vm5, %v829_v37 }
 0x1c7   : > { %716 = vst.msk [vmem:[#allocation2 + $0x88] sm:$0xff] %vm698_vm4, %v637_v32  ;;  %1906 = vrot.lane.b32.xlu1 %v1830_v58, %s5971_s25 }
 0x1c8   : > { %1738 = vrot.lane.b32.xlu0 %v1661_v54, %s5970_s15 }
 0x1c9   : > { %v1556_v42 = vpop.permute.xlu1 %1555  ;;  %v1993_v44 = vld [vmem:[#allocation2 + $0x68] sm:$0xff] }
 0x1ca   : > { %v1380_v0 = vpop.permute.xlu0 %1379  ;;  %1626 = vst.msk [vmem:[#allocation2 + $0x70] sm:$0xff] %vm1611_vm9, %v1556_v42  ;;  %v5724_v45 = vpop.f32.mrf.mxu0  ;;  %5741 = vmatmul.mubr.msk.f32.gmra.mxu0 %vm2024_vm12, %v1993_v44 }
 0x1cb   : > { %1455 = vst.msk [vmem:[#allocation2 + $0x78] sm:$0xff] %vm1439_vm8, %v1380_v0  ;;  %v2197_v46 = vadd.f32 %v5724_v45, %v6826_v41  ;;  %1213 = vrot.lane.b32.xlu1 %v1661_v54, %s5967_s12 }
 0x1cc   : > { %650 = vrot.lane.b32.xlu0 %v1660_v28, %s5965_s10  ;;  %v2191_v47 = vpop.f32.mrf.mxu0 }
 0x1cd   : > { %v2351_v50 = vmax.f32 %v2197_v46, 0.0  ;;  %v2192_v34 = vadd.f32 %v6826_v41, %v2191_v47  ;;  %v1019_v51 = vpop.permute.xlu1 %1018 }
 0x1ce   : > { %v831_v52 = vpop.permute.xlu0 %830  ;;  %1093 = vst.msk [vmem:[#allocation2 + $0x80] sm:$0xff] %vm1076_vm6, %v1019_v51 }
 0x1cf   : > { %910 = vst.msk [vmem:[#allocation2 + $0x88] sm:$0xff] %vm892_vm5, %v831_v52  ;;  %v2350_v53 = vmax.f32 %v2192_v34, 0.0  ;;  %1908 = vrot.lane.b32.xlu1 %v1831_v49, %s5971_s25 }
 0x1d0   : > { %2384 = vst.msk [vmem:[#allocation3 + $0x8] sm:$0xff] %vm2382_vm13, %v2351_v50  ;;  %1393 = vrot.lane.b32.xlu0 %v1830_v58, %s5968_s13 }
 0x1d1   : > { %2383 = vst.msk [vmem:[#allocation3] sm:$0xff] %vm2382_vm13, %v2350_v53  ;;  %v1725_v6 = vpop.permute.xlu1 %1724 }
 0x1d2   : > { %v1558_v55 = vpop.permute.xlu0 %1557  ;;  %1795 = vst.msk [vmem:[#allocation2 + $0x70] sm:$0xff] %vm1780_vm10, %v1725_v6 }
 0x1d3   : > { %1627 = vst.msk [vmem:[#allocation2 + $0x78] sm:$0xff] %vm1611_vm9, %v1558_v55  ;;  %844 = vrot.lane.b32.xlu1 %v1830_v58, %s5964_s29 }
 0x1d4   : > { %652 = vrot.lane.b32.xlu0 %v1661_v54, %s5965_s10 }
 0x1d5   : > { %v1200_v56 = vpop.permute.xlu1 %1199 }
 0x1d6   : > { %v1021_v57 = vpop.permute.xlu0 %1020  ;;  %1274 = vst.msk [vmem:[#allocation2 + $0x80] sm:$0xff] %vm1257_vm7, %v1200_v56 }
 0x1d7   : > { %v2416_v59 = vld [vmem:[#allocation3 + $0x8] sm:$0xff]  ;;  %1094 = vst.msk [vmem:[#allocation2 + $0x88] sm:$0xff] %vm1076_vm6, %v1021_v57  ;;  %1571 = vrot.lane.b32.xlu1 %v6660_v18, %s5969_s14 }
 0x1d8   : > { %2418 = vst.msk [vmem:[#allocation5 + $0x8] sm:$0xff] %vm2382_vm13, %v2416_v59  ;;  %1395 = vrot.lane.b32.xlu0 %v1831_v49, %s5968_s13  ;;  %v2415_v60 = vld [vmem:[#allocation3] sm:$0xff] }
 0x1d9   : > { %2417 = vst.msk [vmem:[#allocation5] sm:$0xff] %vm2382_vm13, %v2415_v60  ;;  %v1895_v61 = vpop.permute.xlu1 %1894 }
 0x1da   : > { %v1727_v12 = vpop.permute.xlu0 %1726  ;;  %1965 = vst.msk [vmem:[#allocation2 + $0x70] sm:$0xff] %vm1950_vm11, %v1895_v61 }
 0x1db   : > { %1796 = vst.msk [vmem:[#allocation2 + $0x78] sm:$0xff] %vm1780_vm10, %v1727_v12  ;;  %1034 = vrot.lane.b32.xlu1 %v6660_v18, %s5966_s11 }
 0x1dc   : > { %846 = vrot.lane.b32.xlu0 %v1831_v49, %s5964_s29 }
 0x1dd   : > { %v1202_v63 = vpop.permute.xlu1 %1201 }
 0x1de   : > { %v639_v38 = vpop.permute.xlu0 %638  ;;  %1275 = vst.msk [vmem:[#allocation2 + $0x88] sm:$0xff] %vm1257_vm7, %v1202_v63 }
 0x1df   : > { %717 = vst.msk [vmem:[#allocation2 + $0x90] sm:$0xff] %vm698_vm4, %v639_v38  ;;  %v2444_v1 = vld [vmem:[#allocation5 + $0x8] sm:$0xff]  ;;  %1740 = vrot.lane.b32.xlu1 %v6859_v62, %s5970_s15 }
 0x1e0   : > { %1573 = vrot.lane.b32.xlu0 %v6673_v24, %s5969_s14  ;;  %2458 = vst.msk [vmem:[#allocation4 + $0x18] sm:$0xff] %vm2382_vm13, %v2444_v1  ;;  %v2443_v18 = vld [vmem:[#allocation5] sm:$0xff] }
 0x1e1   : > { %v1897_v2 = vpop.permute.xlu1 %1896  ;;  %v1994_v4 = vld [vmem:[#allocation2 + $0x70] sm:$0xff]  ;;  %2457 = vst.msk [vmem:[#allocation4] sm:$0xff] %vm2382_vm13, %v2443_v18 }
 0x1e2   : > { %v1382_v3 = vpop.permute.xlu0 %1381  ;;  %1966 = vst.msk [vmem:[#allocation2 + $0x78] sm:$0xff] %vm1950_vm11, %v1897_v2  ;;  %5743 = vmatprep.mubr.msk.f32.mxu0 %vm2024_vm12, %v1994_v4  ;;  %v2471_v50 = vld [vmem:[#allocation5 + $0x2] sm:$0xff] }
 0x1e3   : > { %1456 = vst.msk [vmem:[#allocation2 + $0x80] sm:$0xff] %vm1439_vm8, %v1382_v3  ;;  %1215 = vrot.lane.b32.xlu1 %v6859_v62, %s5967_s12  ;;  %v2557_v56 = vld [vmem:[#allocation5 + $0x4] sm:$0xff] }
 0x1e4   : > { %1036 = vrot.lane.b32.xlu0 %v6673_v24, %s5966_s11  ;;  %v6993_v4 = vld [vmem:[%s6058_s24 + $0xf1] sm:$0xff] }
 0x1e5   : > { %v833_v8 = vpop.permute.xlu1 %832 }
 0x1e6   : > { %v641_v9 = vpop.permute.xlu0 %640  ;;  %911 = vst.msk [vmem:[#allocation2 + $0x90] sm:$0xff] %vm892_vm5, %v833_v8 }
 0x1e7   : > { %718 = vst.msk [vmem:[#allocation2 + $0x98] sm:$0xff] %vm698_vm4, %v641_v9  ;;  %1910 = vrot.lane.b32.xlu1 %v6878_v7, %s5971_s25 }
 0x1e8   : > { %1742 = vrot.lane.b32.xlu0 %v1663_v5, %s5970_s15 }
 0x1e9   : > { %v1560_v24 = vpop.permute.xlu1 %1559  ;;  %v1995_v40 = vld [vmem:[#allocation2 + $0x78] sm:$0xff] }
 0x1ea   : > { %v1384_v10 = vpop.permute.xlu0 %1383  ;;  %1628 = vst.msk [vmem:[#allocation2 + $0x80] sm:$0xff] %vm1611_vm9, %v1560_v24  ;;  %v5727_v11 = vpop.f32.mrf.mxu0  ;;  %5744 = vmatmul.mubr.msk.f32.gmra.mxu0 %vm2024_vm12, %v1995_v40  ;;  %v7009_v40 = vld [vmem:[%s6058_s24 + $0xf2] sm:$0xff] }
 0x1eb   : > { %1457 = vst.msk [vmem:[#allocation2 + $0x88] sm:$0xff] %vm1439_vm8, %v1384_v10  ;;  %1397 = vrot.lane.b32.xlu1 %v6878_v7, %s5968_s13 }
 0x1ec   : > { %1217 = vrot.lane.b32.xlu0 %v1663_v5, %s5967_s12  ;;  %v2201_v30 = vpop.f32.mrf.mxu0 }
 0x1ed   : > { %v1023_v15 = vpop.permute.xlu1 %1022 }
 0x1ee   : > { %v835_v16 = vpop.permute.xlu0 %834  ;;  %1095 = vst.msk [vmem:[#allocation2 + $0x90] sm:$0xff] %vm1076_vm6, %v1023_v15 }
 0x1ef   : > { %912 = vst.msk [vmem:[#allocation2 + $0x98] sm:$0xff] %vm892_vm5, %v835_v16  ;;  %1399 = vrot.lane.b32.xlu1 %v1833_v13, %s5968_s13 }
 0x1f0   : > { %1912 = vrot.lane.b32.xlu0 %v1833_v13, %s5971_s25 }
 0x1f1   : > { %v1729_v39 = vpop.permute.xlu1 %1728 }
 0x1f2   : > { %v1562_v20 = vpop.permute.xlu0 %1561  ;;  %1797 = vst.msk [vmem:[#allocation2 + $0x80] sm:$0xff] %vm1780_vm10, %v1729_v39 }
 0x1f3   : > { %1629 = vst.msk [vmem:[#allocation2 + $0x88] sm:$0xff] %vm1611_vm9, %v1562_v20  ;;  %1577 = vrot.lane.b32.xlu1 %v1496_v17, %s5969_s14 }
 0x1f4   : > { %1575 = vrot.lane.b32.xlu0 %v6705_v43, %s5969_s14 }
 0x1f5   : > { %v1204_v23 = vpop.permute.xlu1 %1203 }
 0x1f6   : > { %v1025_v48 = vpop.permute.xlu0 %1024  ;;  %1276 = vst.msk [vmem:[#allocation2 + $0x90] sm:$0xff] %vm1257_vm7, %v1204_v23 }
 0x1f7   : > { %1096 = vst.msk [vmem:[#allocation2 + $0x98] sm:$0xff] %vm1076_vm6, %v1025_v48  ;;  %1746 = vrot.lane.b32.xlu1 %v6916_v22, %s5970_s15 }
 0x1f8   : > { %1744 = vrot.lane.b32.xlu0 %v6913_v21, %s5970_s15 }
 0x1f9   : > { %v1899_v27 = vpop.permute.xlu1 %1898 }
 0x1fa   : > { %v1731_v28 = vpop.permute.xlu0 %1730  ;;  %1967 = vst.msk [vmem:[#allocation2 + $0x80] sm:$0xff] %vm1950_vm11, %v1899_v27 }
 0x1fb   : > { %1798 = vst.msk [vmem:[#allocation2 + $0x88] sm:$0xff] %vm1780_vm10, %v1731_v28  ;;  %1916 = vrot.lane.b32.xlu1 %v6928_v26, %s5971_s25 }
 0x1fc   : > { %1914 = vrot.lane.b32.xlu0 %v6925_v25, %s5971_s25 }
 0x1fd   : > { %v1206_v29 = vpop.permute.xlu1 %1205 }
 0x1fe   : > { %v643_v31 = vpop.permute.xlu0 %642  ;;  %1277 = vst.msk [vmem:[#allocation2 + $0x98] sm:$0xff] %vm1257_vm7, %v1206_v29 }
 0x1ff   : > { %719 = vst.msk [vmem:[#allocation2 + $0xa0] sm:$0xff] %vm698_vm4, %v643_v31  ;;  %656 = vrot.lane.b32.xlu1 %v1663_v5, %s5965_s10  ;;  %v3029_v31 = vld [vmem:[%s8214_s3 + $0xf8] sm:$0xff] }
 0x200   : > { %654 = vrot.lane.b32.xlu0 %v6859_v62, %s5965_s10  ;;  %5436 = vmatprep.subr.mxu1 %v3029_v31 }
 0x201   : > { %v1901_v33 = vpop.permute.xlu1 %1900  ;;  %v1996_v36 = vld [vmem:[#allocation2 + $0x80] sm:$0xff] }
 0x202   : > { %v1386_v35 = vpop.permute.xlu0 %1385  ;;  %1968 = vst.msk [vmem:[#allocation2 + $0x88] sm:$0xff] %vm1950_vm11, %v1901_v33  ;;  %5746 = vmatprep.mubr.msk.f32.mxu0 %vm2024_vm12, %v1996_v36  ;;  %v3013_v36 = vld [vmem:[%s8214_s3 + $0x78] sm:$0xff] }
 0x203   : > { %1458 = vst.msk [vmem:[#allocation2 + $0x90] sm:$0xff] %vm1439_vm8, %v1386_v35  ;;  %850 = vrot.lane.b32.xlu1 %v1833_v13, %s5964_s29  ;;  %5437 = vmatpush3.msra.mxu1 %v3013_v36 }
 0x204   : > { %848 = vrot.lane.b32.xlu0 %v6878_v7, %s5964_s29 }
 0x205   : > { %v837_v58 = vpop.permute.xlu1 %836 }
 0x206   : > { %v645_v54 = vpop.permute.xlu0 %644  ;;  %913 = vst.msk [vmem:[#allocation2 + $0xa0] sm:$0xff] %vm892_vm5, %v837_v58  ;;  %v3028_v58 = vld [vmem:[%s8214_s3 + $0xf0] sm:$0xff] }
 0x207   : > { %720 = vst.msk [vmem:[#allocation2 + $0xa8] sm:$0xff] %vm698_vm4, %v645_v54  ;;  %v3012_v54 = vld [vmem:[%s8214_s3 + $0x70] sm:$0xff]  ;;  %5438 = vmatprep.subr.mxu1 %v3028_v58 }
 0x208   : > { %1038 = vrot.lane.b32.xlu0 %v6705_v43, %s5966_s11  ;;  %5439 = vmatpush3.msra.mxu1 %v3012_v54 }
 0x209   : > { %v1564_v37 = vpop.permute.xlu1 %1563  ;;  %v1997_v42 = vld [vmem:[#allocation2 + $0x88] sm:$0xff] }
 0x20a   : > { %v1388_v32 = vpop.permute.xlu0 %1387  ;;  %1630 = vst.msk [vmem:[#allocation2 + $0x90] sm:$0xff] %vm1611_vm9, %v1564_v37  ;;  %v5730_v0 = vpop.f32.mrf.mxu0  ;;  %5747 = vmatmul.mubr.msk.f32.gmra.mxu0 %vm2024_vm12, %v1997_v42  ;;  %v3027_v37 = vld [vmem:[%s8214_s3 + $0xe8] sm:$0xff] }
 0x20b   : > { %1459 = vst.msk [vmem:[#allocation2 + $0x98] sm:$0xff] %vm1439_vm8, %v1388_v32  ;;  %v2217_v44 = vadd.f32 %v5730_v0, %v6826_v41  ;;  %5440 = vmatprep.subr.mxu1 %v3027_v37  ;;  %v3000_v37 = vld [vmem:[%s8214_s3 + $0x10] sm:$0xff] }
 0x20c   : > { %1040 = vrot.lane.b32.xlu0 %v1496_v17, %s5966_s11  ;;  %v2211_v45 = vpop.f32.mrf.mxu0 }
 0x20d   : > { %v2355_v46 = vmax.f32 %v2217_v44, 0.0  ;;  %v2212_v47 = vadd.f32 %v6826_v41, %v2211_v45  ;;  %v1027_v49 = vpop.permute.xlu1 %1026  ;;  %v3011_v45 = vld [vmem:[%s8214_s3 + $0x68] sm:$0xff] }
 0x20e   : > { %v839_v43 = vpop.permute.xlu0 %838  ;;  %1097 = vst.msk [vmem:[#allocation2 + $0xa0] sm:$0xff] %vm1076_vm6, %v1027_v49  ;;  %5441 = vmatpush3.msra.mxu1 %v3011_v45 }
 0x20f   : > { %914 = vst.msk [vmem:[#allocation2 + $0xa8] sm:$0xff] %vm892_vm5, %v839_v43  ;;  %v2354_v34 = vmax.f32 %v2212_v47, 0.0  ;;  %v3026_v47 = vld [vmem:[%s8214_s3 + $0xe0] sm:$0xff] }
 0x210   : > { %2388 = vst.msk [vmem:[#allocation3 + $0x28] sm:$0xff] %vm2382_vm13, %v2355_v46  ;;  %2499 = vrot.lane.b32.xlu0 %v2471_v50, %s5971_s25  ;;  %5442 = vmatprep.subr.mxu1 %v3026_v47  ;;  %v3010_v43 = vld [vmem:[%s8214_s3 + $0x60] sm:$0xff] }
 0x211   : > { %2387 = vst.msk [vmem:[#allocation3 + $0x20] sm:$0xff] %vm2382_vm13, %v2354_v34  ;;  %v1733_v51 = vpop.permute.xlu1 %1732  ;;  %5443 = vmatpush3.msra.mxu1 %v3010_v43 }
 0x212   : > { %v1566_v52 = vpop.permute.xlu0 %1565  ;;  %1799 = vst.msk [vmem:[#allocation2 + $0x90] sm:$0xff] %vm1780_vm10, %v1733_v51 }
 0x213   : > { %1631 = vst.msk [vmem:[#allocation2 + $0x98] sm:$0xff] %vm1611_vm9, %v1566_v52 }
 0x214   : > { %1221 = vrot.lane.b32.xlu0 %v6916_v22, %s5967_s12 }
 0x215   : > { %v1208_v53 = vpop.permute.xlu1 %1207 }
 0x216   : > { %v1029_v6 = vpop.permute.xlu0 %1028  ;;  %1278 = vst.msk [vmem:[#allocation2 + $0xa0] sm:$0xff] %vm1257_vm7, %v1208_v53  ;;  %v3025_v53 = vld [vmem:[%s8214_s3 + $0xd8] sm:$0xff] }
 0x217   : > { %v2420_v55 = vld [vmem:[#allocation3 + $0x28] sm:$0xff]  ;;  %1098 = vst.msk [vmem:[#allocation2 + $0xa8] sm:$0xff] %vm1076_vm6, %v1029_v6  ;;  %5444 = vmatprep.subr.mxu1 %v3025_v53  ;;  %v3009_v6 = vld [vmem:[%s8214_s3 + $0x58] sm:$0xff] }
 0x218   : > { %2422 = vst.msk [vmem:[#allocation5 + $0x18] sm:$0xff] %vm2382_vm13, %v2420_v55  ;;  %2585 = vrot.lane.b32.xlu0 %v2557_v56, %s5972_s18  ;;  %v2419_v57 = vld [vmem:[#allocation3 + $0x20] sm:$0xff]  ;;  %5445 = vmatpush3.msra.mxu1 %v3009_v6  ;;  %v3024_v56 = vld [vmem:[%s8214_s3 + $0xd0] sm:$0xff] }
 0x219   : > { %2421 = vst.msk [vmem:[#allocation5 + $0x10] sm:$0xff] %vm2382_vm13, %v2419_v57  ;;  %v1903_v59 = vpop.permute.xlu1 %1902  ;;  %5446 = vmatprep.subr.mxu1 %v3024_v56  ;;  %v3008_v57 = vld [vmem:[%s8214_s3 + $0x50] sm:$0xff] }
 0x21a   : > { %v1735_v60 = vpop.permute.xlu0 %1734  ;;  %1969 = vst.msk [vmem:[#allocation2 + $0x90] sm:$0xff] %vm1950_vm11, %v1903_v59  ;;  %5447 = vmatpush3.msra.mxu1 %v3008_v57 }
 0x21b   : > { %1800 = vst.msk [vmem:[#allocation2 + $0x98] sm:$0xff] %vm1780_vm10, %v1735_v60 }
 0x21c   : > { %1403 = vrot.lane.b32.xlu0 %v6928_v26, %s5968_s13 }
 0x21d   : > { %v1210_v61 = vpop.permute.xlu1 %1209 }
 0x21e   : > { %v647_v12 = vpop.permute.xlu0 %646  ;;  %1279 = vst.msk [vmem:[#allocation2 + $0xa8] sm:$0xff] %vm1257_vm7, %v1210_v61  ;;  %v3023_v61 = vld [vmem:[%s8214_s3 + $0xc8] sm:$0xff] }
 0x21f   : > { %721 = vst.msk [vmem:[#allocation2 + $0xb0] sm:$0xff] %vm698_vm4, %v647_v12  ;;  %v6977_v62 = vld [vmem:[#allocation5 + $0x18] sm:$0xff]  ;;  %5448 = vmatprep.subr.mxu1 %v3023_v61 }
 0x220   : > { %2460 = vst.msk [vmem:[#allocation4 + $0x48] sm:$0xff] %vm2382_vm13, %v6977_v62  ;;  %v6981_v63 = vld [vmem:[#allocation5 + $0x14] sm:$0xff]  ;;  %v2558_v47 = vld [vmem:[#allocation5 + $0xc] sm:$0xff] }
 0x221   : > { %v2643_v38 = vld [vmem:[#allocation5 + $0x10] sm:$0xff]  ;;  %v1905_v1 = vpop.permute.xlu1 %1904  ;;  %2765 = vrot.lane.b32.xlu1 %v6981_v63, %s5971_s25  ;;  %v1998_v2 = vld [vmem:[#allocation2 + $0x90] sm:$0xff]  ;;  %v3007_v12 = vld [vmem:[%s8214_s3 + $0x48] sm:$0xff] }
 0x222   : > { %v1390_v18 = vpop.permute.xlu0 %1389  ;;  %2667 = vrot.lane.b32.xlu0 %v2643_v38, %s5973_s19  ;;  %v6986_v3 = vld [vmem:[#allocation5 + $0x12] sm:$0xff]  ;;  %2459 = vst.msk [vmem:[#allocation4 + $0x30] sm:$0xff] %vm2382_vm13, %v2643_v38  ;;  %5749 = vmatprep.mubr.msk.f32.mxu0 %vm2024_vm12, %v1998_v2 }
 0x223   : > { %1970 = vst.msk [vmem:[#allocation2 + $0x98] sm:$0xff] %vm1950_vm11, %v1905_v1  ;;  %5449 = vmatpush3.msra.mxu1 %v3007_v12  ;;  %v3022_v38 = vld [vmem:[%s8214_s3 + $0xc0] sm:$0xff] }
 0x224   : > { %1460 = vst.msk [vmem:[#allocation2 + $0xa0] sm:$0xff] %vm1439_vm8, %v1390_v18  ;;  %5450 = vmatprep.subr.mxu1 %v3022_v38  ;;  %v3006_v1 = vld [vmem:[%s8214_s3 + $0x40] sm:$0xff]  ;;  %v1318_v38 = vld [vmem:[%s6058_s24 + $0xfa] sm:$0x3f] }
 0x225   : > { %2728 = vst.msk [vmem:[#allocation4 + $0x8] sm:$0xff] %vm2382_vm13, %v6986_v3  ;;  %v841_v5 = vpop.permute.xlu1 %840  ;;  %1219 = vrot.lane.b32.xlu1 %v6913_v21, %s5967_s12  ;;  %5451 = vmatpush3.msra.mxu1 %v3006_v1  ;;  %v2472_v12 = vld [vmem:[#allocation5 + $0xa] sm:$0xff] }
 0x226   : > { %v649_v7 = vpop.permute.xlu0 %648  ;;  %1748 = vrot.lane.b32.xlu0 %v6993_v4, %s5970_s15  ;;  %915 = vst.msk [vmem:[#allocation2 + $0xb0] sm:$0xff] %vm892_vm5, %v841_v5  ;;  %v3021_v5 = vld [vmem:[%s8214_s3 + $0xb8] sm:$0xff] }
 0x227   : > { %722 = vst.msk [vmem:[#allocation2 + $0xb8] sm:$0xff] %vm698_vm4, %v649_v7  ;;  %5452 = vmatprep.subr.mxu1 %v3021_v5 }
 0x229   : > { %v1568_v8 = vpop.permute.xlu1 %1567 }
 0x22a   : > { %v1392_v9 = vpop.permute.xlu0 %1391  ;;  %v1999_v24 = vld [vmem:[#allocation2 + $0x98] sm:$0xff]  ;;  %658 = vrot.lane.b32.xlu0 %v6913_v21, %s5965_s10  ;;  %1632 = vst.msk [vmem:[#allocation2 + $0xa0] sm:$0xff] %vm1611_vm9, %v1568_v8  ;;  %v5733_v10 = vpop.f32.mrf.mxu0 }
 0x22b   : > { %1461 = vst.msk [vmem:[#allocation2 + $0xa8] sm:$0xff] %vm1439_vm8, %v1392_v9  ;;  %5750 = vmatmul.mubr.msk.f32.gmra.mxu0 %vm2024_vm12, %v1999_v24  ;;  %v3005_v8 = vld [vmem:[%s8214_s3 + $0x38] sm:$0xff]  ;;  %v3020_v9 = vld [vmem:[%s8214_s3 + $0xb0] sm:$0xff] }
 0x22c   : > { %v2221_v11 = vpop.f32.mrf.mxu0  ;;  %5453 = vmatpush3.msra.mxu1 %v3005_v8  ;;  %v3004_v10 = vld [vmem:[%s8214_s3 + $0x30] sm:$0xff] }
 0x22d   : > { %v1031_v30 = vpop.permute.xlu1 %1030  ;;  %5454 = vmatprep.subr.mxu1 %v3020_v9 }
 0x22e   : > { %v843_v13 = vpop.permute.xlu0 %842  ;;  %1918 = vrot.lane.b32.xlu0 %v7009_v40, %s5971_s25  ;;  %1099 = vst.msk [vmem:[#allocation2 + $0xb0] sm:$0xff] %vm1076_vm6, %v1031_v30  ;;  %5455 = vmatpush3.msra.mxu1 %v3004_v10 }
 0x22f   : > { %916 = vst.msk [vmem:[#allocation2 + $0xb8] sm:$0xff] %vm892_vm5, %v843_v13  ;;  %v3019_v13 = vld [vmem:[%s8214_s3 + $0xa8] sm:$0xff] }
 0x230   : > { %5456 = vmatprep.subr.mxu1 %v3019_v13 }
 0x231   : > { %v1737_v15 = vpop.permute.xlu1 %1736 }
 0x232   : > { %v1570_v16 = vpop.permute.xlu0 %1569  ;;  %1801 = vst.msk [vmem:[#allocation2 + $0xa0] sm:$0xff] %vm1780_vm10, %v1737_v15  ;;  %v3003_v15 = vld [vmem:[%s8214_s3 + $0x28] sm:$0xff] }
 0x233   : > { %1633 = vst.msk [vmem:[#allocation2 + $0xa8] sm:$0xff] %vm1611_vm9, %v1570_v16  ;;  %v3018_v16 = vld [vmem:[%s8214_s3 + $0xa0] sm:$0xff]  ;;  %5457 = vmatpush3.msra.mxu1 %v3003_v15 }
 0x234   : > { %5458 = vmatprep.subr.mxu1 %v3018_v16 }
 0x235   : > { %v1212_v17 = vpop.permute.xlu1 %1211 }
 0x236   : > { %v1033_v39 = vpop.permute.xlu0 %1032  ;;  %1280 = vst.msk [vmem:[#allocation2 + $0xb0] sm:$0xff] %vm1257_vm7, %v1212_v17  ;;  %v3002_v17 = vld [vmem:[%s8214_s3 + $0x20] sm:$0xff] }
 0x237   : > { %1100 = vst.msk [vmem:[#allocation2 + $0xb8] sm:$0xff] %vm1076_vm6, %v1033_v39  ;;  %v3017_v39 = vld [vmem:[%s8214_s3 + $0x98] sm:$0xff]  ;;  %5459 = vmatpush3.msra.mxu1 %v3002_v17  ;;  %v502_v17 = vld [vmem:[%s6058_s24 + $0xe8] sm:$0xff] }
 0x238   : > { %5460 = vmatprep.subr.mxu1 %v3017_v39  ;;  %535 = vst.msk [vmem:[#allocation2 + $0xe8] sm:$0xff] %vm505_vm2, %v502_v17  ;;  %vm1978_vm2 = vcmask 292096  }
 0x239   : > { %v1907_v20 = vpop.permute.xlu1 %1906 }
 0x23a   : > { %v1739_v21 = vpop.permute.xlu0 %1738  ;;  %1971 = vst.msk [vmem:[#allocation2 + $0xa0] sm:$0xff] %vm1950_vm11, %v1907_v20 }
 0x23b   : > { %1802 = vst.msk [vmem:[#allocation2 + $0xa8] sm:$0xff] %vm1780_vm10, %v1739_v21 }
 0x23d   : > { %v1214_v23 = vpop.permute.xlu1 %1213 }
 0x23e   : > { %v651_v48 = vpop.permute.xlu0 %650  ;;  %1281 = vst.msk [vmem:[#allocation2 + $0xb8] sm:$0xff] %vm1257_vm7, %v1214_v23  ;;  %v3001_v23 = vld [vmem:[%s8214_s3 + $0x18] sm:$0xff] }
 0x23f   : > { %723 = vst.msk [vmem:[#allocation2 + $0xc0] sm:$0xff] %vm698_vm4, %v651_v48  ;;  %v3016_v48 = vld [vmem:[%s8214_s3 + $0x90] sm:$0xff]  ;;  %5461 = vmatpush3.msra.mxu1 %v3001_v23 }
 0x240   : > { %5462 = vmatprep.subr.mxu1 %v3016_v48 }
 0x241   : > { %v1909_v27 = vpop.permute.xlu1 %1908  ;;  %v2000_v29 = vld [vmem:[#allocation2 + $0xa0] sm:$0xff]  ;;  %5463 = vmatpush3.msra.mxu1 %v3000_v37 }
 0x242   : > { %v1394_v28 = vpop.permute.xlu0 %1393  ;;  %1972 = vst.msk [vmem:[#allocation2 + $0xa8] sm:$0xff] %vm1950_vm11, %v1909_v27  ;;  %5752 = vmatprep.mubr.msk.f32.mxu0 %vm2024_vm12, %v2000_v29 }
 0x243   : > { %1462 = vst.msk [vmem:[#allocation2 + $0xb0] sm:$0xff] %vm1439_vm8, %v1394_v28 }
 0x245   : > { %v845_v35 = vpop.permute.xlu1 %844 }
 0x246   : > { %v653_v33 = vpop.permute.xlu0 %652  ;;  %917 = vst.msk [vmem:[#allocation2 + $0xc0] sm:$0xff] %vm892_vm5, %v845_v35 }
 0x247   : > { %724 = vst.msk [vmem:[#allocation2 + $0xc8] sm:$0xff] %vm698_vm4, %v653_v33 }
 0x249   : > { %v1572_v42 = vpop.permute.xlu1 %1571  ;;  %v2001_v0 = vld [vmem:[#allocation2 + $0xa8] sm:$0xff] }
 0x24a   : > { %v1396_v32 = vpop.permute.xlu0 %1395  ;;  %1634 = vst.msk [vmem:[#allocation2 + $0xb0] sm:$0xff] %vm1611_vm9, %v1572_v42  ;;  %v5736_v44 = vpop.f32.mrf.mxu0  ;;  %5753 = vmatmul.mubr.msk.f32.gmra.mxu0 %vm2024_vm12, %v2001_v0  ;;  %v2999_v42 = vld [vmem:[%s8214_s3 + $0x8] sm:$0xff]  ;;  %v3014_v0 = vld [vmem:[%s8214_s3 + $0x80] sm:$0xff] }
 0x24b   : > { %1463 = vst.msk [vmem:[#allocation2 + $0xb8] sm:$0xff] %vm1439_vm8, %v1396_v32  ;;  %v2237_v46 = vadd.f32 %v5736_v44, %v6826_v41  ;;  %v3015_v32 = vld [vmem:[%s8214_s3 + $0x88] sm:$0xff]  ;;  %v2998_v44 = vld [vmem:[%s8214_s3] sm:$0xff] }
 0x24c   : > { %v2231_v49 = vpop.f32.mrf.mxu0  ;;  %5464 = vmatprep.subr.mxu1 %v3015_v32 }
 0x24d   : > { %v2359_v50 = vmax.f32 %v2237_v46, 0.0  ;;  %v2232_v34 = vadd.f32 %v6826_v41, %v2231_v49  ;;  %v1035_v52 = vpop.permute.xlu1 %1034  ;;  %5465 = vmatpush3.msra.mxu1 %v2999_v42  ;;  %v763_v42 = vld [vmem:[%s6058_s24 + $0xfa] sm:$0x3f] }
 0x24e   : > { %v847_v51 = vpop.permute.xlu0 %846  ;;  %1101 = vst.msk [vmem:[#allocation2 + $0xc0] sm:$0xff] %vm1076_vm6, %v1035_v52  ;;  %5466 = vmatprep.subr.mxu1 %v3014_v0 }
 0x24f   : > { %918 = vst.msk [vmem:[#allocation2 + $0xc8] sm:$0xff] %vm892_vm5, %v847_v51  ;;  %v2358_v55 = vmax.f32 %v2232_v34, 0.0  ;;  %5467 = vmatpush3.msra.mxu1 %v2998_v44 }
 0x250   : > { %2392 = vst.msk [vmem:[#allocation3 + $0x48] sm:$0xff] %vm2382_vm13, %v2359_v50 }
 0x251   : > { %2391 = vst.msk [vmem:[#allocation3 + $0x40] sm:$0xff] %vm2382_vm13, %v2358_v55  ;;  %v1741_v60 = vpop.permute.xlu1 %1740  ;;  %v1136_v55 = vld [vmem:[%s6058_s24 + $0xf9] sm:$0x7f] }
 0x252   : > { %v1574_v59 = vpop.permute.xlu0 %1573  ;;  %1803 = vst.msk [vmem:[#allocation2 + $0xb0] sm:$0xff] %vm1780_vm10, %v1741_v60  ;;  %v1667_v60 = vld [vmem:[%s6058_s24 + $0xf9] sm:$0x7f] }
 0x253   : > { %1635 = vst.msk [vmem:[#allocation2 + $0xb8] sm:$0xff] %vm1611_vm9, %v1574_v59 }
 0x255   : > { %v1216_v2 = vpop.permute.xlu1 %1215 }
 0x256   : > { %v1037_v18 = vpop.permute.xlu0 %1036  ;;  %1282 = vst.msk [vmem:[#allocation2 + $0xc0] sm:$0xff] %vm1257_vm7, %v1216_v2  ;;  %v1837_v2 = vld [vmem:[%s6058_s24 + $0xfa] sm:$0x3f] }
 0x257   : > { %v2424_v7 = vld [vmem:[#allocation3 + $0x48] sm:$0xff]  ;;  %1102 = vst.msk [vmem:[#allocation2 + $0xc8] sm:$0xff] %vm1076_vm6, %v1037_v18 }
 0x258   : > { %2426 = vst.msk [vmem:[#allocation5 + $0x28] sm:$0xff] %vm2382_vm13, %v2424_v7  ;;  %v2423_v24 = vld [vmem:[#allocation3 + $0x40] sm:$0xff] }
 0x259   : > { %2425 = vst.msk [vmem:[#allocation5 + $0x20] sm:$0xff] %vm2382_vm13, %v2423_v24  ;;  %v1911_v30 = vpop.permute.xlu1 %1910 }
 0x25a   : > { %v1743_v11 = vpop.permute.xlu0 %1742  ;;  %1973 = vst.msk [vmem:[#allocation2 + $0xb0] sm:$0xff] %vm1950_vm11, %v1911_v30 }
 0x25b   : > { %1804 = vst.msk [vmem:[#allocation2 + $0xb8] sm:$0xff] %vm1780_vm10, %v1743_v11 }
 0x25d   : > { %v1398_v21 = vpop.permute.xlu1 %1397 }
 0x25e   : > { %v1218_v20 = vpop.permute.xlu0 %1217  ;;  %1464 = vst.msk [vmem:[#allocation2 + $0xc0] sm:$0xff] %vm1439_vm8, %v1398_v21 }
 0x25f   : > { %1283 = vst.msk [vmem:[#allocation2 + $0xc8] sm:$0xff] %vm1257_vm7, %v1218_v20  ;;  %v7128_v27 = vld [vmem:[#allocation5 + $0x28] sm:$0xff] }
 0x260   : > { %v2448_v28 = vld [vmem:[#allocation5 + $0x28] sm:$0xff]  ;;  %2836 = vrot.lane.b32.xlu0 %v7128_v27, %s5972_s18  ;;  %v7133_v29 = vld [vmem:[#allocation5 + $0x20] sm:$0xff] }
 0x261   : > { %2462 = vst.msk [vmem:[#allocation4 + $0x78] sm:$0xff] %vm2382_vm13, %v2448_v28  ;;  %v7135_v31 = vld [vmem:[#allocation5 + $0x22] sm:$0xff]  ;;  %2834 = vrot.lane.b32.xlu1 %v7133_v29, %s5972_s18  ;;  %v1400_v35 = vpop.permute.xlu1 %1399  ;;  %v7141_v54 = vld [vmem:[#allocation5 + $0x1a] sm:$0xff]  ;;  %2461 = vst.msk [vmem:[#allocation4 + $0x60] sm:$0xff] %vm2382_vm13, %v7133_v29 }
 0x262   : > { %v1913_v33 = vpop.permute.xlu0 %1912  ;;  %v2002_v36 = vld [vmem:[#allocation2 + $0xb0] sm:$0xff]  ;;  %2730 = vst.msk [vmem:[#allocation4 + $0x38] sm:$0xff] %vm2382_vm13, %v7135_v31  ;;  %2729 = vst.msk [vmem:[#allocation4 + $0x20] sm:$0xff] %vm2382_vm13, %v7141_v54 }
 0x263   : > { %v7139_v58 = vld [vmem:[#allocation5 + $0x24] sm:$0xff]  ;;  %1974 = vst.msk [vmem:[#allocation2 + $0xb8] sm:$0xff] %vm1950_vm11, %v1913_v33  ;;  %5755 = vmatprep.mubr.msk.f32.mxu0 %vm2024_vm12, %v2002_v36 }
 0x264   : > { %1465 = vst.msk [vmem:[#allocation2 + $0xc8] sm:$0xff] %vm1439_vm8, %v1400_v35  ;;  %852 = vrot.lane.b32.xlu0 %v6925_v25, %s5964_s29  ;;  %v569_v36 = vld [vmem:[%s6058_s24 + $0xf9] sm:$0x7f] }
 0x265   : > { %2945 = vst.msk [vmem:[#allocation4 + $0x10] sm:$0xff] %vm2382_vm13, %v7139_v58  ;;  %1401 = vrot.lane.b32.xlu1 %v6925_v25, %s5968_s13  ;;  %v1578_v46 = vpop.permute.xlu1 %1577 }
 0x266   : > { %v1576_v45 = vpop.permute.xlu0 %1575  ;;  %1637 = vst.msk [vmem:[#allocation2 + $0xc8] sm:$0xff] %vm1611_vm9, %v1578_v46 }
 0x267   : > { %1636 = vst.msk [vmem:[#allocation2 + $0xc0] sm:$0xff] %vm1611_vm9, %v1576_v45 }
 0x268   : > { %2587 = vrot.lane.b32.xlu0 %v2558_v47, %s5972_s18 }
 0x269   : > { %2894 = vrot.lane.b32.xlu1 %v7135_v31, %s5973_s19  ;;  %v1747_v43 = vpop.permute.xlu1 %1746 }
 0x26a   : > { %v1745_v49 = vpop.permute.xlu0 %1744  ;;  %v2003_v50 = vld [vmem:[#allocation2 + $0xb8] sm:$0xff]  ;;  %1806 = vst.msk [vmem:[#allocation2 + $0xc8] sm:$0xff] %vm1780_vm10, %v1747_v43  ;;  %v5739_v25 = vpop.f32.mrf.mxu0 }
 0x26b   : > { %1805 = vst.msk [vmem:[#allocation2 + $0xc0] sm:$0xff] %vm1780_vm10, %v1745_v49  ;;  %5756 = vmatmul.mubr.msk.f32.gmra.mxu0 %vm2024_vm12, %v2003_v50 }
 0x26c   : > { %854 = vrot.lane.b32.xlu0 %v6928_v26, %s5964_s29  ;;  %v2241_v34 = vpop.f32.mrf.mxu0  ;;  %v7195_v26 = vld [vmem:[#allocation5 + $0x1c] sm:$0xff] }
 0x26d   : > { %1579 = vrot.lane.b32.xlu1 %v6893_v14, %s5969_s14  ;;  %v1917_v52 = vpop.permute.xlu1 %1916 }
 0x26e   : > { %v1915_v51 = vpop.permute.xlu0 %1914  ;;  %1976 = vst.msk [vmem:[#allocation2 + $0xc8] sm:$0xff] %vm1950_vm11, %v1917_v52 }
 0x26f   : > { %1975 = vst.msk [vmem:[#allocation2 + $0xc0] sm:$0xff] %vm1950_vm11, %v1915_v51 }
 0x270   : > { %2669 = vrot.lane.b32.xlu0 %v6977_v62, %s5973_s19 }
 0x271   : > { %1581 = vrot.lane.b32.xlu1 %v6903_v19, %s5969_s14  ;;  %v657_v6 = vpop.permute.xlu1 %656 }
 0x272   : > { %v655_v53 = vpop.permute.xlu0 %654  ;;  %726 = vst.msk [vmem:[#allocation2 + $0xd8] sm:$0xff] %vm698_vm4, %v657_v6 }
 0x273   : > { %725 = vst.msk [vmem:[#allocation2 + $0xd0] sm:$0xff] %vm698_vm4, %v655_v53 }
 0x274   : > { %1223 = vrot.lane.b32.xlu0 %v6993_v4, %s5967_s12 }
 0x275   : > { %2767 = vrot.lane.b32.xlu1 %v7195_v26, %s5971_s25  ;;  %v2005_v57 = vld [vmem:[#allocation2 + $0xc8] sm:$0xff]  ;;  %v851_v59 = vpop.permute.xlu1 %850 }
 0x276   : > { %v849_v56 = vpop.permute.xlu0 %848  ;;  %v2004_v62 = vld [vmem:[#allocation2 + $0xc0] sm:$0xff]  ;;  %920 = vst.msk [vmem:[#allocation2 + $0xd8] sm:$0xff] %vm892_vm5, %v851_v59 }
 0x277   : > { %919 = vst.msk [vmem:[#allocation2 + $0xd0] sm:$0xff] %vm892_vm5, %v849_v56  ;;  %5758 = vmatprep.mubr.msk.f32.mxu0 %vm2024_vm12, %v2004_v62 }
 0x278   : > { %5759 = vmatmul.mubr.msk.f32.gmra.mxu0 %vm2024_vm12, %v2005_v57  ;;  %1225 = vrot.lane.b32.xlu0 %v1136_v55, %s5967_s12 }
 0x279   : > { %1750 = vrot.lane.b32.xlu1 %v1667_v60, %s5970_s15 }
 0x27a   : > { %v1039_v61 = vpop.permute.xlu0 %1038 }
 0x27b   : > { %1103 = vst.msk [vmem:[#allocation2 + $0xd0] sm:$0xff] %vm1076_vm6, %v1039_v61 }
 0x27c   : > { %2503 = vrot.lane.b32.xlu0 %v6986_v3, %s5971_s25 }
 0x27d   : > { %2501 = vrot.lane.b32.xlu1 %v2472_v12, %s5971_s25 }
 0x27e   : > { %v1041_v1 = vpop.permute.xlu0 %1040 }
 0x27f   : > { %1104 = vst.msk [vmem:[#allocation2 + $0xd8] sm:$0xff] %vm1076_vm6, %v1041_v1 }
 0x280   : > { %1407 = vrot.lane.b32.xlu0 %v1318_v38, %s5968_s13 }
 0x281   : > { %660 = vrot.lane.b32.xlu1 %v6916_v22, %s5965_s10 }
 0x282   : > { %v2500_v18 = vpop.permute.xlu0 %2499 }
 0x283   : > { %2542 = vst.msk [vmem:[#allocation4] sm:$0xff] %vm2541_vm14, %v2500_v18 }
 0x285   : > { %1920 = vrot.lane.b32.xlu1 %v1837_v2, %s5971_s25 }
 0x286   : > { %v1222_v5 = vpop.permute.xlu0 %1221 }
 0x287   : > { %1285 = vst.msk [vmem:[#allocation2 + $0xd8] sm:$0xff] %vm1257_vm7, %v1222_v5 }
 0x28a   : > { %v2586_v3 = vpop.permute.xlu0 %2585  ;;  %v5742_v7 = vpop.f32.mrf.mxu0 }
 0x28b   : > { %2628 = vst.msk [vmem:[#allocation4] sm:$0xff] %vm2627_vm15, %v2586_v3  ;;  %v2257_v8 = vadd.f32 %v5742_v7, %v6826_v41 }
 0x28c   : > { %v2251_v9 = vpop.f32.mrf.mxu0 }
 0x28d   : > { %v2363_v24 = vmax.f32 %v2257_v8, 0.0  ;;  %v2252_v22 = vadd.f32 %v6826_v41, %v2251_v9 }
 0x28e   : > { %v1404_v10 = vpop.permute.xlu0 %1403 }
 0x28f   : > { %1467 = vst.msk [vmem:[#allocation2 + $0xd8] sm:$0xff] %vm1439_vm8, %v1404_v10  ;;  %v2362_v11 = vmax.f32 %v2252_v22, 0.0 }
 0x290   : > { %2396 = vst.msk [vmem:[#allocation3 + $0x68] sm:$0xff] %vm2382_vm13, %v2363_v24 }
 0x291   : > { %2395 = vst.msk [vmem:[#allocation3 + $0x60] sm:$0xff] %vm2382_vm13, %v2362_v11 }
 0x293   : > { %v2766_v30 = vpop.permute.xlu1 %2765 }
 0x294   : > { %v2668_v13 = vpop.permute.xlu0 %2667  ;;  %2801 = vst.msk [vmem:[#allocation4 + $0x8] sm:$0xff] %vm2541_vm14, %v2766_v30 }
 0x295   : > { %2704 = vst.msk [vmem:[#allocation4] sm:$0xff] %vm2703_vm0, %v2668_v13 }
 0x297   : > { %v2428_v15 = vld [vmem:[#allocation3 + $0x68] sm:$0xff]  ;;  %v1220_v41 = vpop.permute.xlu1 %1219 }
 0x298   : > { %2430 = vst.msk [vmem:[#allocation5 + $0x38] sm:$0xff] %vm2382_vm13, %v2428_v15  ;;  %v7229_v16 = vpop.permute.xlu0 %1748  ;;  %v2427_v39 = vld [vmem:[#allocation3 + $0x60] sm:$0xff] }
 0x299   : > { %1284 = vst.msk [vmem:[#allocation2 + $0xd0] sm:$0xff] %vm1257_vm7, %v1220_v41 }
 0x29a   : > { %2429 = vst.msk [vmem:[#allocation5 + $0x30] sm:$0xff] %vm2382_vm13, %v2427_v39 }
 0x29c   : > { %v659_v20 = vpop.permute.xlu0 %658  ;;  %v2956_v12 = vld [vmem:[#allocation4] sm:$0xff] }
 0x29d   : > { %727 = vst.msk [vmem:[#allocation2 + $0xe0] sm:$0xff] %vm698_vm4, %v659_v20 }
 0x29f   : > { %v7236_v21 = vld [vmem:[#allocation5 + $0x38] sm:$0xff] }
 0x2a0   : > { %2464 = vst.msk [vmem:[#allocation4 + $0xa8] sm:$0xff] %vm2382_vm13, %v7236_v21  ;;  %v1919_v44 = vpop.permute.xlu0 %1918 }
 0x2a1   : > { %v7240_v23 = vld [vmem:[#allocation5 + $0x2a] sm:$0xff]  ;;  %v7242_v48 = vld [vmem:[#allocation5 + $0x32] sm:$0xff] }
 0x2a2   : > { %v7244_v28 = vld [vmem:[#allocation5 + $0x30] sm:$0xff]  ;;  %2896 = vrot.lane.b32.xlu1 %v7240_v23, %s5973_s19  ;;  %2898 = vrot.lane.b32.xlu0 %v7242_v48, %s5973_s19  ;;  %2731 = vst.msk [vmem:[#allocation4 + $0x50] sm:$0xff] %vm2382_vm13, %v7240_v23  ;;  %2732 = vst.msk [vmem:[#allocation4 + $0x68] sm:$0xff] %vm2382_vm13, %v7242_v48 }
 0x2a3   : > { %v7250_v33 = vld [vmem:[#allocation5 + $0x2c] sm:$0xff]  ;;  %v7252_v35 = vld [vmem:[#allocation5 + $0x34] sm:$0xff]  ;;  %2463 = vst.msk [vmem:[#allocation4 + $0x90] sm:$0xff] %vm2382_vm13, %v7244_v28 }
 0x2a4   : > { %2946 = vst.msk [vmem:[#allocation4 + $0x28] sm:$0xff] %vm2382_vm13, %v7250_v33  ;;  %2947 = vst.msk [vmem:[#allocation4 + $0x40] sm:$0xff] %vm2382_vm13, %v7252_v35 }
 0x2a6   : > { %1042 = vrot.lane.b32.xlu1 %v6893_v14, %s5966_s11  ;;  %662 = vrot.lane.b32.xlu0 %v6993_v4, %s5965_s10  ;;  %v3033_v14 = vld [vmem:[%s8214_s3 + $0x118] sm:$0xff]  ;;  %v3030_v4 = vld [vmem:[%s8214_s3 + $0x100] sm:$0xff] }
 0x2a7   : > { %5770 = vmatprep.subr.mxu0 %v3033_v14 }
 0x2a8   : > { %5771 = vmatpush3.msra.mxu0 %v3033_v14 }
 0x2aa   : > { %1044 = vrot.lane.b32.xlu1 %v6903_v19, %s5966_s11  ;;  %664 = vrot.lane.b32.xlu0 %v569_v36, %s5965_s10  ;;  %v5745_v37 = vpop.f32.mrf.mxu0  ;;  %v3032_v19 = vld [vmem:[%s8214_s3 + $0x110] sm:$0xff] }
 0x2ab   : > { %5772 = vmatprep.subr.mxu0 %v3032_v19 }
 0x2ac   : > { %v2261_v32 = vpop.f32.mrf.mxu0  ;;  %5773 = vmatpush3.msra.mxu0 %v3032_v19 }
 0x2ae   : > { %2769 = vrot.lane.b32.xlu1 %v7139_v58, %s5971_s25  ;;  %2505 = vrot.lane.b32.xlu0 %v7141_v54, %s5971_s25  ;;  %v7307_v54 = vld [vmem:[%s8213_s2] ss:$0 sm:$0xff] }
 0x2b2   : > { %1405 = vrot.lane.b32.xlu1 %v7009_v40, %s5968_s13  ;;  %858 = vrot.lane.b32.xlu0 %v763_v42, %s5964_s29 }
 0x2b6   : > { %2838 = vrot.lane.b32.xlu1 %v7244_v28, %s5972_s18 }
 0x2ba   : > { %2589 = vrot.lane.b32.xlu1 %v6981_v63, %s5972_s18  ;;  %v3031_v63 = vld [vmem:[%s8214_s3 + $0x108] sm:$0xff] }
 0x2bb   : > { %5774 = vmatprep.subr.mxu0 %v3031_v63 }
 0x2bc   : > { %5775 = vmatpush3.msra.mxu0 %v3031_v63 }
 0x2bd   : > { %5776 = vmatprep.subr.mxu0 %v3030_v4 }
 0x2be   : > { %2671 = vrot.lane.b32.xlu1 %v7133_v29, %s5973_s19  ;;  %5777 = vmatpush3.msra.mxu0 %v3030_v4 }
 0x2c2   : > { %2771 = vrot.lane.b32.xlu1 %v7250_v33, %s5971_s25 }
 0x2c6   : > { %856 = vrot.lane.b32.xlu1 %v7009_v40, %s5964_s29 }
 0x2ca   : > { %2840 = vrot.lane.b32.xlu1 %v7236_v21, %s5972_s18  ;;  %v5748_v29 = vpop.f32.mrf.mxu0 }
 0x2cb   : > { %v2277_v0 = vadd.f32 %v7307_v54, %v5748_v29 }
 0x2cc   : > { %v2271_v45 = vpop.f32.mrf.mxu0 }
 0x2cd   : > { %v2367_v46 = vmax.f32 %v2277_v0, 0.0  ;;  %v2272_v47 = vadd.f32 %v7307_v54, %v2271_v45 }
 0x2ce   : > { %2591 = vrot.lane.b32.xlu1 %v7195_v26, %s5972_s18 }
 0x2cf   : > { %2400 = vst.msk [vmem:[#allocation3 + $0x88] sm:$0xff] %vm2382_vm13, %v2367_v46  ;;  %v2366_v40 = vmax.f32 %v2272_v47, 0.0 }
 0x2d1   : > { %2399 = vst.msk [vmem:[#allocation3 + $0x80] sm:$0xff] %vm2382_vm13, %v2366_v40 }
 0x2d2   : > { %2673 = vrot.lane.b32.xlu1 %v7128_v27, %s5973_s19  ;;  %v2837_v49 = vpop.permute.xlu0 %2836 }
 0x2d3   : > { %v2835_v43 = vpop.permute.xlu1 %2834 }
 0x2d4   : > { %2864 = vst.msk [vmem:[#allocation4 + $0x8] sm:$0xff] %vm2627_vm15, %v2835_v43 }
 0x2d6   : > { %2507 = vrot.lane.b32.xlu1 %v7135_v31, %s5971_s25  ;;  %v853_v50 = vpop.permute.xlu0 %852  ;;  %v2432_v25 = vld [vmem:[#allocation3 + $0x88] sm:$0xff] }
 0x2d7   : > { %921 = vst.msk [vmem:[#allocation2 + $0xe0] sm:$0xff] %vm892_vm5, %v853_v50  ;;  %v1402_v34 = vpop.permute.xlu1 %1401 }
 0x2d8   : > { %2434 = vst.msk [vmem:[#allocation5 + $0x48] sm:$0xff] %vm2382_vm13, %v2432_v25  ;;  %v2431_v51 = vld [vmem:[#allocation3 + $0x80] sm:$0xff] }
 0x2d9   : > { %1466 = vst.msk [vmem:[#allocation2 + $0xd0] sm:$0xff] %vm1439_vm8, %v1402_v34 }
 0x2da   : > { %2433 = vst.msk [vmem:[#allocation5 + $0x40] sm:$0xff] %vm2382_vm13, %v2431_v51  ;;  %2593 = vrot.lane.b32.xlu1 %v7139_v58, %s5972_s18  ;;  %v2588_v27 = vpop.permute.xlu0 %2587 }
 0x2db   : > { %v2895_v52 = vpop.permute.xlu1 %2894 }
 0x2dc   : > { %2924 = vst.msk [vmem:[#allocation4 + $0x8] sm:$0xff] %vm2703_vm0, %v2895_v52 }
 0x2de   : > { %2675 = vrot.lane.b32.xlu1 %v7244_v28, %s5973_s19  ;;  %v855_v31 = vpop.permute.xlu0 %854 }
 0x2df   : > { %v7329_v53 = vld [vmem:[#allocation5 + $0x48] sm:$0xff]  ;;  %v1580_v6 = vpop.permute.xlu1 %1579 }
 0x2e0   : > { %2466 = vst.msk [vmem:[#allocation4 + $0xd8] sm:$0xff] %vm2382_vm13, %v7329_v53 }
 0x2e1   : > { %1638 = vst.msk [vmem:[#allocation2 + $0xd0] sm:$0xff] %vm1611_vm9, %v1580_v6  ;;  %v2877_v26 = vld [vmem:[#allocation5 + $0x3a] sm:$0xff]  ;;  %v2878_v56 = vld [vmem:[#allocation5 + $0x42] sm:$0xff] }
 0x2e2   : > { %v2818_v55 = vld [vmem:[#allocation5 + $0x40] sm:$0xff]  ;;  %1807 = vst.msk [vmem:[#allocation2 + $0xd0] sm:$0xff] %vm1780_vm10, %v7229_v16  ;;  %2509 = vrot.lane.b32.xlu1 %v7240_v23, %s5971_s25  ;;  %2900 = vrot.lane.b32.xlu0 %v2877_v26, %s5973_s19  ;;  %v2670_v58 = vpop.permute.xlu0 %2669  ;;  %vm1469_vm10 = vcmask 193696  }
 0x2e3   : > { %v2746_v62 = vld [vmem:[#allocation5 + $0x3c] sm:$0xff]  ;;  %v7339_v57 = vld [vmem:[#allocation5 + $0x44] sm:$0xff]  ;;  %2733 = vst.msk [vmem:[#allocation4 + $0x80] sm:$0xff] %vm2382_vm13, %v2877_v26  ;;  %2465 = vst.msk [vmem:[#allocation4 + $0xc0] sm:$0xff] %vm2382_vm13, %v2818_v55  ;;  %v1582_v59 = vpop.permute.xlu1 %1581 }
 0x2e4   : > { %2734 = vst.msk [vmem:[#allocation4 + $0x98] sm:$0xff] %vm2382_vm13, %v2878_v56  ;;  %2948 = vst.msk [vmem:[#allocation4 + $0x58] sm:$0xff] %vm2382_vm13, %v2746_v62  ;;  %v2957_v60 = vld [vmem:[#allocation4 + $0x8] sm:$0xff] }
 0x2e5   : > { %1977 = vst.msk [vmem:[#allocation2 + $0xd0] sm:$0xff] %vm1950_vm11, %v1919_v44  ;;  %3147 = vmatprep.mubr.f32.mxu1 %v2957_v60  ;;  %vm2555_vm11 = vcmask 521472  }
 0x2e6   : > { %2949 = vst.msk [vmem:[#allocation4 + $0x70] sm:$0xff] %vm2382_vm13, %v7339_v57  ;;  %2595 = vrot.lane.b32.xlu1 %v7250_v33, %s5972_s18  ;;  %2773 = vrot.lane.b32.xlu0 %v7252_v35, %s5971_s25  ;;  %v1224_v61 = vpop.permute.xlu0 %1223 }
 0x2e7   : > { %1639 = vst.msk [vmem:[#allocation2 + $0xd8] sm:$0xff] %vm1611_vm9, %v1582_v59  ;;  %3148 = vmatmul.mubr.f32.vlgmr.msra.gmra.mxu1 %v2956_v12  ;;  %v2768_v38 = vpop.permute.xlu1 %2767  ;;  %vm1287_vm9 = vcmask 161920   ;;  %v2958_v59 = vld [vmem:[#allocation4 + $0x10] sm:$0xff] }
 0x2e8   : > { %2802 = vst.msk [vmem:[#allocation4 + $0x20] sm:$0xff] %vm2541_vm14, %v2768_v38  ;;  %v2964_v38 = vld [vmem:[#allocation4 + $0x40] sm:$0xff] }
 0x2e9   : > { %2865 = vst.msk [vmem:[#allocation4 + $0x20] sm:$0xff] %vm2627_vm15, %v2837_v49 }
 0x2ea   : > { %2677 = vrot.lane.b32.xlu1 %v7236_v21, %s5973_s19  ;;  %2842 = vrot.lane.b32.xlu0 %v2818_v55, %s5972_s18  ;;  %v7358_v1 = vpop.permute.xlu0 %1225 }
 0x2eb   : > { %v5751_v2 = vpop.f32.mrf.mxu0  ;;  %v1751_v5 = vpop.permute.xlu1 %1750 }
 0x2ec   : > { %v2006_v18 = vld [vmem:[#allocation2 + $0xd0] sm:$0xff]  ;;  %1809 = vst.msk [vmem:[#allocation2 + $0xd8] sm:$0x7f] %vm1808_vm1, %v1751_v5 }
 0x2ed   : > { %5761 = vmatprep.mubr.msk.f32.mxu0 %vm2024_vm12, %v2006_v18  ;;  %v2281_v3 = vpop.f32.mrf.mxu0  ;;  %v2967_v18 = vld [vmem:[#allocation4 + $0x58] sm:$0xff]  ;;  %v2970_v2 = vld [vmem:[#allocation4 + $0x70] sm:$0xff] }
 0x2ee   : > { %2511 = vrot.lane.b32.xlu1 %v7242_v48, %s5971_s25  ;;  %2902 = vrot.lane.b32.xlu0 %v2878_v56, %s5973_s19  ;;  %v2504_v7 = vpop.permute.xlu0 %2503 }
 0x2ef   : > { %2544 = vst.msk [vmem:[#allocation4 + $0x30] sm:$0xff] %vm2541_vm14, %v2504_v7  ;;  %v2502_v8 = vpop.permute.xlu1 %2501 }
 0x2f0   : > { %2543 = vst.msk [vmem:[#allocation4 + $0x18] sm:$0xff] %vm2541_vm14, %v2502_v8 }
 0x2f1   : > { %2629 = vst.msk [vmem:[#allocation4 + $0x18] sm:$0xff] %vm2627_vm15, %v2588_v27 }
 0x2f2   : > { %2597 = vrot.lane.b32.xlu1 %v7252_v35, %s5972_s18  ;;  %2775 = vrot.lane.b32.xlu0 %v2746_v62, %s5971_s25  ;;  %2705 = vst.msk [vmem:[#allocation4 + $0x18] sm:$0xff] %vm2703_vm0, %v2670_v58  ;;  %v1408_v16 = vpop.permute.xlu0 %1407 }
 0x2f3   : > { %v661_v9 = vpop.permute.xlu1 %660 }
 0x2f4   : > { %728 = vst.msk [vmem:[#allocation2 + $0xe8] sm:$0xff] %vm698_vm4, %v661_v9 }
 0x2f5   : > { %922 = vst.msk [vmem:[#allocation2 + $0xe8] sm:$0xff] %vm892_vm5, %v855_v31 }
 0x2f6   : > { %2679 = vrot.lane.b32.xlu1 %v2818_v55, %s5973_s19  ;;  %2844 = vrot.lane.b32.xlu0 %v7329_v53, %s5972_s18 }
 0x2f7   : > { %v1921_v24 = vpop.permute.xlu1 %1920 }
 0x2f8   : > { %1979 = vst.msk [vmem:[#allocation2 + $0xd8] sm:$0x3f] %vm1978_vm2, %v1921_v24 }
 0x2f9   : > { %v2959_v36 = vld [vmem:[#allocation4 + $0x18] sm:$0xff] }
 0x2fa   : > { %2513 = vrot.lane.b32.xlu1 %v2877_v26, %s5971_s25 }
 0x2fe   : > { %2599 = vrot.lane.b32.xlu1 %v2746_v62, %s5972_s18 }
 0x2ff   : > { %v2007_v22 = vld [vmem:[#allocation2 + $0xd8] sm:$0xff] }
 0x300   : > { %5762 = vmatmul.mubr.msk.f32.gmra.mxu0 %vm2024_vm12, %v2007_v22 }
 0x302   : > { %2681 = vrot.lane.b32.xlu1 %v7329_v53, %s5973_s19 }
 0x306   : > { %2515 = vrot.lane.b32.xlu1 %v2878_v56, %s5971_s25 }
 0x30a   : > { %2601 = vrot.lane.b32.xlu1 %v7339_v57, %s5972_s18  ;;  %v5754_v10 = vpop.f32.mrf.mxu0 }
 0x30b   : > { %v2297_v11 = vadd.f32 %v7307_v54, %v5754_v10 }
 0x30c   : > { %v2291_v30 = vpop.f32.mrf.mxu0 }
 0x30d   : > { %v2371_v13 = vmax.f32 %v2297_v11, 0.0  ;;  %v2292_v15 = vadd.f32 %v7307_v54, %v2291_v30 }
 0x30f   : > { %2404 = vst.msk [vmem:[#allocation3 + $0xa8] sm:$0xff] %vm2382_vm13, %v2371_v13  ;;  %v2370_v41 = vmax.f32 %v2292_v15, 0.0 }
 0x311   : > { %2403 = vst.msk [vmem:[#allocation3 + $0xa0] sm:$0xff] %vm2382_vm13, %v2370_v41 }
 0x314   : > { %v2897_v17 = vpop.permute.xlu1 %2896  ;;  %v2899_v39 = vpop.permute.xlu0 %2898 }
 0x315   : > { %2925 = vst.msk [vmem:[#allocation4 + $0x20] sm:$0xff] %vm2703_vm0, %v2897_v17 }
 0x316   : > { %v2436_v20 = vld [vmem:[#allocation3 + $0xa8] sm:$0xff] }
 0x317   : > { %2438 = vst.msk [vmem:[#allocation5 + $0x58] sm:$0xff] %vm2382_vm13, %v2436_v20 }
 0x318   : > { %v1043_v21 = vpop.permute.xlu1 %1042  ;;  %v663_v23 = vpop.permute.xlu0 %662  ;;  %v2435_v48 = vld [vmem:[#allocation3 + $0xa0] sm:$0xff] }
 0x319   : > { %1105 = vst.msk [vmem:[#allocation2 + $0xe0] sm:$0xff] %vm1076_vm6, %v1043_v21 }
 0x31a   : > { %729 = vst.msk [vmem:[#allocation2 + $0xf0] sm:$0xff] %vm698_vm4, %v663_v23  ;;  %vm924_vm4 = vcmask 95296  }
 0x31b   : > { %2437 = vst.msk [vmem:[#allocation5 + $0x50] sm:$0xff] %vm2382_vm13, %v2435_v48 }
 0x31c   : > { %1286 = vst.msk [vmem:[#allocation2 + $0xe0] sm:$0xff] %vm1257_vm7, %v1224_v61  ;;  %v1045_v28 = vpop.permute.xlu1 %1044  ;;  %v665_v33 = vpop.permute.xlu0 %664  ;;  %v2960_v35 = vld [vmem:[#allocation4 + $0x20] sm:$0xff]  ;;  %v2961_v61 = vld [vmem:[#allocation4 + $0x28] sm:$0xff]  ;;  %vm2933_vm7 = vcmask 1046272  }
 0x31d   : > { %1106 = vst.msk [vmem:[#allocation2 + $0xe8] sm:$0xff] %vm1076_vm6, %v1045_v28  ;;  %3152 = vmatprep.mubr.f32.mxu1 %v2960_v35  ;;  %vm2739_vm6 = vcmask 259072  }
 0x31e   : > { %731 = vst.msk [vmem:[#allocation2 + $0xf8] sm:$0x7f] %vm730_vm3, %v665_v33  ;;  %3153 = vmatmul.mubr.f32.gmra.mxu1 %v2959_v36  ;;  %v2652_v37 = vld [vmem:[#allocation5 + $0x58] sm:$0xff] }
 0x31f   : > { %1288 = vst.msk [vmem:[#allocation2 + $0xe8] sm:$0x7f] %vm1287_vm9, %v7358_v1 }
 0x320   : > { %1470 = vst.msk [vmem:[#allocation2 + $0xe8] sm:$0x3f] %vm1469_vm10, %v1408_v16  ;;  %v2770_v32 = vpop.permute.xlu1 %2769  ;;  %v2506_v42 = vpop.permute.xlu0 %2505 }
 0x321   : > { %2468 = vst.msk [vmem:[#allocation4 + $0x108] sm:$0xff] %vm2382_vm13, %v2652_v37 }
 0x322   : > { %2803 = vst.msk [vmem:[#allocation4 + $0x38] sm:$0xff] %vm2541_vm14, %v2770_v32  ;;  %2545 = vst.msk [vmem:[#allocation4 + $0x48] sm:$0xff] %vm2541_vm14, %v2506_v42  ;;  %v2651_v14 = vld [vmem:[#allocation5 + $0x50] sm:$0xff] }
 0x323   : > { %v2879_v19 = vld [vmem:[#allocation5 + $0x4a] sm:$0xff]  ;;  %2683 = vrot.lane.b32.xlu1 %v2651_v14, %s5973_s19  ;;  %v7401_v4 = vld [vmem:[#allocation5 + $0x52] sm:$0xff]  ;;  %2467 = vst.msk [vmem:[#allocation4 + $0xf0] sm:$0xff] %vm2382_vm13, %v2651_v14 }
 0x324   : > { %v2566_v63 = vld [vmem:[#allocation5 + $0x4c] sm:$0xff]  ;;  %2904 = vrot.lane.b32.xlu0 %v2879_v19, %s5973_s19  ;;  %v7403_v29 = vld [vmem:[#allocation5 + $0x54] sm:$0xff]  ;;  %2735 = vst.msk [vmem:[#allocation4 + $0xb0] sm:$0xff] %vm2382_vm13, %v2879_v19  ;;  %2736 = vst.msk [vmem:[#allocation4 + $0xc8] sm:$0xff] %vm2382_vm13, %v7401_v4  ;;  %v1406_v0 = vpop.permute.xlu1 %1405  ;;  %v859_v44 = vpop.permute.xlu0 %858 }
 0x325   : > { %2950 = vst.msk [vmem:[#allocation4 + $0x88] sm:$0xff] %vm2382_vm13, %v2566_v63  ;;  %2951 = vst.msk [vmem:[#allocation4 + $0xa0] sm:$0xff] %vm2382_vm13, %v7403_v29 }
 0x326   : > { %1468 = vst.msk [vmem:[#allocation2 + $0xe0] sm:$0xff] %vm1439_vm8, %v1406_v0  ;;  %vm2812_vm8 = vcmask 519424  }
 0x327   : > { %925 = vst.msk [vmem:[#allocation2 + $0xf8] sm:$0x3f] %vm924_vm4, %v859_v44  ;;  %2517 = vrot.lane.b32.xlu1 %v2879_v19, %s5971_s25  ;;  %v2009_v49 = vld [vmem:[#allocation2 + $0xe8] sm:$0xff] }
 0x328   : > { %2777 = vrot.lane.b32.xlu0 %v7339_v57, %s5971_s25  ;;  %v2839_v45 = vpop.permute.xlu1 %2838 }
 0x329   : > { %2866 = vst.msk [vmem:[#allocation4 + $0x38] sm:$0xff] %vm2627_vm15, %v2839_v45 }
 0x32a   : > { %2926 = vst.msk [vmem:[#allocation4 + $0x38] sm:$0xff] %vm2703_vm0, %v2899_v39 }
 0x32b   : > { %2603 = vrot.lane.b32.xlu1 %v2566_v63, %s5972_s18  ;;  %v5757_v46 = vpop.f32.mrf.mxu0 }
 0x32c   : > { %2846 = vrot.lane.b32.xlu0 %v2651_v14, %s5972_s18  ;;  %v2590_v47 = vpop.permute.xlu1 %2589  ;;  %v2973_v8 = vld [vmem:[#allocation4 + $0x88] sm:$0xff]  ;;  %v2976_v10 = vld [vmem:[#allocation4 + $0xa0] sm:$0xff] }
 0x32d   : > { %v2008_v40 = vld [vmem:[#allocation2 + $0xe0] sm:$0xff]  ;;  %2630 = vst.msk [vmem:[#allocation4 + $0x30] sm:$0xff] %vm2627_vm15, %v2590_v47  ;;  %v2301_v43 = vpop.f32.mrf.mxu0  ;;  %v2991_v47 = vld [vmem:[#allocation4 + $0x118] sm:$0xff] }
 0x32e   : > { %5764 = vmatprep.mubr.msk.f32.mxu0 %vm2024_vm12, %v2008_v40  ;;  %v2011_v58 = vld [vmem:[#allocation2 + $0xf8] sm:$0xff]  ;;  %v2988_v46 = vld [vmem:[#allocation4 + $0x100] sm:$0xff] }
 0x32f   : > { %2685 = vrot.lane.b32.xlu1 %v2652_v37, %s5973_s19  ;;  %5765 = vmatmul.mubr.msk.f32.gmra.mxu0 %vm2024_vm12, %v2009_v49 }
 0x330   : > { %2906 = vrot.lane.b32.xlu0 %v7401_v4, %s5973_s19  ;;  %v2672_v50 = vpop.permute.xlu1 %2671 }
 0x331   : > { %2706 = vst.msk [vmem:[#allocation4 + $0x30] sm:$0xff] %vm2703_vm0, %v2672_v50  ;;  %v2963_v25 = vld [vmem:[#allocation4 + $0x38] sm:$0xff]  ;;  %v2994_v50 = vld [vmem:[#allocation4 + $0x130] sm:$0xff] }
 0x332   : > { %3157 = vmatprep.mubr.f32.mxu1 %v2963_v25 }
 0x333   : > { %2605 = vrot.lane.b32.xlu1 %v7403_v29, %s5972_s18 }
 0x334   : > { %2779 = vrot.lane.b32.xlu0 %v2566_v63, %s5971_s25  ;;  %v2772_v34 = vpop.permute.xlu1 %2771 }
 0x335   : > { %2804 = vst.msk [vmem:[#allocation4 + $0x50] sm:$0xff] %vm2541_vm14, %v2772_v34  ;;  %v2997_v34 = vld [vmem:[#allocation4 + $0x148] sm:$0xff] }
 0x338   : > { %2848 = vrot.lane.b32.xlu0 %v2652_v37, %s5972_s18  ;;  %v5760_v51 = vpop.f32.mrf.mxu0  ;;  %v857_v27 = vpop.permute.xlu1 %856  ;;  %v2962_v52 = vld [vmem:[#allocation4 + $0x30] sm:$0xff] }
 0x339   : > { %v2317_v31 = vadd.f32 %v7307_v54, %v5760_v51  ;;  %923 = vst.msk [vmem:[#allocation2 + $0xf0] sm:$0xff] %vm892_vm5, %v857_v27  ;;  %3158 = vmatmul.mubr.f32.gmra.mxu1 %v2962_v52  ;;  %vm2954_vm5 = vcmask 257024  }
 0x33a   : > { %v2311_v53 = vpop.f32.mrf.mxu0 }
 0x33b   : > { %v2375_v6 = vmax.f32 %v2317_v31, 0.0  ;;  %v2312_v26 = vadd.f32 %v7307_v54, %v2311_v53 }
 0x33c   : > { %v2841_v55 = vpop.permute.xlu1 %2840 }
 0x33d   : > { %2408 = vst.msk [vmem:[#allocation3 + $0xc8] sm:$0xff] %vm2382_vm13, %v2375_v6  ;;  %v2374_v56 = vmax.f32 %v2312_v26, 0.0 }
 0x33e   : > { %2867 = vst.msk [vmem:[#allocation4 + $0x50] sm:$0xff] %vm2627_vm15, %v2841_v55 }
 0x33f   : > { %2407 = vst.msk [vmem:[#allocation3 + $0xc0] sm:$0xff] %vm2382_vm13, %v2374_v56 }
 0x340   : > { %v2592_v62 = vpop.permute.xlu1 %2591  ;;  %v2010_v57 = vld [vmem:[#allocation2 + $0xf0] sm:$0xff] }
 0x341   : > { %2631 = vst.msk [vmem:[#allocation4 + $0x48] sm:$0xff] %vm2627_vm15, %v2592_v62  ;;  %5767 = vmatprep.mubr.msk.f32.mxu0 %vm2024_vm12, %v2010_v57 }
 0x342   : > { %5768 = vmatmul.mubr.msk.f32.gmra.mxu0 %vm2024_vm12, %v2011_v58  ;;  %vm2641_vm12 = vcmask 781824  }
 0x343   : > { %5778 = vmatprep.mubr.msk.f32.mxu0 %vm2382_vm13, %v2958_v59 }
 0x344   : > { %v2440_v54 = vld [vmem:[#allocation3 + $0xc8] sm:$0xff]  ;;  %v2674_v60 = vpop.permute.xlu1 %2673 }
 0x345   : > { %2442 = vst.msk [vmem:[#allocation5 + $0x68] sm:$0xff] %vm2382_vm13, %v2440_v54 }
 0x346   : > { %2707 = vst.msk [vmem:[#allocation4 + $0x48] sm:$0xff] %vm2703_vm0, %v2674_v60  ;;  %v2439_v12 = vld [vmem:[#allocation3 + $0xc0] sm:$0xff]  ;;  %5779 = vmatmul.mubr.msk.f32.vlgmr.msra.gmra.mxu0 %vm2382_vm13, %v2961_v61 }
 0x347   : > { %2441 = vst.msk [vmem:[#allocation5 + $0x60] sm:$0xff] %vm2382_vm13, %v2439_v12  ;;  %5781 = vmatprep.mubr.msk.f32.mxu0 %vm2382_vm13, %v2964_v38 }
 0x348   : > { %v2508_v1 = vpop.permute.xlu1 %2507 }
 0x349   : > { %2546 = vst.msk [vmem:[#allocation4 + $0x60] sm:$0xff] %vm2541_vm14, %v2508_v1 }
 0x34a   : > { %5782 = vmatmul.mubr.msk.f32.gmra.mxu0 %vm2382_vm13, %v2967_v18 }
 0x34b   : > { %5784 = vmatprep.mubr.msk.f32.mxu0 %vm2382_vm13, %v2970_v2 }
 0x34c   : > { %v2594_v5 = vpop.permute.xlu1 %2593  ;;  %v2654_v3 = vld [vmem:[#allocation5 + $0x68] sm:$0xff] }
 0x34d   : > { %v2944_v7 = vld [vmem:[#allocation5 + $0x6c] sm:$0xf]  ;;  %2632 = vst.msk [vmem:[#allocation4 + $0x60] sm:$0xff] %vm2627_vm15, %v2594_v5  ;;  %v2965_v35 = vld [vmem:[#allocation4 + $0x48] sm:$0xff] }
 0x34e   : > { %2955 = vst.msk [vmem:[#allocation4 + $0xe8] sm:$0xf] %vm2954_vm5, %v2944_v7  ;;  %5785 = vmatmul.mubr.msk.f32.gmra.mxu0 %vm2382_vm13, %v2973_v8  ;;  %v2653_v9 = vld [vmem:[#allocation5 + $0x60] sm:$0xff]  ;;  %v2727_v15 = vld [vmem:[#allocation5 + $0x6a] sm:$0x3f] }
 0x34f   : > { %2470 = vst.msk [vmem:[#allocation4 + $0x138] sm:$0xff] %vm2382_vm13, %v2654_v3  ;;  %v7454_v24 = vld [vmem:[#allocation5 + $0x5a] sm:$0xff]  ;;  %2687 = vrot.lane.b32.xlu1 %v2653_v9, %s5973_s19  ;;  %v7460_v11 = vld [vmem:[#allocation5 + $0x64] sm:$0xff]  ;;  %2469 = vst.msk [vmem:[#allocation4 + $0x120] sm:$0xff] %vm2382_vm13, %v2653_v9  ;;  %5787 = vmatprep.mubr.msk.f32.mxu0 %vm2382_vm13, %v2976_v10 }
 0x350   : > { %v2568_v22 = vld [vmem:[#allocation5 + $0x5c] sm:$0xff]  ;;  %2908 = vrot.lane.b32.xlu0 %v7454_v24, %s5973_s19  ;;  %2737 = vst.msk [vmem:[#allocation4 + $0xe0] sm:$0xff] %vm2382_vm13, %v7454_v24  ;;  %v2676_v13 = vpop.permute.xlu1 %2675  ;;  %2953 = vst.msk [vmem:[#allocation4 + $0xd0] sm:$0xff] %vm2382_vm13, %v7460_v11  ;;  %v2570_v36 = vld [vmem:[#allocation5 + $0x6c] sm:$0xf] }
 0x351   : > { %2952 = vst.msk [vmem:[#allocation4 + $0xb8] sm:$0xff] %vm2382_vm13, %v2568_v22  ;;  %v7462_v30 = vld [vmem:[#allocation5 + $0x62] sm:$0xff]  ;;  %v2883_v19 = vld [vmem:[#allocation5 + $0x6a] sm:$0x3f] }
 0x352   : > { %2738 = vst.msk [vmem:[#allocation4 + $0xf8] sm:$0xff] %vm2382_vm13, %v7462_v30  ;;  %v2484_v51 = vld [vmem:[#allocation5 + $0x6a] sm:$0x3f] }
 0x353   : > { %2708 = vst.msk [vmem:[#allocation4 + $0x60] sm:$0xff] %vm2703_vm0, %v2676_v13  ;;  %2607 = vrot.lane.b32.xlu1 %v2568_v22, %s5972_s18 }
 0x354   : > { %2740 = vst.msk [vmem:[#allocation4 + $0x110] sm:$0x3f] %vm2739_vm6, %v2727_v15  ;;  %2781 = vrot.lane.b32.xlu0 %v7403_v29, %s5971_s25  ;;  %v2510_v16 = vpop.permute.xlu1 %2509  ;;  %v2901_v41 = vpop.permute.xlu0 %2900 }
 0x355   : > { %2547 = vst.msk [vmem:[#allocation4 + $0x78] sm:$0xff] %vm2541_vm14, %v2510_v16  ;;  %v2985_v23 = vld [vmem:[#allocation4 + $0xe8] sm:$0xff] }
 0x356   : > { %2927 = vst.msk [vmem:[#allocation4 + $0x50] sm:$0xff] %vm2703_vm0, %v2901_v41 }
 0x357   : > { %2689 = vrot.lane.b32.xlu1 %v2654_v3, %s5973_s19  ;;  %v2982_v39 = vld [vmem:[#allocation4 + $0xd0] sm:$0xff] }
 0x358   : > { %v2979_v17 = vld [vmem:[#allocation4 + $0xb8] sm:$0xff]  ;;  %2850 = vrot.lane.b32.xlu0 %v2653_v9, %s5972_s18  ;;  %v2596_v20 = vpop.permute.xlu1 %2595  ;;  %v2774_v21 = vpop.permute.xlu0 %2773 }
 0x359   : > { %5788 = vmatmul.mubr.msk.f32.gmra.mxu0 %vm2382_vm13, %v2979_v17  ;;  %2633 = vst.msk [vmem:[#allocation4 + $0x78] sm:$0xff] %vm2627_vm15, %v2596_v20 }
 0x35a   : > { %5790 = vmatprep.mubr.msk.f32.mxu0 %vm2382_vm13, %v2982_v39  ;;  %2805 = vst.msk [vmem:[#allocation4 + $0x68] sm:$0xff] %vm2541_vm14, %v2774_v21  ;;  %v2968_v44 = vld [vmem:[#allocation4 + $0x60] sm:$0xff] }
 0x35b   : > { %2609 = vrot.lane.b32.xlu1 %v7460_v11, %s5972_s18 }
 0x35c   : > { %2910 = vrot.lane.b32.xlu0 %v7462_v30, %s5973_s19  ;;  %v2678_v48 = vpop.permute.xlu1 %2677  ;;  %v2843_v28 = vpop.permute.xlu0 %2842 }
 0x35d   : > { %5791 = vmatmul.mubr.msk.f32.gmra.mxu0 %vm2382_vm13, %v2985_v23  ;;  %v2966_v33 = vld [vmem:[#allocation4 + $0x50] sm:$0xff]  ;;  %2709 = vst.msk [vmem:[#allocation4 + $0x78] sm:$0xff] %vm2703_vm0, %v2678_v48 }
 0x35e   : > { %2868 = vst.msk [vmem:[#allocation4 + $0x68] sm:$0xff] %vm2627_vm15, %v2843_v28  ;;  %3162 = vmatprep.mubr.f32.mxu1 %v2966_v33  ;;  %5793 = vmatprep.mubr.msk.f32.mxu0 %vm2382_vm13, %v2988_v46  ;;  %v3962_v46 = vld [vmem:[%s8216_s5 + $0x118] sm:$0xff] }
 0x35f   : > { %3163 = vmatmul.mubr.f32.gmra.mxu1 %v2965_v35  ;;  %2611 = vrot.lane.b32.xlu1 %v2570_v36, %s5972_s18 }
 0x360   : > { %2783 = vrot.lane.b32.xlu0 %v2568_v22, %s5971_s25  ;;  %v2512_v37 = vpop.permute.xlu1 %2511  ;;  %v2903_v32 = vpop.permute.xlu0 %2902  ;;  %5799 = vmatprep.subr.mxu0 %v3962_v46 }
 0x361   : > { %2548 = vst.msk [vmem:[#allocation4 + $0x90] sm:$0xff] %vm2541_vm14, %v2512_v37  ;;  %5794 = vmatmul.mubr.msk.f32.gmra.mxu0 %vm2382_vm13, %v2991_v47  ;;  %v2993_v37 = vld [vmem:[#allocation4 + $0x128] sm:$0xff] }
 0x362   : > { %2928 = vst.msk [vmem:[#allocation4 + $0x68] sm:$0xff] %vm2703_vm0, %v2903_v32  ;;  %5796 = vmatprep.mubr.msk.f32.mxu0 %vm2382_vm13, %v2994_v50  ;;  %5800 = vmatpush3.msra.mxu0 %v3962_v46  ;;  %v3937_v46 = vld [vmem:[%s8216_s5 + $0x50] sm:$0xff] }
 0x364   : > { %2852 = vrot.lane.b32.xlu0 %v2654_v3, %s5972_s18  ;;  %v2598_v42 = vpop.permute.xlu1 %2597  ;;  %v2776_v14 = vpop.permute.xlu0 %2775  ;;  %v2971_v56 = vld [vmem:[#allocation4 + $0x78] sm:$0xff] }
 0x365   : > { %2634 = vst.msk [vmem:[#allocation4 + $0x90] sm:$0xff] %vm2627_vm15, %v2598_v42  ;;  %5797 = vmatmul.mubr.msk.f32.gmra.mxu0 %vm2382_vm13, %v2997_v34 }
 0x366   : > { %2806 = vst.msk [vmem:[#allocation4 + $0x80] sm:$0xff] %vm2541_vm14, %v2776_v14 }
 0x368   : > { %2912 = vrot.lane.b32.xlu0 %v2883_v19, %s5973_s19  ;;  %v2680_v63 = vpop.permute.xlu1 %2679  ;;  %v2845_v29 = vpop.permute.xlu0 %2844 }
 0x369   : > { %v2969_v0 = vld [vmem:[#allocation4 + $0x68] sm:$0xff]  ;;  %2710 = vst.msk [vmem:[#allocation4 + $0x90] sm:$0xff] %vm2703_vm0, %v2680_v63  ;;  %v2996_v63 = vld [vmem:[#allocation4 + $0x140] sm:$0xff] }
 0x36a   : > { %2869 = vst.msk [vmem:[#allocation4 + $0x80] sm:$0xff] %vm2627_vm15, %v2845_v29  ;;  %3167 = vmatprep.mubr.f32.mxu1 %v2969_v0 }
 0x36b   : > { %3168 = vmatmul.mubr.f32.gmra.mxu1 %v2968_v44 }
 0x36c   : > { %2519 = vrot.lane.b32.xlu0 %v7401_v4, %s5971_s25  ;;  %v2514_v45 = vpop.permute.xlu1 %2513  ;;  %v2752_v4 = vld [vmem:[#allocation5 + $0x6c] sm:$0xf] }
 0x36d   : > { %2549 = vst.msk [vmem:[#allocation4 + $0xa8] sm:$0xff] %vm2541_vm14, %v2514_v45 }
 0x370   : > { %2785 = vrot.lane.b32.xlu0 %v7460_v11, %s5971_s25  ;;  %v2600_v40 = vpop.permute.xlu1 %2599  ;;  %v2974_v60 = vld [vmem:[#allocation4 + $0x90] sm:$0xff] }
 0x371   : > { %2635 = vst.msk [vmem:[#allocation4 + $0xa8] sm:$0xff] %vm2627_vm15, %v2600_v40  ;;  %v3961_v40 = vld [vmem:[%s8216_s5 + $0x110] sm:$0xff] }
 0x372   : > { %5801 = vmatprep.subr.mxu0 %v3961_v40 }
 0x373   : > { %5802 = vmatpush3.msra.mxu0 %v3961_v40  ;;  %v3936_v40 = vld [vmem:[%s8216_s5 + $0x48] sm:$0xff] }
 0x374   : > { %2521 = vrot.lane.b32.xlu0 %v7454_v24, %s5971_s25  ;;  %v2682_v49 = vpop.permute.xlu1 %2681 }
 0x375   : > { %2711 = vst.msk [vmem:[#allocation4 + $0xa8] sm:$0xff] %vm2703_vm0, %v2682_v49  ;;  %v3960_v49 = vld [vmem:[%s8216_s5 + $0x108] sm:$0xff] }
 0x376   : > { %5803 = vmatprep.subr.mxu0 %v3960_v49 }
 0x377   : > { %5804 = vmatpush3.msra.mxu0 %v3960_v49  ;;  %v3951_v49 = vld [vmem:[%s8216_s5 + $0xc0] sm:$0xff] }
 0x378   : > { %2787 = vrot.lane.b32.xlu0 %v2752_v4, %s5971_s25  ;;  %v2516_v43 = vpop.permute.xlu1 %2515 }
 0x379   : > { %2550 = vst.msk [vmem:[#allocation4 + $0xc0] sm:$0xff] %vm2541_vm14, %v2516_v43 }
 0x37c   : > { %2523 = vrot.lane.b32.xlu0 %v7462_v30, %s5971_s25  ;;  %v2602_v25 = vpop.permute.xlu1 %2601  ;;  %v2977_v5 = vld [vmem:[#allocation4 + $0xa8] sm:$0xff] }
 0x37d   : > { %2636 = vst.msk [vmem:[#allocation4 + $0xc0] sm:$0xff] %vm2627_vm15, %v2602_v25  ;;  %v3959_v25 = vld [vmem:[%s8216_s5 + $0x100] sm:$0xff] }
 0x37e   : > { %5805 = vmatprep.subr.mxu0 %v3959_v25 }
 0x37f   : > { %5806 = vmatpush3.msra.mxu0 %v3959_v25 }
 0x380   : > { %2525 = vrot.lane.b32.xlu0 %v2484_v51, %s5971_s25 }
 0x395   : > { %v2684_v27 = vpop.permute.xlu1 %2683 }
 0x396   : > { %v2905_v52 = vpop.permute.xlu0 %2904  ;;  %2712 = vst.msk [vmem:[#allocation4 + $0xc0] sm:$0xff] %vm2703_vm0, %v2684_v27 }
 0x397   : > { %2929 = vst.msk [vmem:[#allocation4 + $0x80] sm:$0xff] %vm2703_vm0, %v2905_v52  ;;  %v7565_v52 = vld [vmem:[%s8215_s4] ss:$0 sm:$0xff] }
 0x399   : > { %v2518_v31 = vpop.permute.xlu1 %2517 }
 0x39a   : > { %v2778_v53 = vpop.permute.xlu0 %2777  ;;  %2551 = vst.msk [vmem:[#allocation4 + $0xd8] sm:$0xff] %vm2541_vm14, %v2518_v31 }
 0x39b   : > { %2807 = vst.msk [vmem:[#allocation4 + $0x98] sm:$0xff] %vm2541_vm14, %v2778_v53 }
 0x39d   : > { %v2604_v6 = vpop.permute.xlu1 %2603  ;;  %v2980_v22 = vld [vmem:[#allocation4 + $0xc0] sm:$0xff] }
 0x39e   : > { %v2847_v26 = vpop.permute.xlu0 %2846  ;;  %v2972_v55 = vld [vmem:[#allocation4 + $0x80] sm:$0xff]  ;;  %2637 = vst.msk [vmem:[#allocation4 + $0xd8] sm:$0xff] %vm2627_vm15, %v2604_v6 }
 0x39f   : > { %2870 = vst.msk [vmem:[#allocation4 + $0x98] sm:$0xff] %vm2627_vm15, %v2847_v26  ;;  %3172 = vmatprep.mubr.f32.mxu1 %v2972_v55 }
 0x3a0   : > { %3173 = vmatmul.mubr.f32.gmra.mxu1 %v2971_v56 }
 0x3a1   : > { %v2686_v58 = vpop.permute.xlu1 %2685 }
 0x3a2   : > { %v2907_v62 = vpop.permute.xlu0 %2906  ;;  %2713 = vst.msk [vmem:[#allocation4 + $0xd8] sm:$0xff] %vm2703_vm0, %v2686_v58 }
 0x3a3   : > { %2930 = vst.msk [vmem:[#allocation4 + $0x98] sm:$0xff] %vm2703_vm0, %v2907_v62 }
 0x3a5   : > { %v2606_v24 = vpop.permute.xlu1 %2605 }
 0x3a6   : > { %v2780_v57 = vpop.permute.xlu0 %2779 }
 0x3a7   : > { %2808 = vst.msk [vmem:[#allocation4 + $0xb0] sm:$0xff] %vm2541_vm14, %v2780_v57  ;;  %v5468_v19 = vpop.f32.mrf.mxu1 }
 0x3a9   : > { %v2983_v41 = vld [vmem:[#allocation4 + $0xd8] sm:$0xff]  ;;  %v5469_v0 = vpop.f32.mrf.mxu1 }
 0x3aa   : > { %v2849_v59 = vpop.permute.xlu0 %2848  ;;  %v2975_v54 = vld [vmem:[#allocation4 + $0x98] sm:$0xff]  ;;  %v5470_v34 = vadd.f32 %v5469_v0, %v5468_v19  ;;  %v3940_v19 = vld [vmem:[%s8216_s5 + $0x68] sm:$0xff] }
 0x3ab   : > { %2871 = vst.msk [vmem:[#allocation4 + $0xb0] sm:$0xff] %vm2627_vm15, %v2849_v59  ;;  %3177 = vmatprep.mubr.f32.mxu1 %v2975_v54  ;;  %v3954_v0 = vld [vmem:[%s8216_s5 + $0xd8] sm:$0xff] }
 0x3ac   : > { %3178 = vmatmul.mubr.f32.gmra.mxu1 %v2974_v60  ;;  %v3150_v55 = vadd.f32 %v5470_v34, %v7565_v52  ;;  %v3949_v34 = vld [vmem:[%s8216_s5 + $0xb0] sm:$0xff] }
 0x3c0   : > { %v5763_v12 = vpop.f32.mrf.mxu0 }
 0x3c1   : > { %v2688_v11 = vpop.permute.xlu1 %2687 }
 0x3c2   : > { %v2909_v61 = vpop.permute.xlu0 %2908  ;;  %v2321_v38 = vpop.f32.mrf.mxu0 }
 0x3c3   : > { %2931 = vst.msk [vmem:[#allocation4 + $0xb0] sm:$0xff] %vm2703_vm0, %v2909_v61 }
 0x3c5   : > { %v2608_v13 = vpop.permute.xlu1 %2607 }
 0x3c6   : > { %v2782_v1 = vpop.permute.xlu0 %2781 }
 0x3c7   : > { %2809 = vst.msk [vmem:[#allocation4 + $0xc8] sm:$0xff] %vm2541_vm14, %v2782_v1 }
 0x3c9   : > { %v2690_v39 = vpop.permute.xlu1 %2689 }
 0x3ca   : > { %v2851_v18 = vpop.permute.xlu0 %2850  ;;  %v2978_v2 = vld [vmem:[#allocation4 + $0xb0] sm:$0xff] }
 0x3cb   : > { %2872 = vst.msk [vmem:[#allocation4 + $0xc8] sm:$0xff] %vm2627_vm15, %v2851_v18  ;;  %3182 = vmatprep.mubr.f32.mxu1 %v2978_v2 }
 0x3cc   : > { %3183 = vmatmul.mubr.f32.gmra.mxu1 %v2977_v5 }
 0x3cd   : > { %v2610_v48 = vpop.permute.xlu1 %2609 }
 0x3ce   : > { %v2911_v3 = vpop.permute.xlu0 %2910 }
 0x3cf   : > { %2932 = vst.msk [vmem:[#allocation4 + $0xc8] sm:$0xff] %vm2703_vm0, %v2911_v3 }
 0x3d1   : > { %v2612_v42 = vpop.permute.xlu1 %2611 }
 0x3d2   : > { %v2784_v7 = vpop.permute.xlu0 %2783 }
 0x3d3   : > { %2810 = vst.msk [vmem:[#allocation4 + $0xe0] sm:$0xff] %vm2541_vm14, %v2784_v7 }
 0x3d6   : > { %v2853_v8 = vpop.permute.xlu0 %2852  ;;  %v2981_v9 = vld [vmem:[#allocation4 + $0xc8] sm:$0xff] }
 0x3d7   : > { %2873 = vst.msk [vmem:[#allocation4 + $0xe0] sm:$0xff] %vm2627_vm15, %v2853_v8  ;;  %3187 = vmatprep.mubr.f32.mxu1 %v2981_v9 }
 0x3d8   : > { %3188 = vmatmul.mubr.f32.gmra.mxu1 %v2980_v22 }
 0x3da   : > { %v2913_v10 = vpop.permute.xlu0 %2912 }
 0x3db   : > { %2934 = vst.msk [vmem:[#allocation4 + $0xe0] sm:$0x3f] %vm2933_vm7, %v2913_v10 }
 0x3de   : > { %v2520_v30 = vpop.permute.xlu0 %2519  ;;  %v5471_v44 = vpop.f32.mrf.mxu1 }
 0x3df   : > { %2552 = vst.msk [vmem:[#allocation4 + $0xf0] sm:$0xff] %vm2541_vm14, %v2520_v30 }
 0x3e0   : > { %2638 = vst.msk [vmem:[#allocation4 + $0xf0] sm:$0xff] %vm2627_vm15, %v2606_v24  ;;  %v5472_v47 = vpop.f32.mrf.mxu1 }
 0x3e1   : > { %2714 = vst.msk [vmem:[#allocation4 + $0xf0] sm:$0xff] %vm2703_vm0, %v2688_v11  ;;  %v5473_v43 = vadd.f32 %v5472_v47, %v5471_v44  ;;  %v3938_v44 = vld [vmem:[%s8216_s5 + $0x58] sm:$0xff]  ;;  %v3952_v47 = vld [vmem:[%s8216_s5 + $0xc8] sm:$0xff] }
 0x3e2   : > { %v2786_v15 = vpop.permute.xlu0 %2785  ;;  %v2984_v16 = vld [vmem:[#allocation4 + $0xe0] sm:$0xff] }
 0x3e3   : > { %2811 = vst.msk [vmem:[#allocation4 + $0xf8] sm:$0xff] %vm2541_vm14, %v2786_v15  ;;  %3192 = vmatprep.mubr.f32.mxu1 %v2984_v16  ;;  %v3155_v31 = vadd.f32 %v5473_v43, %v7565_v52  ;;  %v3950_v43 = vld [vmem:[%s8216_s5 + $0xb8] sm:$0xff] }
 0x3e4   : > { %3193 = vmatmul.mubr.f32.gmra.mxu1 %v2983_v41 }
 0x3e6   : > { %v2522_v17 = vpop.permute.xlu0 %2521 }
 0x3e7   : > { %2553 = vst.msk [vmem:[#allocation4 + $0x108] sm:$0xff] %vm2541_vm14, %v2522_v17 }
 0x3e8   : > { %2639 = vst.msk [vmem:[#allocation4 + $0x108] sm:$0xff] %vm2627_vm15, %v2608_v13  ;;  %v2986_v23 = vld [vmem:[#allocation4 + $0xf0] sm:$0xff] }
 0x3e9   : > { %2715 = vst.msk [vmem:[#allocation4 + $0x108] sm:$0xff] %vm2703_vm0, %v2690_v39 }
 0x3ea   : > { %v2788_v20 = vpop.permute.xlu0 %2787  ;;  %v2987_v21 = vld [vmem:[#allocation4 + $0xf8] sm:$0xff] }
 0x3eb   : > { %2813 = vst.msk [vmem:[#allocation4 + $0x110] sm:$0xf] %vm2812_vm8, %v2788_v20  ;;  %3197 = vmatprep.mubr.f32.mxu1 %v2987_v21 }
 0x3ec   : > { %3198 = vmatmul.mubr.f32.gmra.mxu1 %v2986_v23 }
 0x3ee   : > { %v2524_v28 = vpop.permute.xlu0 %2523 }
 0x3ef   : > { %2554 = vst.msk [vmem:[#allocation4 + $0x120] sm:$0xff] %vm2541_vm14, %v2524_v28  ;;  %v5766_v33 = vpop.f32.mrf.mxu0 }
 0x3f0   : > { %2640 = vst.msk [vmem:[#allocation4 + $0x120] sm:$0xff] %vm2627_vm15, %v2610_v48  ;;  %v2989_v14 = vld [vmem:[#allocation4 + $0x108] sm:$0xff] }
 0x3f1   : > { %v2331_v32 = vpop.f32.mrf.mxu0 }
 0x3f2   : > { %v2526_v35 = vpop.permute.xlu0 %2525  ;;  %v2990_v36 = vld [vmem:[#allocation4 + $0x110] sm:$0xff] }
 0x3f3   : > { %2556 = vst.msk [vmem:[#allocation4 + $0x138] sm:$0x3f] %vm2555_vm11, %v2526_v35  ;;  %3202 = vmatprep.mubr.f32.mxu1 %v2990_v36  ;;  %v3958_v36 = vld [vmem:[%s8216_s5 + $0xf8] sm:$0xff]  ;;  %v3957_v32 = vld [vmem:[%s8216_s5 + $0xf0] sm:$0xff] }
 0x3f4   : > { %2642 = vst.msk [vmem:[#allocation4 + $0x138] sm:$0xf] %vm2641_vm12, %v2612_v42  ;;  %3203 = vmatmul.mubr.f32.gmra.mxu1 %v2989_v14  ;;  %5528 = vmatprep.subr.mxu1 %v3958_v36  ;;  %v3941_v42 = vld [vmem:[%s8216_s5 + $0x70] sm:$0xff]  ;;  %v3956_v14 = vld [vmem:[%s8216_s5 + $0xe8] sm:$0xff] }
 0x3f5   : > { %3207 = vmatprep.mubr.f32.mxu1 %v2993_v37  ;;  %v3942_v37 = vld [vmem:[%s8216_s5 + $0x78] sm:$0xff] }
 0x3f6   : > { %5529 = vmatpush3.msra.mxu1 %v3942_v37 }
 0x3f7   : > { %v2992_v29 = vld [vmem:[#allocation4 + $0x120] sm:$0xff]  ;;  %5530 = vmatprep.subr.mxu1 %v3957_v32 }
 0x3f8   : > { %3208 = vmatmul.mubr.f32.gmra.mxu1 %v2992_v29  ;;  %v3939_v29 = vld [vmem:[%s8216_s5 + $0x60] sm:$0xff] }
 0x3f9   : > { %3212 = vmatprep.mubr.f32.mxu1 %v2996_v63  ;;  %v5474_v4 = vpop.f32.mrf.mxu1  ;;  %5531 = vmatpush3.msra.mxu1 %v3941_v42  ;;  %v3955_v63 = vld [vmem:[%s8216_s5 + $0xe0] sm:$0xff] }
 0x3fa   : > { %5532 = vmatprep.subr.mxu1 %v3956_v14 }
 0x3fb   : > { %v2995_v45 = vld [vmem:[#allocation4 + $0x138] sm:$0xff]  ;;  %v5475_v51 = vpop.f32.mrf.mxu1  ;;  %5533 = vmatpush3.msra.mxu1 %v3940_v19 }
 0x3fc   : > { %3213 = vmatmul.mubr.f32.gmra.mxu1 %v2995_v45  ;;  %v5476_v6 = vadd.f32 %v5475_v51, %v5474_v4  ;;  %5534 = vmatprep.subr.mxu1 %v3955_v63  ;;  %v3953_v45 = vld [vmem:[%s8216_s5 + $0xd0] sm:$0xff]  ;;  %v3935_v4 = vld [vmem:[%s8216_s5 + $0x40] sm:$0xff] }
 0x3fd   : > { %5535 = vmatpush3.msra.mxu1 %v3939_v29  ;;  %v3933_v51 = vld [vmem:[%s8216_s5 + $0x30] sm:$0xff] }
 0x3fe   : > { %v3160_v54 = vadd.f32 %v5476_v6, %v7565_v52  ;;  %5536 = vmatprep.subr.mxu1 %v3954_v0  ;;  %v3932_v6 = vld [vmem:[%s8216_s5 + $0x28] sm:$0xff] }
 0x3ff   : > { %5537 = vmatpush3.msra.mxu1 %v3938_v44 }
 0x400   : > { %5538 = vmatprep.subr.mxu1 %v3953_v45 }
 0x401   : > { %5539 = vmatpush3.msra.mxu1 %v3937_v46 }
 0x402   : > { %v5769_v50 = vpop.f32.mrf.mxu0  ;;  %5540 = vmatprep.subr.mxu1 %v3952_v47 }
 0x403   : > { %5541 = vmatpush3.msra.mxu1 %v3936_v40  ;;  %v3934_v50 = vld [vmem:[%s8216_s5 + $0x38] sm:$0xff] }
 0x404   : > { %v2341_v27 = vpop.f32.mrf.mxu0  ;;  %5542 = vmatprep.subr.mxu1 %v3951_v49 }
 0x405   : > { %5543 = vmatpush3.msra.mxu1 %v3935_v4 }
 0x406   : > { %v5780_v53 = vpop.f32.mrf.mxu0  ;;  %5544 = vmatprep.subr.mxu1 %v3950_v43 }
 0x407   : > { %v3290_v26 = vadd.f32 %v5780_v53, %v3155_v31  ;;  %5545 = vmatpush3.msra.mxu1 %v3934_v50  ;;  %v3948_v31 = vld [vmem:[%s8216_s5 + $0xa8] sm:$0xff] }
 0x408   : > { %v3284_v56 = vpop.f32.mrf.mxu0  ;;  %5546 = vmatprep.subr.mxu1 %v3949_v34 }
 0x409   : > { %v3354_v58 = vmax.f32 %v3290_v26, 0.0  ;;  %v3285_v62 = vadd.f32 %v3284_v56, %v3150_v55  ;;  %5547 = vmatpush3.msra.mxu1 %v3933_v51  ;;  %v3947_v55 = vld [vmem:[%s8216_s5 + $0xa0] sm:$0xff] }
 0x40a   : > { %v5783_v57 = vpop.f32.mrf.mxu0  ;;  %5548 = vmatprep.subr.mxu1 %v3948_v31  ;;  %v3931_v56 = vld [vmem:[%s8216_s5 + $0x20] sm:$0xff] }
 0x40b   : > { %3368 = vst.msk [vmem:[#allocation6 + $0x8] sm:$0xff] %vm2382_vm13, %v3354_v58  ;;  %v3353_v59 = vmax.f32 %v3285_v62, 0.0  ;;  %5549 = vmatpush3.msra.mxu1 %v3932_v6  ;;  %v3946_v58 = vld [vmem:[%s8216_s5 + $0x98] sm:$0xff] }
 0x40c   : > { %v3294_v60 = vpop.f32.mrf.mxu0  ;;  %5550 = vmatprep.subr.mxu1 %v3947_v55 }
 0x40d   : > { %3367 = vst.msk [vmem:[#allocation6] sm:$0xff] %vm2382_vm13, %v3353_v59  ;;  %v3295_v61 = vadd.f32 %v3294_v60, %v3160_v54  ;;  %5551 = vmatpush3.msra.mxu1 %v3931_v56  ;;  %v3945_v54 = vld [vmem:[%s8216_s5 + $0x90] sm:$0xff] }
 0x40e   : > { %v7583_v13 = vpop.f32.mrf.mxu0  ;;  %5552 = vmatprep.subr.mxu1 %v3946_v58  ;;  %v3929_v60 = vld [vmem:[%s8216_s5 + $0x10] sm:$0xff] }
 0x40f   : > { %v3355_v12 = vmax.f32 %v3295_v61, 0.0  ;;  %v3944_v61 = vld [vmem:[%s8216_s5 + $0x88] sm:$0xff] }
 0x410   : > { %v3304_v17 = vpop.f32.mrf.mxu0 }
 0x411   : > { %3369 = vst.msk [vmem:[#allocation6 + $0x10] sm:$0xff] %vm2382_vm13, %v3355_v12  ;;  %v3928_v12 = vld [vmem:[%s8216_s5 + $0x8] sm:$0xff] }
 0x412   : > { %v3382_v38 = vld [vmem:[#allocation6 + $0x8] sm:$0xff] }
 0x413   : > { %3396 = vst.msk [vmem:[#allocation4 + $0x18] sm:$0xff] %vm2382_vm13, %v3382_v38 }
 0x414   : > { %v3409_v1 = vld [vmem:[#allocation6 + $0x2] sm:$0xff] }
 0x415   : > { %v3381_v18 = vld [vmem:[#allocation6] sm:$0xff]  ;;  %3437 = vrot.lane.b32.xlu1 %v3409_v1, %s5971_s25 }
 0x416   : > { %3395 = vst.msk [vmem:[#allocation4] sm:$0xff] %vm2382_vm13, %v3381_v18  ;;  %v3493_v2 = vld [vmem:[#allocation6 + $0x4] sm:$0xff] }
 0x417   : > { %v3943_v1 = vld [vmem:[%s8216_s5 + $0x80] sm:$0xff] }
 0x418   : > { %v3577_v5 = vld [vmem:[#allocation6 + $0x10] sm:$0xff] }
 0x419   : > { %3521 = vrot.lane.b32.xlu1 %v3493_v2, %s5972_s18  ;;  %3397 = vst.msk [vmem:[#allocation4 + $0x30] sm:$0xff] %vm2382_vm13, %v3577_v5  ;;  %v3410_v8 = vld [vmem:[#allocation6 + $0xa] sm:$0xff]  ;;  %v5789_v18 = vpop.f32.mrf.mxu0 }
 0x41a   : > { %v3494_v22 = vld [vmem:[#allocation6 + $0xc] sm:$0xff] }
 0x41d   : > { %3601 = vrot.lane.b32.xlu1 %v3577_v5, %s5973_s19 }
 0x41f   : > { %v5477_v3 = vpop.f32.mrf.mxu1 }
 0x421   : > { %v5478_v7 = vpop.f32.mrf.mxu1  ;;  %3439 = vrot.lane.b32.xlu1 %v3410_v8, %s5971_s25  ;;  %v3314_v8 = vpop.f32.mrf.mxu0 }
 0x422   : > { %v5479_v9 = vadd.f32 %v5478_v7, %v5477_v3  ;;  %v3927_v3 = vld [vmem:[%s8216_s5] sm:$0xff] }
 0x423   : > { %v5792_v42 = vpop.f32.mrf.mxu0 }
 0x424   : > { %v3165_v24 = vadd.f32 %v5479_v9, %v7565_v52 }
 0x425   : > { %3523 = vrot.lane.b32.xlu1 %v3494_v22, %s5972_s18  ;;  %v3324_v29 = vpop.f32.mrf.mxu0 }
 0x426   : > { %v3300_v10 = vadd.f32 %v5783_v57, %v3165_v24  ;;  %v3930_v57 = vld [vmem:[%s8216_s5 + $0x18] sm:$0xff] }
 0x427   : > { %5553 = vmatpush3.msra.mxu1 %v3930_v57  ;;  %v5795_v55 = vpop.f32.mrf.mxu0 }
 0x428   : > { %v3356_v11 = vmax.f32 %v3300_v10, 0.0  ;;  %5554 = vmatprep.subr.mxu1 %v3945_v54 }
 0x429   : > { %5555 = vmatpush3.msra.mxu1 %v3929_v60  ;;  %v3334_v54 = vpop.f32.mrf.mxu0 }
 0x42a   : > { %3370 = vst.msk [vmem:[#allocation6 + $0x18] sm:$0xff] %vm2382_vm13, %v3356_v11  ;;  %5556 = vmatprep.subr.mxu1 %v3944_v61 }
 0x42b   : > { %v5480_v30 = vpop.f32.mrf.mxu1  ;;  %5557 = vmatpush3.msra.mxu1 %v3928_v12 }
 0x42c   : > { %5558 = vmatprep.subr.mxu1 %v3943_v1 }
 0x42d   : > { %v5481_v15 = vpop.f32.mrf.mxu1  ;;  %5559 = vmatpush3.msra.mxu1 %v3927_v3 }
 0x42e   : > { %v5482_v16 = vadd.f32 %v5481_v15, %v5480_v30 }
 0x430   : > { %v3170_v41 = vadd.f32 %v5482_v16, %v7565_v52 }
 0x431   : > { %v3673_v39 = vld [vmem:[#allocation6 + $0x14] sm:$0xff] }
 0x432   : > { %v3578_v20 = vld [vmem:[#allocation6 + $0x18] sm:$0xff]  ;;  %v3305_v23 = vadd.f32 %v3304_v17, %v3170_v41  ;;  %3697 = vrot.lane.b32.xlu0 %v3673_v39, %s5971_s25 }
 0x433   : > { %v3411_v21 = vld [vmem:[#allocation6 + $0x12] sm:$0xff]  ;;  %3603 = vrot.lane.b32.xlu1 %v3578_v20, %s5973_s19  ;;  %3398 = vst.msk [vmem:[#allocation4 + $0x48] sm:$0xff] %vm2382_vm13, %v3578_v20 }
 0x434   : > { %3661 = vst.msk [vmem:[#allocation4 + $0x8] sm:$0xff] %vm2382_vm13, %v3411_v21  ;;  %v3357_v48 = vmax.f32 %v3305_v23, 0.0 }
 0x436   : > { %3371 = vst.msk [vmem:[#allocation6 + $0x20] sm:$0xff] %vm2382_vm13, %v3357_v48 }
 0x437   : > { %3441 = vrot.lane.b32.xlu1 %v3411_v21, %s5971_s25 }
 0x43b   : > { %3525 = vrot.lane.b32.xlu1 %v3673_v39, %s5972_s18 }
 0x43d   : > { %v3745_v28 = vld [vmem:[#allocation6 + $0x20] sm:$0xff] }
 0x43e   : > { %v3412_v33 = vld [vmem:[#allocation6 + $0x1a] sm:$0xff]  ;;  %3765 = vrot.lane.b32.xlu0 %v3745_v28, %s5972_s18  ;;  %3399 = vst.msk [vmem:[#allocation4 + $0x60] sm:$0xff] %vm2382_vm13, %v3745_v28 }
 0x43f   : > { %3605 = vrot.lane.b32.xlu1 %v3745_v28, %s5973_s19  ;;  %3662 = vst.msk [vmem:[#allocation4 + $0x20] sm:$0xff] %vm2382_vm13, %v3412_v33  ;;  %v3674_v35 = vld [vmem:[#allocation6 + $0x1c] sm:$0xff] }
 0x442   : > { %3699 = vrot.lane.b32.xlu0 %v3674_v35, %s5971_s25 }
 0x443   : > { %3443 = vrot.lane.b32.xlu1 %v3412_v33, %s5971_s25 }
 0x447   : > { %3527 = vrot.lane.b32.xlu1 %v3674_v35, %s5972_s18 }
 0x460   : > { %v5483_v25 = vpop.f32.mrf.mxu1 }
 0x462   : > { %v5484_v27 = vpop.f32.mrf.mxu1 }
 0x463   : > { %v5485_v53 = vadd.f32 %v5484_v27, %v5483_v25 }
 0x465   : > { %v3175_v26 = vadd.f32 %v5485_v53, %v7565_v52 }
 0x467   : > { %v3310_v62 = vadd.f32 %v7583_v13, %v3175_v26 }
 0x469   : > { %v3358_v59 = vmax.f32 %v3310_v62, 0.0 }
 0x46b   : > { %3372 = vst.msk [vmem:[#allocation6 + $0x28] sm:$0xff] %vm2382_vm13, %v3358_v59 }
 0x46c   : > { %v5486_v38 = vpop.f32.mrf.mxu1 }
 0x46e   : > { %v5487_v2 = vpop.f32.mrf.mxu1 }
 0x46f   : > { %v5488_v5 = vadd.f32 %v5487_v2, %v5486_v38 }
 0x471   : > { %v3180_v7 = vadd.f32 %v5488_v5, %v7565_v52 }
 0x472   : > { %v3865_v9 = vld [vmem:[#allocation6 + $0x24] sm:$0xff] }
 0x473   : > { %v3805_v24 = vld [vmem:[#allocation6 + $0x22] sm:$0xff]  ;;  %3875 = vst.msk [vmem:[#allocation4 + $0x10] sm:$0xff] %vm2382_vm13, %v3865_v9  ;;  %v3315_v10 = vadd.f32 %v3314_v8, %v3180_v7 }
 0x474   : > { %v3580_v22 = vld [vmem:[#allocation6 + $0x28] sm:$0xff]  ;;  %3825 = vrot.lane.b32.xlu0 %v3805_v24, %s5973_s19  ;;  %3663 = vst.msk [vmem:[#allocation4 + $0x38] sm:$0xff] %vm2382_vm13, %v3805_v24 }
 0x475   : > { %3607 = vrot.lane.b32.xlu1 %v3580_v22, %s5973_s19  ;;  %3400 = vst.msk [vmem:[#allocation4 + $0x78] sm:$0xff] %vm2382_vm13, %v3580_v22  ;;  %v3359_v11 = vmax.f32 %v3315_v10, 0.0  ;;  %v5798_v10 = vpop.f32.mrf.mxu0 }
 0x477   : > { %3373 = vst.msk [vmem:[#allocation6 + $0x30] sm:$0xff] %vm2382_vm13, %v3359_v11 }
 0x478   : > { %3767 = vrot.lane.b32.xlu0 %v3580_v22, %s5972_s18 }
 0x479   : > { %3445 = vrot.lane.b32.xlu1 %v3805_v24, %s5971_s25 }
 0x47a   : > { %v3887_v30 = vld [vmem:[#allocation4 + $0x10] sm:$0xff] }
 0x47b   : > { %5807 = vmatprep.mubr.msk.f32.mxu0 %vm2382_vm13, %v3887_v30 }
 0x47c   : > { %3701 = vrot.lane.b32.xlu0 %v3865_v9, %s5971_s25 }
 0x47d   : > { %3529 = vrot.lane.b32.xlu1 %v3865_v9, %s5972_s18 }
 0x47e   : > { %v3866_v13 = vld [vmem:[#allocation6 + $0x2c] sm:$0xff] }
 0x47f   : > { %v3806_v15 = vld [vmem:[#allocation6 + $0x2a] sm:$0xff]  ;;  %3876 = vst.msk [vmem:[#allocation4 + $0x28] sm:$0xff] %vm2382_vm13, %v3866_v13 }
 0x480   : > { %v3581_v16 = vld [vmem:[#allocation6 + $0x30] sm:$0xff]  ;;  %3827 = vrot.lane.b32.xlu0 %v3806_v15, %s5973_s19  ;;  %3664 = vst.msk [vmem:[#allocation4 + $0x50] sm:$0xff] %vm2382_vm13, %v3806_v15 }
 0x481   : > { %3401 = vst.msk [vmem:[#allocation4 + $0x90] sm:$0xff] %vm2382_vm13, %v3581_v16  ;;  %3609 = vrot.lane.b32.xlu1 %v3581_v16, %s5973_s19 }
 0x484   : > { %3769 = vrot.lane.b32.xlu0 %v3581_v16, %s5972_s18 }
 0x485   : > { %3447 = vrot.lane.b32.xlu1 %v3806_v15, %s5971_s25 }
 0x486   : > { %v3890_v41 = vld [vmem:[#allocation4 + $0x28] sm:$0xff] }
 0x487   : > { %5808 = vmatmul.mubr.msk.f32.vlgmr.msra.gmra.mxu0 %vm2382_vm13, %v3890_v41  ;;  %v3438_v17 = vpop.permute.xlu1 %3437 }
 0x488   : > { %3703 = vrot.lane.b32.xlu0 %v3866_v13, %s5971_s25  ;;  %3479 = vst.msk [vmem:[#allocation4] sm:$0xff] %vm2541_vm14, %v3438_v17  ;;  %v3344_v17 = vpop.f32.mrf.mxu0 }
 0x489   : > { %3531 = vrot.lane.b32.xlu1 %v3866_v13, %s5972_s18 }
 0x48b   : > { %v3522_v20 = vpop.permute.xlu1 %3521 }
 0x48c   : > { %v5489_v39 = vpop.f32.mrf.mxu1  ;;  %3563 = vst.msk [vmem:[#allocation4] sm:$0xff] %vm2627_vm15, %v3522_v20 }
 0x48e   : > { %v5490_v21 = vpop.f32.mrf.mxu1 }
 0x48f   : > { %v5491_v23 = vadd.f32 %v5490_v21, %v5489_v39  ;;  %v3602_v48 = vpop.permute.xlu1 %3601 }
 0x490   : > { %3637 = vst.msk [vmem:[#allocation4] sm:$0xff] %vm2703_vm0, %v3602_v48 }
 0x491   : > { %v3185_v28 = vadd.f32 %v5491_v23, %v7565_v52 }
 0x493   : > { %v3320_v33 = vadd.f32 %v5789_v18, %v3185_v28  ;;  %v3440_v35 = vpop.permute.xlu1 %3439 }
 0x494   : > { %3480 = vst.msk [vmem:[#allocation4 + $0x18] sm:$0xff] %vm2541_vm14, %v3440_v35 }
 0x495   : > { %v3360_v36 = vmax.f32 %v3320_v33, 0.0 }
 0x497   : > { %3374 = vst.msk [vmem:[#allocation6 + $0x38] sm:$0xff] %vm2382_vm13, %v3360_v36  ;;  %v3524_v32 = vpop.permute.xlu1 %3523 }
 0x498   : > { %v5492_v37 = vpop.f32.mrf.mxu1  ;;  %3564 = vst.msk [vmem:[#allocation4 + $0x18] sm:$0xff] %vm2627_vm15, %v3524_v32 }
 0x49a   : > { %v5493_v14 = vpop.f32.mrf.mxu1 }
 0x49b   : > { %v5494_v19 = vadd.f32 %v5493_v14, %v5492_v37 }
 0x49d   : > { %v3190_v63 = vadd.f32 %v5494_v19, %v7565_v52 }
 0x49e   : > { %v3867_v0 = vld [vmem:[#allocation6 + $0x34] sm:$0xff] }
 0x49f   : > { %v3807_v44 = vld [vmem:[#allocation6 + $0x32] sm:$0xff]  ;;  %3877 = vst.msk [vmem:[#allocation4 + $0x40] sm:$0xff] %vm2382_vm13, %v3867_v0  ;;  %v3325_v46 = vadd.f32 %v3324_v29, %v3190_v63 }
 0x4a0   : > { %v3582_v45 = vld [vmem:[#allocation6 + $0x38] sm:$0xff]  ;;  %3829 = vrot.lane.b32.xlu0 %v3807_v44, %s5973_s19  ;;  %3665 = vst.msk [vmem:[#allocation4 + $0x68] sm:$0xff] %vm2382_vm13, %v3807_v44 }
 0x4a1   : > { %3611 = vrot.lane.b32.xlu1 %v3582_v45, %s5973_s19  ;;  %3402 = vst.msk [vmem:[#allocation4 + $0xa8] sm:$0xff] %vm2382_vm13, %v3582_v45  ;;  %v3361_v47 = vmax.f32 %v3325_v46, 0.0 }
 0x4a3   : > { %3375 = vst.msk [vmem:[#allocation6 + $0x40] sm:$0xff] %vm2382_vm13, %v3361_v47 }
 0x4a4   : > { %3771 = vrot.lane.b32.xlu0 %v3582_v45, %s5972_s18  ;;  %v5495_v40 = vpop.f32.mrf.mxu1  ;;  %v3698_v49 = vpop.permute.xlu0 %3697 }
 0x4a5   : > { %3449 = vrot.lane.b32.xlu1 %v3807_v44, %s5971_s25  ;;  %3733 = vst.msk [vmem:[#allocation4 + $0x8] sm:$0xff] %vm2541_vm14, %v3698_v49  ;;  %v3604_v4 = vpop.permute.xlu1 %3603 }
 0x4a6   : > { %3638 = vst.msk [vmem:[#allocation4 + $0x18] sm:$0xff] %vm2703_vm0, %v3604_v4  ;;  %v5496_v43 = vpop.f32.mrf.mxu1  ;;  %v3893_v50 = vld [vmem:[#allocation4 + $0x40] sm:$0xff] }
 0x4a7   : > { %v5497_v25 = vadd.f32 %v5496_v43, %v5495_v40  ;;  %5810 = vmatprep.mubr.msk.f32.mxu0 %vm2382_vm13, %v3893_v50 }
 0x4a8   : > { %3705 = vrot.lane.b32.xlu0 %v3867_v0, %s5971_s25 }
 0x4a9   : > { %3533 = vrot.lane.b32.xlu1 %v3867_v0, %s5972_s18  ;;  %v3195_v34 = vadd.f32 %v5497_v25, %v7565_v52  ;;  %v3442_v51 = vpop.permute.xlu1 %3441 }
 0x4aa   : > { %v3868_v27 = vld [vmem:[#allocation6 + $0x3c] sm:$0xff]  ;;  %3481 = vst.msk [vmem:[#allocation4 + $0x30] sm:$0xff] %vm2541_vm14, %v3442_v51 }
 0x4ab   : > { %v3808_v31 = vld [vmem:[#allocation6 + $0x3a] sm:$0xff]  ;;  %3878 = vst.msk [vmem:[#allocation4 + $0x58] sm:$0xff] %vm2382_vm13, %v3868_v27  ;;  %v3330_v6 = vadd.f32 %v5792_v42, %v3195_v34 }
 0x4ac   : > { %v3583_v53 = vld [vmem:[#allocation6 + $0x40] sm:$0xff]  ;;  %3831 = vrot.lane.b32.xlu0 %v3808_v31, %s5973_s19  ;;  %3666 = vst.msk [vmem:[#allocation4 + $0x80] sm:$0xff] %vm2382_vm13, %v3808_v31  ;;  %v5498_v26 = vpop.f32.mrf.mxu1 }
 0x4ad   : > { %3403 = vst.msk [vmem:[#allocation4 + $0xc0] sm:$0xff] %vm2382_vm13, %v3583_v53  ;;  %3613 = vrot.lane.b32.xlu1 %v3583_v53, %s5973_s19  ;;  %v3362_v56 = vmax.f32 %v3330_v6, 0.0  ;;  %v3526_v58 = vpop.permute.xlu1 %3525 }
 0x4ae   : > { %3565 = vst.msk [vmem:[#allocation4 + $0x30] sm:$0xff] %vm2627_vm15, %v3526_v58  ;;  %v5499_v62 = vpop.f32.mrf.mxu1  ;;  %v3885_v58 = vld [vmem:[#allocation4] sm:$0xff] }
 0x4af   : > { %3376 = vst.msk [vmem:[#allocation6 + $0x48] sm:$0xff] %vm2382_vm13, %v3362_v56  ;;  %v5500_v57 = vadd.f32 %v5499_v62, %v5498_v26 }
 0x4b0   : > { %3773 = vrot.lane.b32.xlu0 %v3583_v53, %s5972_s18  ;;  %v3766_v59 = vpop.permute.xlu0 %3765 }
 0x4b1   : > { %3451 = vrot.lane.b32.xlu1 %v3808_v31, %s5971_s25  ;;  %3795 = vst.msk [vmem:[#allocation4 + $0x8] sm:$0xff] %vm2627_vm15, %v3766_v59  ;;  %v3606_v60 = vpop.permute.xlu1 %3605  ;;  %v3200_v61 = vadd.f32 %v5500_v57, %v7565_v52 }
 0x4b2   : > { %3639 = vst.msk [vmem:[#allocation4 + $0x30] sm:$0xff] %vm2703_vm0, %v3606_v60  ;;  %v3896_v12 = vld [vmem:[#allocation4 + $0x58] sm:$0xff] }
 0x4b3   : > { %v3335_v38 = vadd.f32 %v3334_v54, %v3200_v61  ;;  %5811 = vmatmul.mubr.msk.f32.gmra.mxu0 %vm2382_vm13, %v3896_v12 }
 0x4b4   : > { %3707 = vrot.lane.b32.xlu0 %v3868_v27, %s5971_s25  ;;  %v5501_v1 = vpop.f32.mrf.mxu1  ;;  %v3700_v18 = vpop.permute.xlu0 %3699 }
 0x4b5   : > { %3535 = vrot.lane.b32.xlu1 %v3868_v27, %s5972_s18  ;;  %v3363_v2 = vmax.f32 %v3335_v38, 0.0  ;;  %3734 = vst.msk [vmem:[#allocation4 + $0x20] sm:$0xff] %vm2541_vm14, %v3700_v18  ;;  %v3444_v5 = vpop.permute.xlu1 %3443  ;;  %v3917_v18 = vld [vmem:[#allocation4 + $0x100] sm:$0xff] }
 0x4b6   : > { %v3869_v3 = vld [vmem:[#allocation6 + $0x44] sm:$0xff]  ;;  %3482 = vst.msk [vmem:[#allocation4 + $0x48] sm:$0xff] %vm2541_vm14, %v3444_v5  ;;  %v5502_v7 = vpop.f32.mrf.mxu1 }
 0x4b7   : > { %v3809_v8 = vld [vmem:[#allocation6 + $0x42] sm:$0xff]  ;;  %3879 = vst.msk [vmem:[#allocation4 + $0x70] sm:$0xff] %vm2382_vm13, %v3869_v3  ;;  %3377 = vst.msk [vmem:[#allocation6 + $0x50] sm:$0xff] %vm2382_vm13, %v3363_v2  ;;  %v5503_v24 = vadd.f32 %v5502_v7, %v5501_v1  ;;  %v3888_v1 = vld [vmem:[#allocation4 + $0x18] sm:$0xff] }
 0x4b8   : > { %v3584_v9 = vld [vmem:[#allocation6 + $0x48] sm:$0xff]  ;;  %3833 = vrot.lane.b32.xlu0 %v3809_v8, %s5973_s19  ;;  %3667 = vst.msk [vmem:[#allocation4 + $0x98] sm:$0xff] %vm2382_vm13, %v3809_v8  ;;  %v5504_v22 = vpop.f32.mrf.mxu1  ;;  %v3920_v2 = vld [vmem:[#allocation4 + $0x118] sm:$0xff] }
 0x4b9   : > { %3404 = vst.msk [vmem:[#allocation4 + $0xd8] sm:$0xff] %vm2382_vm13, %v3584_v9  ;;  %3615 = vrot.lane.b32.xlu1 %v3584_v9, %s5973_s19  ;;  %v3205_v11 = vadd.f32 %v5503_v24, %v7565_v52  ;;  %v3528_v30 = vpop.permute.xlu1 %3527  ;;  %v3926_v7 = vld [vmem:[#allocation4 + $0x148] sm:$0xff] }
 0x4ba   : > { %3566 = vst.msk [vmem:[#allocation4 + $0x48] sm:$0xff] %vm2627_vm15, %v3528_v30  ;;  %v5505_v13 = vpop.f32.mrf.mxu1 }
 0x4bb   : > { %v3340_v15 = vadd.f32 %v5795_v55, %v3205_v11  ;;  %v5506_v16 = vadd.f32 %v5505_v13, %v5504_v22 }
 0x4bc   : > { %3775 = vrot.lane.b32.xlu0 %v3584_v9, %s5972_s18  ;;  %v5507_v41 = vpop.f32.mrf.mxu1 }
 0x4bd   : > { %3453 = vrot.lane.b32.xlu1 %v3809_v8, %s5971_s25  ;;  %v3364_v39 = vmax.f32 %v3340_v15, 0.0  ;;  %v3210_v20 = vadd.f32 %v5506_v16, %v7565_v52  ;;  %v3891_v15 = vld [vmem:[#allocation4 + $0x30] sm:$0xff] }
 0x4be   : > { %v3870_v21 = vld [vmem:[#allocation6 + $0x4c] sm:$0xff]  ;;  %v5508_v23 = vpop.f32.mrf.mxu1 }
 0x4bf   : > { %v3899_v48 = vld [vmem:[#allocation4 + $0x70] sm:$0xff]  ;;  %3880 = vst.msk [vmem:[#allocation4 + $0x88] sm:$0xff] %vm2382_vm13, %v3870_v21  ;;  %3378 = vst.msk [vmem:[#allocation6 + $0x58] sm:$0xff] %vm2382_vm13, %v3364_v39  ;;  %v5509_v33 = vadd.f32 %v5508_v23, %v5507_v41  ;;  %v3345_v35 = vadd.f32 %v3344_v17, %v3210_v20 }
 0x4c0   : > { %v3810_v28 = vld [vmem:[#allocation6 + $0x4a] sm:$0xff]  ;;  %5813 = vmatprep.mubr.msk.f32.mxu0 %vm2382_vm13, %v3899_v48  ;;  %3709 = vrot.lane.b32.xlu0 %v3869_v3, %s5971_s25 }
 0x4c1   : > { %v3585_v36 = vld [vmem:[#allocation6 + $0x50] sm:$0xff]  ;;  %3668 = vst.msk [vmem:[#allocation4 + $0xb0] sm:$0xff] %vm2382_vm13, %v3810_v28  ;;  %3537 = vrot.lane.b32.xlu1 %v3869_v3, %s5972_s18  ;;  %v3215_v37 = vadd.f32 %v5509_v33, %v7565_v52  ;;  %v3365_v32 = vmax.f32 %v3345_v35, 0.0 }
 0x4c2   : > { %3405 = vst.msk [vmem:[#allocation4 + $0xf0] sm:$0xff] %vm2382_vm13, %v3585_v36  ;;  %v3923_v3 = vld [vmem:[#allocation4 + $0x130] sm:$0xff] }
 0x4c3   : > { %v3350_v42 = vadd.f32 %v5798_v10, %v3215_v37  ;;  %3379 = vst.msk [vmem:[#allocation6 + $0x60] sm:$0xff] %vm2382_vm13, %v3365_v32 }
 0x4c4   : > { %3835 = vrot.lane.b32.xlu0 %v3810_v28, %s5973_s19 }
 0x4c5   : > { %3617 = vrot.lane.b32.xlu1 %v3585_v36, %s5973_s19  ;;  %v3366_v14 = vmax.f32 %v3350_v42, 0.0 }
 0x4c6   : > { %v3871_v19 = vld [vmem:[#allocation6 + $0x54] sm:$0xff]  ;;  %v3902_v63 = vld [vmem:[#allocation4 + $0x88] sm:$0xff] }
 0x4c7   : > { %v3811_v29 = vld [vmem:[#allocation6 + $0x52] sm:$0xff]  ;;  %3881 = vst.msk [vmem:[#allocation4 + $0xa0] sm:$0xff] %vm2382_vm13, %v3871_v19  ;;  %3380 = vst.msk [vmem:[#allocation6 + $0x68] sm:$0xff] %vm2382_vm13, %v3366_v14  ;;  %5814 = vmatmul.mubr.msk.f32.gmra.mxu0 %vm2382_vm13, %v3902_v63 }
 0x4c8   : > { %3777 = vrot.lane.b32.xlu0 %v3585_v36, %s5972_s18  ;;  %v3586_v52 = vld [vmem:[#allocation6 + $0x58] sm:$0xff]  ;;  %3669 = vst.msk [vmem:[#allocation4 + $0xc8] sm:$0xff] %vm2382_vm13, %v3811_v29 }
 0x4c9   : > { %3455 = vrot.lane.b32.xlu1 %v3810_v28, %s5971_s25  ;;  %3406 = vst.msk [vmem:[#allocation4 + $0x108] sm:$0xff] %vm2382_vm13, %v3586_v52 }
 0x4ca   : > { %v3872_v0 = vld [vmem:[#allocation6 + $0x5c] sm:$0xff] }
 0x4cb   : > { %v3587_v44 = vld [vmem:[#allocation6 + $0x60] sm:$0xff]  ;;  %3882 = vst.msk [vmem:[#allocation4 + $0xb8] sm:$0xff] %vm2382_vm13, %v3872_v0 }
 0x4cc   : > { %v3812_v45 = vld [vmem:[#allocation6 + $0x5a] sm:$0xff]  ;;  %3711 = vrot.lane.b32.xlu0 %v3870_v21, %s5971_s25  ;;  %3407 = vst.msk [vmem:[#allocation4 + $0x120] sm:$0xff] %vm2382_vm13, %v3587_v44 }
 0x4cd   : > { %3670 = vst.msk [vmem:[#allocation4 + $0xe0] sm:$0xff] %vm2382_vm13, %v3812_v45  ;;  %3539 = vrot.lane.b32.xlu1 %v3870_v21, %s5972_s18 }
 0x4ce   : > { %v3874_v46 = vld [vmem:[#allocation6 + $0x6c] sm:$0xf]  ;;  %v7795_v47 = vld [vmem:[#allocation6 + $0x64] sm:$0xff] }
 0x4cf   : > { %v3905_v40 = vld [vmem:[#allocation4 + $0xa0] sm:$0xff]  ;;  %3884 = vst.msk [vmem:[#allocation4 + $0xe8] sm:$0xf] %vm2954_vm5, %v3874_v46  ;;  %v3588_v49 = vld [vmem:[#allocation6 + $0x68] sm:$0xff] }
 0x4d0   : > { %3883 = vst.msk [vmem:[#allocation4 + $0xd0] sm:$0xff] %vm2382_vm13, %v7795_v47  ;;  %5816 = vmatprep.mubr.msk.f32.mxu0 %vm2382_vm13, %v3905_v40  ;;  %3837 = vrot.lane.b32.xlu0 %v3811_v29, %s5973_s19  ;;  %v7802_v4 = vld [vmem:[#allocation6 + $0x62] sm:$0xff]  ;;  %3408 = vst.msk [vmem:[#allocation4 + $0x138] sm:$0xff] %vm2382_vm13, %v3588_v49  ;;  %v3660_v43 = vld [vmem:[#allocation6 + $0x6a] sm:$0x3f] }
 0x4d1   : > { %3619 = vrot.lane.b32.xlu1 %v3586_v52, %s5973_s19  ;;  %3671 = vst.msk [vmem:[#allocation4 + $0xf8] sm:$0xff] %vm2382_vm13, %v7802_v4  ;;  %v3506_v31 = vld [vmem:[#allocation6 + $0x6c] sm:$0xf] }
 0x4d2   : > { %v3908_v50 = vld [vmem:[#allocation4 + $0xb8] sm:$0xff]  ;;  %3672 = vst.msk [vmem:[#allocation4 + $0x110] sm:$0x3f] %vm2739_vm6, %v3660_v43  ;;  %v3814_v60 = vld [vmem:[#allocation6 + $0x6a] sm:$0x3f] }
 0x4d3   : > { %5817 = vmatmul.mubr.msk.f32.gmra.mxu0 %vm2382_vm13, %v3908_v50  ;;  %v3684_v5 = vld [vmem:[#allocation6 + $0x6c] sm:$0xf] }
 0x4d4   : > { %3779 = vrot.lane.b32.xlu0 %v3586_v52, %s5972_s18  ;;  %v3422_v8 = vld [vmem:[#allocation6 + $0x6a] sm:$0x3f] }
 0x4d5   : > { %3541 = vrot.lane.b32.xlu1 %v3871_v19, %s5972_s18 }
 0x4d6   : > { %v3914_v34 = vld [vmem:[#allocation4 + $0xe8] sm:$0xff] }
 0x4d7   : > { %v3911_v25 = vld [vmem:[#allocation4 + $0xd0] sm:$0xff] }
 0x4d8   : > { %5819 = vmatprep.mubr.msk.f32.mxu0 %vm2382_vm13, %v3911_v25  ;;  %3713 = vrot.lane.b32.xlu0 %v3871_v19, %s5971_s25 }
 0x4d9   : > { %3621 = vrot.lane.b32.xlu1 %v3587_v44, %s5973_s19  ;;  %5820 = vmatmul.mubr.msk.f32.gmra.mxu0 %vm2382_vm13, %v3914_v34 }
 0x4da   : > { %5822 = vmatprep.mubr.msk.f32.mxu0 %vm2382_vm13, %v3917_v18 }
 0x4dc   : > { %3457 = vrot.lane.b32.xlu0 %v3811_v29, %s5971_s25 }
 0x4dd   : > { %3543 = vrot.lane.b32.xlu1 %v3872_v0, %s5972_s18  ;;  %5823 = vmatmul.mubr.msk.f32.gmra.mxu0 %vm2382_vm13, %v3920_v2 }
 0x4de   : > { %5825 = vmatprep.mubr.msk.f32.mxu0 %vm2382_vm13, %v3923_v3 }
 0x4e0   : > { %3839 = vrot.lane.b32.xlu0 %v3812_v45, %s5973_s19 }
 0x4e1   : > { %3623 = vrot.lane.b32.xlu1 %v3588_v49, %s5973_s19  ;;  %5826 = vmatmul.mubr.msk.f32.gmra.mxu0 %vm2382_vm13, %v3926_v7 }
 0x4e4   : > { %3781 = vrot.lane.b32.xlu0 %v3587_v44, %s5972_s18 }
 0x4e5   : > { %3545 = vrot.lane.b32.xlu1 %v7795_v47, %s5972_s18 }
 0x4e6   : > { %v3826_v51 = vpop.permute.xlu0 %3825 }
 0x4e7   : > { %v3608_v27 = vpop.permute.xlu1 %3607  ;;  %3855 = vst.msk [vmem:[#allocation4 + $0x8] sm:$0xff] %vm2703_vm0, %v3826_v51 }
 0x4e8   : > { %3640 = vst.msk [vmem:[#allocation4 + $0x48] sm:$0xff] %vm2703_vm0, %v3608_v27  ;;  %3715 = vrot.lane.b32.xlu0 %v3872_v0, %s5971_s25 }
 0x4e9   : > { %3547 = vrot.lane.b32.xlu1 %v3506_v31, %s5972_s18 }
 0x4ea   : > { %v3768_v53 = vpop.permute.xlu0 %3767 }
 0x4eb   : > { %v3446_v6 = vpop.permute.xlu1 %3445  ;;  %3796 = vst.msk [vmem:[#allocation4 + $0x20] sm:$0xff] %vm2627_vm15, %v3768_v53 }
 0x4ec   : > { %3483 = vst.msk [vmem:[#allocation4 + $0x60] sm:$0xff] %vm2541_vm14, %v3446_v6  ;;  %3459 = vrot.lane.b32.xlu0 %v3812_v45, %s5971_s25 }
 0x4ee   : > { %v3702_v26 = vpop.permute.xlu0 %3701  ;;  %v3886_v55 = vld [vmem:[#allocation4 + $0x8] sm:$0xff] }
 0x4ef   : > { %3735 = vst.msk [vmem:[#allocation4 + $0x38] sm:$0xff] %vm2541_vm14, %v3702_v26  ;;  %v3530_v56 = vpop.permute.xlu1 %3529  ;;  %4076 = vmatprep.mubr.f32.mxu1 %v3886_v55  ;;  %v3894_v48 = vld [vmem:[#allocation4 + $0x48] sm:$0xff] }
 0x4f0   : > { %3567 = vst.msk [vmem:[#allocation4 + $0x60] sm:$0xff] %vm2627_vm15, %v3530_v56  ;;  %4077 = vmatmul.mubr.f32.vlgmr.msra.gmra.mxu1 %v3885_v58  ;;  %3841 = vrot.lane.b32.xlu0 %v7802_v4, %s5973_s19 }
 0x4f2   : > { %v3828_v62 = vpop.permute.xlu0 %3827 }
 0x4f3   : > { %3856 = vst.msk [vmem:[#allocation4 + $0x20] sm:$0xff] %vm2703_vm0, %v3828_v62  ;;  %v3610_v57 = vpop.permute.xlu1 %3609 }
 0x4f4   : > { %3641 = vst.msk [vmem:[#allocation4 + $0x60] sm:$0xff] %vm2703_vm0, %v3610_v57  ;;  %3783 = vrot.lane.b32.xlu0 %v3588_v49, %s5972_s18 }
 0x4f6   : > { %v3770_v59 = vpop.permute.xlu0 %3769 }
 0x4f7   : > { %3797 = vst.msk [vmem:[#allocation4 + $0x38] sm:$0xff] %vm2627_vm15, %v3770_v59  ;;  %v3448_v54 = vpop.permute.xlu1 %3447 }
 0x4f8   : > { %3484 = vst.msk [vmem:[#allocation4 + $0x78] sm:$0xff] %vm2541_vm14, %v3448_v54  ;;  %3843 = vrot.lane.b32.xlu0 %v3814_v60, %s5973_s19 }
 0x4fa   : > { %v3704_v61 = vpop.permute.xlu0 %3703  ;;  %v3889_v12 = vld [vmem:[#allocation4 + $0x20] sm:$0xff] }
 0x4fb   : > { %3736 = vst.msk [vmem:[#allocation4 + $0x50] sm:$0xff] %vm2541_vm14, %v3704_v61  ;;  %v3532_v38 = vpop.permute.xlu1 %3531  ;;  %4081 = vmatprep.mubr.f32.mxu1 %v3889_v12  ;;  %v3897_v14 = vld [vmem:[#allocation4 + $0x60] sm:$0xff] }
 0x4fc   : > { %3568 = vst.msk [vmem:[#allocation4 + $0x78] sm:$0xff] %vm2627_vm15, %v3532_v38  ;;  %4082 = vmatmul.mubr.f32.gmra.mxu1 %v3888_v1  ;;  %3717 = vrot.lane.b32.xlu0 %v7795_v47, %s5971_s25 }
 0x500   : > { %3719 = vrot.lane.b32.xlu0 %v3684_v5, %s5971_s25 }
 0x504   : > { %3461 = vrot.lane.b32.xlu0 %v7802_v4, %s5971_s25 }
 0x508   : > { %3463 = vrot.lane.b32.xlu0 %v3422_v8, %s5971_s25 }
 0x512   : > { %v3830_v9 = vpop.permute.xlu0 %3829 }
 0x513   : > { %v3612_v24 = vpop.permute.xlu1 %3611  ;;  %3857 = vst.msk [vmem:[#allocation4 + $0x38] sm:$0xff] %vm2703_vm0, %v3830_v9  ;;  %v3922_v9 = vld [vmem:[#allocation4 + $0x128] sm:$0xff] }
 0x514   : > { %3642 = vst.msk [vmem:[#allocation4 + $0x78] sm:$0xff] %vm2703_vm0, %v3612_v24 }
 0x516   : > { %v3772_v22 = vpop.permute.xlu0 %3771 }
 0x517   : > { %v3450_v10 = vpop.permute.xlu1 %3449  ;;  %3798 = vst.msk [vmem:[#allocation4 + $0x50] sm:$0xff] %vm2627_vm15, %v3772_v22 }
 0x518   : > { %3485 = vst.msk [vmem:[#allocation4 + $0x90] sm:$0xff] %vm2541_vm14, %v3450_v10  ;;  %v3925_v10 = vld [vmem:[#allocation4 + $0x140] sm:$0xff] }
 0x51a   : > { %v3706_v11 = vpop.permute.xlu0 %3705  ;;  %v3892_v30 = vld [vmem:[#allocation4 + $0x38] sm:$0xff] }
 0x51b   : > { %3737 = vst.msk [vmem:[#allocation4 + $0x68] sm:$0xff] %vm2541_vm14, %v3706_v11  ;;  %v3534_v13 = vpop.permute.xlu1 %3533  ;;  %4086 = vmatprep.mubr.f32.mxu1 %v3892_v30  ;;  %v3900_v46 = vld [vmem:[#allocation4 + $0x78] sm:$0xff] }
 0x51c   : > { %3569 = vst.msk [vmem:[#allocation4 + $0x90] sm:$0xff] %vm2627_vm15, %v3534_v13  ;;  %4087 = vmatmul.mubr.f32.gmra.mxu1 %v3891_v15 }
 0x51e   : > { %v3832_v16 = vpop.permute.xlu0 %3831 }
 0x51f   : > { %3858 = vst.msk [vmem:[#allocation4 + $0x50] sm:$0xff] %vm2703_vm0, %v3832_v16  ;;  %v3614_v41 = vpop.permute.xlu1 %3613  ;;  %v7901_v16 = vld [vmem:[%s8217_s6] ss:$0 sm:$0xff] }
 0x520   : > { %3643 = vst.msk [vmem:[#allocation4 + $0x90] sm:$0xff] %vm2703_vm0, %v3614_v41 }
 0x522   : > { %v3774_v17 = vpop.permute.xlu0 %3773 }
 0x523   : > { %3799 = vst.msk [vmem:[#allocation4 + $0x68] sm:$0xff] %vm2627_vm15, %v3774_v17  ;;  %v3452_v39 = vpop.permute.xlu1 %3451 }
 0x524   : > { %3486 = vst.msk [vmem:[#allocation4 + $0xa8] sm:$0xff] %vm2541_vm14, %v3452_v39 }
 0x526   : > { %v3708_v20 = vpop.permute.xlu0 %3707  ;;  %v3895_v21 = vld [vmem:[#allocation4 + $0x50] sm:$0xff] }
 0x527   : > { %3738 = vst.msk [vmem:[#allocation4 + $0x80] sm:$0xff] %vm2541_vm14, %v3708_v20  ;;  %v3536_v23 = vpop.permute.xlu1 %3535  ;;  %4091 = vmatprep.mubr.f32.mxu1 %v3895_v21  ;;  %v3903_v25 = vld [vmem:[#allocation4 + $0x90] sm:$0xff] }
 0x528   : > { %3570 = vst.msk [vmem:[#allocation4 + $0xa8] sm:$0xff] %vm2627_vm15, %v3536_v23  ;;  %4092 = vmatmul.mubr.f32.gmra.mxu1 %v3894_v48 }
 0x52a   : > { %v3834_v28 = vpop.permute.xlu0 %3833 }
 0x52b   : > { %3859 = vst.msk [vmem:[#allocation4 + $0x68] sm:$0xff] %vm2703_vm0, %v3834_v28  ;;  %v3616_v33 = vpop.permute.xlu1 %3615 }
 0x52c   : > { %3644 = vst.msk [vmem:[#allocation4 + $0xa8] sm:$0xff] %vm2703_vm0, %v3616_v33 }
 0x52e   : > { %v3776_v35 = vpop.permute.xlu0 %3775 }
 0x52f   : > { %3800 = vst.msk [vmem:[#allocation4 + $0x80] sm:$0xff] %vm2627_vm15, %v3776_v35  ;;  %v3454_v36 = vpop.permute.xlu1 %3453 }
 0x530   : > { %3487 = vst.msk [vmem:[#allocation4 + $0xc0] sm:$0xff] %vm2541_vm14, %v3454_v36 }
 0x532   : > { %v3710_v37 = vpop.permute.xlu0 %3709  ;;  %v3898_v32 = vld [vmem:[#allocation4 + $0x68] sm:$0xff] }
 0x533   : > { %3739 = vst.msk [vmem:[#allocation4 + $0x98] sm:$0xff] %vm2541_vm14, %v3710_v37  ;;  %v3538_v42 = vpop.permute.xlu1 %3537  ;;  %4096 = vmatprep.mubr.f32.mxu1 %v3898_v32  ;;  %v3906_v55 = vld [vmem:[#allocation4 + $0xa8] sm:$0xff] }
 0x534   : > { %3571 = vst.msk [vmem:[#allocation4 + $0xc0] sm:$0xff] %vm2627_vm15, %v3538_v42  ;;  %4097 = vmatmul.mubr.f32.gmra.mxu1 %v3897_v14 }
 0x536   : > { %v3836_v19 = vpop.permute.xlu0 %3835 }
 0x537   : > { %3860 = vst.msk [vmem:[#allocation4 + $0x80] sm:$0xff] %vm2703_vm0, %v3836_v19  ;;  %v3618_v63 = vpop.permute.xlu1 %3617 }
 0x538   : > { %3645 = vst.msk [vmem:[#allocation4 + $0xc0] sm:$0xff] %vm2703_vm0, %v3618_v63 }
 0x53a   : > { %v3778_v29 = vpop.permute.xlu0 %3777 }
 0x53b   : > { %3801 = vst.msk [vmem:[#allocation4 + $0x98] sm:$0xff] %vm2627_vm15, %v3778_v29  ;;  %v3456_v52 = vpop.permute.xlu1 %3455 }
 0x53c   : > { %3488 = vst.msk [vmem:[#allocation4 + $0xd8] sm:$0xff] %vm2541_vm14, %v3456_v52 }
 0x53e   : > { %v3712_v0 = vpop.permute.xlu0 %3711  ;;  %v3901_v44 = vld [vmem:[#allocation4 + $0x80] sm:$0xff] }
 0x53f   : > { %3740 = vst.msk [vmem:[#allocation4 + $0xb0] sm:$0xff] %vm2541_vm14, %v3712_v0  ;;  %v3540_v45 = vpop.permute.xlu1 %3539  ;;  %4101 = vmatprep.mubr.f32.mxu1 %v3901_v44  ;;  %v3909_v60 = vld [vmem:[#allocation4 + $0xc0] sm:$0xff] }
 0x540   : > { %3572 = vst.msk [vmem:[#allocation4 + $0xd8] sm:$0xff] %vm2627_vm15, %v3540_v45  ;;  %4102 = vmatmul.mubr.f32.gmra.mxu1 %v3900_v46 }
 0x542   : > { %v3838_v47 = vpop.permute.xlu0 %3837 }
 0x543   : > { %3861 = vst.msk [vmem:[#allocation4 + $0x98] sm:$0xff] %vm2703_vm0, %v3838_v47  ;;  %v3620_v40 = vpop.permute.xlu1 %3619 }
 0x544   : > { %3646 = vst.msk [vmem:[#allocation4 + $0xd8] sm:$0xff] %vm2703_vm0, %v3620_v40 }
 0x546   : > { %v3780_v49 = vpop.permute.xlu0 %3779 }
 0x547   : > { %3802 = vst.msk [vmem:[#allocation4 + $0xb0] sm:$0xff] %vm2627_vm15, %v3780_v49  ;;  %v3542_v4 = vpop.permute.xlu1 %3541  ;;  %v5809_v15 = vpop.f32.mrf.mxu0 }
 0x549   : > { %v4213_v20 = vpop.f32.mrf.mxu0 }
 0x54a   : > { %v3714_v43 = vpop.permute.xlu0 %3713  ;;  %v3904_v50 = vld [vmem:[#allocation4 + $0x98] sm:$0xff] }
 0x54b   : > { %3741 = vst.msk [vmem:[#allocation4 + $0xc8] sm:$0xff] %vm2541_vm14, %v3714_v43  ;;  %4106 = vmatprep.mubr.f32.mxu1 %v3904_v50  ;;  %v3622_v51 = vpop.permute.xlu1 %3621  ;;  %v3912_v1 = vld [vmem:[#allocation4 + $0xd8] sm:$0xff] }
 0x54c   : > { %4107 = vmatmul.mubr.f32.gmra.mxu1 %v3903_v25 }
 0x54e   : > { %v3458_v34 = vpop.permute.xlu0 %3457 }
 0x54f   : > { %3489 = vst.msk [vmem:[#allocation4 + $0xf0] sm:$0xff] %vm2541_vm14, %v3458_v34  ;;  %v3544_v53 = vpop.permute.xlu1 %3543  ;;  %v4887_v34 = vld [vmem:[#allocation8 + $0xf8] sm:$0xff] }
 0x550   : > { %3573 = vst.msk [vmem:[#allocation4 + $0xf0] sm:$0xff] %vm2627_vm15, %v3542_v4  ;;  %5620 = vmatprep.subr.mxu0 %v4887_v34  ;;  %5857 = vmatprep.subr.mxu1 %v4887_v34 }
 0x551   : > { %3647 = vst.msk [vmem:[#allocation4 + $0xf0] sm:$0xff] %vm2703_vm0, %v3622_v51  ;;  %v4871_v51 = vld [vmem:[#allocation8 + $0x78] sm:$0xff] }
 0x552   : > { %v3840_v27 = vpop.permute.xlu0 %3839  ;;  %5621 = vmatpush3.msra.mxu0 %v4871_v51  ;;  %5873 = vmatpush3.msra.mxu1 %v4871_v51 }
 0x553   : > { %3862 = vst.msk [vmem:[#allocation4 + $0xb0] sm:$0xff] %vm2703_vm0, %v3840_v27  ;;  %v3624_v58 = vpop.permute.xlu1 %3623  ;;  %v4886_v27 = vld [vmem:[#allocation8 + $0xf0] sm:$0xff] }
 0x554   : > { %5622 = vmatprep.subr.mxu0 %v4886_v27  ;;  %5858 = vmatprep.subr.mxu1 %v4886_v27 }
 0x556   : > { %v3782_v31 = vpop.permute.xlu0 %3781 }
 0x557   : > { %3803 = vst.msk [vmem:[#allocation4 + $0xc8] sm:$0xff] %vm2627_vm15, %v3782_v31  ;;  %v3546_v18 = vpop.permute.xlu1 %3545 }
 0x558   : > { %v3915_v3 = vld [vmem:[#allocation4 + $0xf0] sm:$0xff] }
 0x55a   : > { %v3716_v6 = vpop.permute.xlu0 %3715  ;;  %v3907_v26 = vld [vmem:[#allocation4 + $0xb0] sm:$0xff] }
 0x55b   : > { %3742 = vst.msk [vmem:[#allocation4 + $0xe0] sm:$0xff] %vm2541_vm14, %v3716_v6  ;;  %4111 = vmatprep.mubr.f32.mxu1 %v3907_v26  ;;  %v3548_v24 = vpop.permute.xlu1 %3547  ;;  %v4870_v6 = vld [vmem:[#allocation8 + $0x70] sm:$0xff]  ;;  %v4885_v26 = vld [vmem:[#allocation8 + $0xe8] sm:$0xff] }
 0x55c   : > { %4112 = vmatmul.mubr.f32.gmra.mxu1 %v3906_v55  ;;  %5623 = vmatpush3.msra.mxu0 %v4870_v6  ;;  %v4869_v55 = vld [vmem:[#allocation8 + $0x68] sm:$0xff] }
 0x55d   : > { %5624 = vmatprep.subr.mxu0 %v4885_v26  ;;  %5874 = vmatpush3.msra.mxu1 %v4870_v6 }
 0x55e   : > { %v3460_v56 = vpop.permute.xlu0 %3459  ;;  %5625 = vmatpush3.msra.mxu0 %v4869_v55  ;;  %5859 = vmatprep.subr.mxu1 %v4885_v26 }
 0x55f   : > { %3490 = vst.msk [vmem:[#allocation4 + $0x108] sm:$0xff] %vm2541_vm14, %v3460_v56  ;;  %v4884_v56 = vld [vmem:[#allocation8 + $0xe0] sm:$0xff]  ;;  %5875 = vmatpush3.msra.mxu1 %v4869_v55 }
 0x560   : > { %3574 = vst.msk [vmem:[#allocation4 + $0x108] sm:$0xff] %vm2627_vm15, %v3544_v53  ;;  %5626 = vmatprep.subr.mxu0 %v4884_v56  ;;  %5860 = vmatprep.subr.mxu1 %v4884_v56 }
 0x561   : > { %3648 = vst.msk [vmem:[#allocation4 + $0x108] sm:$0xff] %vm2703_vm0, %v3624_v58 }
 0x562   : > { %v3842_v62 = vpop.permute.xlu0 %3841 }
 0x563   : > { %3863 = vst.msk [vmem:[#allocation4 + $0xc8] sm:$0xff] %vm2703_vm0, %v3842_v62 }
 0x566   : > { %v3784_v57 = vpop.permute.xlu0 %3783 }
 0x567   : > { %3804 = vst.msk [vmem:[#allocation4 + $0xe0] sm:$0xff] %vm2627_vm15, %v3784_v57 }
 0x568   : > { %v3918_v22 = vld [vmem:[#allocation4 + $0x108] sm:$0xff] }
 0x56a   : > { %v3844_v59 = vpop.permute.xlu0 %3843  ;;  %v3910_v54 = vld [vmem:[#allocation4 + $0xc8] sm:$0xff] }
 0x56b   : > { %3864 = vst.msk [vmem:[#allocation4 + $0xe0] sm:$0x3f] %vm2933_vm7, %v3844_v59  ;;  %4116 = vmatprep.mubr.f32.mxu1 %v3910_v54  ;;  %v4868_v54 = vld [vmem:[#allocation8 + $0x60] sm:$0xff] }
 0x56c   : > { %4117 = vmatmul.mubr.f32.gmra.mxu1 %v3909_v60  ;;  %v4883_v60 = vld [vmem:[#allocation8 + $0xd8] sm:$0xff]  ;;  %5627 = vmatpush3.msra.mxu0 %v4868_v54 }
 0x56d   : > { %5628 = vmatprep.subr.mxu0 %v4883_v60  ;;  %5876 = vmatpush3.msra.mxu1 %v4868_v54 }
 0x56e   : > { %v3718_v61 = vpop.permute.xlu0 %3717  ;;  %5861 = vmatprep.subr.mxu1 %v4883_v60 }
 0x56f   : > { %3743 = vst.msk [vmem:[#allocation4 + $0xf8] sm:$0xff] %vm2541_vm14, %v3718_v61 }
 0x572   : > { %v3720_v12 = vpop.permute.xlu0 %3719  ;;  %v3913_v38 = vld [vmem:[#allocation4 + $0xe0] sm:$0xff] }
 0x573   : > { %3744 = vst.msk [vmem:[#allocation4 + $0x110] sm:$0xf] %vm2812_vm8, %v3720_v12  ;;  %4121 = vmatprep.mubr.f32.mxu1 %v3913_v38  ;;  %v5812_v29 = vpop.f32.mrf.mxu0  ;;  %v4867_v12 = vld [vmem:[#allocation8 + $0x58] sm:$0xff]  ;;  %v4882_v38 = vld [vmem:[#allocation8 + $0xd0] sm:$0xff] }
 0x574   : > { %4122 = vmatmul.mubr.f32.gmra.mxu1 %v3912_v1  ;;  %5629 = vmatpush3.msra.mxu0 %v4867_v12 }
 0x575   : > { %v4223_v45 = vpop.f32.mrf.mxu0  ;;  %5630 = vmatprep.subr.mxu0 %v4882_v38  ;;  %5877 = vmatpush3.msra.mxu1 %v4867_v12 }
 0x576   : > { %v3462_v2 = vpop.permute.xlu0 %3461  ;;  %v3916_v5 = vld [vmem:[#allocation4 + $0xf8] sm:$0xff]  ;;  %5862 = vmatprep.subr.mxu1 %v4882_v38 }
 0x577   : > { %3491 = vst.msk [vmem:[#allocation4 + $0x120] sm:$0xff] %vm2541_vm14, %v3462_v2  ;;  %4126 = vmatprep.mubr.f32.mxu1 %v3916_v5 }
 0x578   : > { %3575 = vst.msk [vmem:[#allocation4 + $0x120] sm:$0xff] %vm2627_vm15, %v3546_v18  ;;  %4127 = vmatmul.mubr.f32.gmra.mxu1 %v3915_v3 }
 0x57a   : > { %v3464_v7 = vpop.permute.xlu0 %3463  ;;  %v3919_v8 = vld [vmem:[#allocation4 + $0x110] sm:$0xff] }
 0x57b   : > { %3492 = vst.msk [vmem:[#allocation4 + $0x138] sm:$0x3f] %vm2555_vm11, %v3464_v7  ;;  %4131 = vmatprep.mubr.f32.mxu1 %v3919_v8  ;;  %v4866_v8 = vld [vmem:[#allocation8 + $0x50] sm:$0xff] }
 0x57c   : > { %3576 = vst.msk [vmem:[#allocation4 + $0x138] sm:$0xf] %vm2641_vm12, %v3548_v24  ;;  %4132 = vmatmul.mubr.f32.gmra.mxu1 %v3918_v22  ;;  %v4865_v24 = vld [vmem:[#allocation8 + $0x48] sm:$0xff]  ;;  %5631 = vmatpush3.msra.mxu0 %v4866_v8  ;;  %v4880_v22 = vld [vmem:[#allocation8 + $0xc0] sm:$0xff] }
 0x57d   : > { %4136 = vmatprep.mubr.f32.mxu1 %v3922_v9  ;;  %v4881_v9 = vld [vmem:[#allocation8 + $0xc8] sm:$0xff]  ;;  %5878 = vmatpush3.msra.mxu1 %v4866_v8 }
 0x57e   : > { %5632 = vmatprep.subr.mxu0 %v4881_v9  ;;  %5863 = vmatprep.subr.mxu1 %v4881_v9 }
 0x57f   : > { %v3921_v11 = vld [vmem:[#allocation4 + $0x120] sm:$0xff]  ;;  %5633 = vmatpush3.msra.mxu0 %v4865_v24  ;;  %5879 = vmatpush3.msra.mxu1 %v4865_v24 }
 0x580   : > { %4137 = vmatmul.mubr.f32.gmra.mxu1 %v3921_v11  ;;  %v4864_v11 = vld [vmem:[#allocation8 + $0x40] sm:$0xff]  ;;  %5634 = vmatprep.subr.mxu0 %v4880_v22 }
 0x581   : > { %4141 = vmatprep.mubr.f32.mxu1 %v3925_v10  ;;  %5635 = vmatpush3.msra.mxu0 %v4864_v11 }
 0x582   : > { %5864 = vmatprep.subr.mxu1 %v4880_v22 }
 0x583   : > { %v3924_v30 = vld [vmem:[#allocation4 + $0x138] sm:$0xff]  ;;  %5880 = vmatpush3.msra.mxu1 %v4864_v11 }
 0x584   : > { %4142 = vmatmul.mubr.f32.gmra.mxu1 %v3924_v30  ;;  %v4879_v30 = vld [vmem:[#allocation8 + $0xb8] sm:$0xff] }
 0x585   : > { %5636 = vmatprep.subr.mxu0 %v4879_v30  ;;  %5865 = vmatprep.subr.mxu1 %v4879_v30 }
 0x587   : > { %v7918_v62 = vpop.f32.mrf.mxu0 }
 0x589   : > { %v4233_v18 = vpop.f32.mrf.mxu0 }
 0x5b0   : > { %v5560_v13 = vpop.f32.mrf.mxu1 }
 0x5b2   : > { %v5561_v41 = vpop.f32.mrf.mxu1 }
 0x5b3   : > { %v5562_v17 = vadd.f32 %v5561_v41, %v5560_v13  ;;  %v4863_v13 = vld [vmem:[#allocation8 + $0x38] sm:$0xff]  ;;  %v4878_v41 = vld [vmem:[#allocation8 + $0xb0] sm:$0xff] }
 0x5b4   : > { %5637 = vmatpush3.msra.mxu0 %v4863_v13  ;;  %5881 = vmatpush3.msra.mxu1 %v4863_v13 }
 0x5b5   : > { %v4079_v39 = vadd.f32 %v5562_v17, %v7901_v16  ;;  %5638 = vmatprep.subr.mxu0 %v4878_v41  ;;  %5866 = vmatprep.subr.mxu1 %v4878_v41 }
 0x5b7   : > { %v4214_v21 = vadd.f32 %v4213_v20, %v4079_v39  ;;  %v4862_v39 = vld [vmem:[#allocation8 + $0x30] sm:$0xff]  ;;  %v4877_v20 = vld [vmem:[#allocation8 + $0xa8] sm:$0xff] }
 0x5b8   : > { %5639 = vmatpush3.msra.mxu0 %v4862_v39  ;;  %5882 = vmatpush3.msra.mxu1 %v4862_v39 }
 0x5b9   : > { %v4282_v23 = vmax.f32 %v4214_v21, 0.0  ;;  %5640 = vmatprep.subr.mxu0 %v4877_v20  ;;  %5867 = vmatprep.subr.mxu1 %v4877_v20 }
 0x5bb   : > { %4296 = vst.msk [vmem:[#allocation7] sm:$0xff] %vm2382_vm13, %v4282_v23  ;;  %v4861_v23 = vld [vmem:[#allocation8 + $0x28] sm:$0xff] }
 0x5bc   : > { %v5563_v48 = vpop.f32.mrf.mxu1  ;;  %5641 = vmatpush3.msra.mxu0 %v4861_v23  ;;  %5883 = vmatpush3.msra.mxu1 %v4861_v23 }
 0x5be   : > { %v5564_v28 = vpop.f32.mrf.mxu1 }
 0x5bf   : > { %v5565_v33 = vadd.f32 %v5564_v28, %v5563_v48  ;;  %v4876_v28 = vld [vmem:[#allocation8 + $0xa0] sm:$0xff] }
 0x5c0   : > { %5642 = vmatprep.subr.mxu0 %v4876_v28  ;;  %5868 = vmatprep.subr.mxu1 %v4876_v28 }
 0x5c1   : > { %v4084_v35 = vadd.f32 %v5565_v33, %v7901_v16 }
 0x5c2   : > { %v4310_v36 = vld [vmem:[#allocation7] sm:$0xff] }
 0x5c3   : > { %v4219_v37 = vadd.f32 %v5809_v15, %v4084_v35  ;;  %4324 = vst.msk [vmem:[#allocation4] sm:$0xff] %vm2382_vm13, %v4310_v36 }
 0x5c5   : > { %v4283_v32 = vmax.f32 %v4219_v37, 0.0  ;;  %v4860_v37 = vld [vmem:[#allocation8 + $0x20] sm:$0xff] }
 0x5c6   : > { %5643 = vmatpush3.msra.mxu0 %v4860_v37  ;;  %5884 = vmatpush3.msra.mxu1 %v4860_v37 }
 0x5c7   : > { %4297 = vst.msk [vmem:[#allocation7 + $0x8] sm:$0xff] %vm2382_vm13, %v4283_v32  ;;  %v4875_v32 = vld [vmem:[#allocation8 + $0x98] sm:$0xff] }
 0x5c8   : > { %5644 = vmatprep.subr.mxu0 %v4875_v32  ;;  %5869 = vmatprep.subr.mxu1 %v4875_v32 }
 0x5ce   : > { %v4338_v42 = vld [vmem:[#allocation7 + $0x2] sm:$0xff] }
 0x5cf   : > { %v4311_v14 = vld [vmem:[#allocation7 + $0x8] sm:$0xff]  ;;  %4366 = vrot.lane.b32.xlu1 %v4338_v42, %s5971_s25 }
 0x5d0   : > { %4325 = vst.msk [vmem:[#allocation4 + $0x18] sm:$0xff] %vm2382_vm13, %v4311_v14  ;;  %v4422_v19 = vld [vmem:[#allocation7 + $0x4] sm:$0xff] }
 0x5d1   : > { %v4859_v14 = vld [vmem:[#allocation8 + $0x18] sm:$0xff] }
 0x5d2   : > { %5645 = vmatpush3.msra.mxu0 %v4859_v14  ;;  %5885 = vmatpush3.msra.mxu1 %v4859_v14 }
 0x5d3   : > { %4450 = vrot.lane.b32.xlu1 %v4422_v19, %s5972_s18 }
 0x5dc   : > { %v5566_v63 = vpop.f32.mrf.mxu1 }
 0x5de   : > { %v5567_v52 = vpop.f32.mrf.mxu1 }
 0x5df   : > { %v5568_v0 = vadd.f32 %v5567_v52, %v5566_v63  ;;  %v4874_v63 = vld [vmem:[#allocation8 + $0x90] sm:$0xff] }
 0x5e0   : > { %5646 = vmatprep.subr.mxu0 %v4874_v63  ;;  %5870 = vmatprep.subr.mxu1 %v4874_v63 }
 0x5e1   : > { %v4089_v44 = vadd.f32 %v5568_v0, %v7901_v16  ;;  %v4873_v0 = vld [vmem:[#allocation8 + $0x88] sm:$0xff] }
 0x5e3   : > { %v4224_v46 = vadd.f32 %v4223_v45, %v4089_v44  ;;  %v4857_v44 = vld [vmem:[#allocation8 + $0x8] sm:$0xff]  ;;  %v5818_v45 = vpop.f32.mrf.mxu0 }
 0x5e5   : > { %v4284_v47 = vmax.f32 %v4224_v46, 0.0 }
 0x5e7   : > { %4298 = vst.msk [vmem:[#allocation7 + $0x10] sm:$0xff] %vm2382_vm13, %v4284_v47  ;;  %v4872_v47 = vld [vmem:[#allocation8 + $0x80] sm:$0xff] }
 0x5e8   : > { %v5569_v40 = vpop.f32.mrf.mxu1 }
 0x5ea   : > { %v5570_v49 = vpop.f32.mrf.mxu1 }
 0x5eb   : > { %v5571_v4 = vadd.f32 %v5570_v49, %v5569_v40  ;;  %v4856_v49 = vld [vmem:[#allocation8] sm:$0xff] }
 0x5ed   : > { %v4094_v43 = vadd.f32 %v5571_v4, %v7901_v16 }
 0x5ee   : > { %v4506_v50 = vld [vmem:[#allocation7 + $0x10] sm:$0xff] }
 0x5ef   : > { %v4229_v25 = vadd.f32 %v5812_v29, %v4094_v43  ;;  %4530 = vrot.lane.b32.xlu1 %v4506_v50, %s5973_s19  ;;  %4326 = vst.msk [vmem:[#allocation4 + $0x30] sm:$0xff] %vm2382_vm13, %v4506_v50  ;;  %v4339_v53 = vld [vmem:[#allocation7 + $0xa] sm:$0xff]  ;;  %v4858_v29 = vld [vmem:[#allocation8 + $0x10] sm:$0xff]  ;;  %v4243_v43 = vpop.f32.mrf.mxu0 }
 0x5f0   : > { %v4423_v59 = vld [vmem:[#allocation7 + $0xc] sm:$0xff]  ;;  %5647 = vmatpush3.msra.mxu0 %v4858_v29  ;;  %5886 = vmatpush3.msra.mxu1 %v4858_v29 }
 0x5f1   : > { %v4285_v31 = vmax.f32 %v4229_v25, 0.0  ;;  %5648 = vmatprep.subr.mxu0 %v4873_v0  ;;  %5871 = vmatprep.subr.mxu1 %v4873_v0  ;;  %v5821_v54 = vpop.f32.mrf.mxu0 }
 0x5f2   : > { %5649 = vmatpush3.msra.mxu0 %v4857_v44  ;;  %5887 = vmatpush3.msra.mxu1 %v4857_v44 }
 0x5f3   : > { %4299 = vst.msk [vmem:[#allocation7 + $0x18] sm:$0xff] %vm2382_vm13, %v4285_v31  ;;  %4368 = vrot.lane.b32.xlu1 %v4339_v53, %s5971_s25  ;;  %5650 = vmatprep.subr.mxu0 %v4872_v47 }
 0x5f4   : > { %v5572_v58 = vpop.f32.mrf.mxu1  ;;  %5651 = vmatpush3.msra.mxu0 %v4856_v49  ;;  %5872 = vmatprep.subr.mxu1 %v4872_v47 }
 0x5f5   : > { %5888 = vmatpush3.msra.mxu1 %v4856_v49 }
 0x5f6   : > { %v5573_v57 = vpop.f32.mrf.mxu1 }
 0x5f7   : > { %v5574_v61 = vadd.f32 %v5573_v57, %v5572_v58  ;;  %4452 = vrot.lane.b32.xlu1 %v4423_v59, %s5972_s18 }
 0x5f9   : > { %v4099_v1 = vadd.f32 %v5574_v61, %v7901_v16 }
 0x5fa   : > { %v4602_v2 = vld [vmem:[#allocation7 + $0x14] sm:$0xff] }
 0x5fb   : > { %v4507_v5 = vld [vmem:[#allocation7 + $0x18] sm:$0xff]  ;;  %v4234_v7 = vadd.f32 %v4233_v18, %v4099_v1  ;;  %4626 = vrot.lane.b32.xlu0 %v4602_v2, %s5971_s25 }
 0x5fc   : > { %v4340_v3 = vld [vmem:[#allocation7 + $0x12] sm:$0xff]  ;;  %4532 = vrot.lane.b32.xlu1 %v4507_v5, %s5973_s19  ;;  %4327 = vst.msk [vmem:[#allocation4 + $0x48] sm:$0xff] %vm2382_vm13, %v4507_v5 }
 0x5fd   : > { %4590 = vst.msk [vmem:[#allocation4 + $0x8] sm:$0xff] %vm2382_vm13, %v4340_v3  ;;  %v4286_v10 = vmax.f32 %v4234_v7, 0.0 }
 0x5ff   : > { %4300 = vst.msk [vmem:[#allocation7 + $0x20] sm:$0xff] %vm2382_vm13, %v4286_v10 }
 0x600   : > { %4370 = vrot.lane.b32.xlu1 %v4340_v3, %s5971_s25  ;;  %v5575_v15 = vpop.f32.mrf.mxu1 }
 0x602   : > { %v5576_v17 = vpop.f32.mrf.mxu1 }
 0x603   : > { %v5577_v21 = vadd.f32 %v5576_v17, %v5575_v15 }
 0x604   : > { %4454 = vrot.lane.b32.xlu1 %v4602_v2, %s5972_s18  ;;  %v4253_v2 = vpop.f32.mrf.mxu0 }
 0x605   : > { %v4104_v48 = vadd.f32 %v5577_v21, %v7901_v16 }
 0x606   : > { %v4674_v33 = vld [vmem:[#allocation7 + $0x20] sm:$0xff]  ;;  %v5824_v22 = vpop.f32.mrf.mxu0 }
 0x607   : > { %v4341_v35 = vld [vmem:[#allocation7 + $0x1a] sm:$0xff]  ;;  %v4239_v36 = vadd.f32 %v7918_v62, %v4104_v48  ;;  %4694 = vrot.lane.b32.xlu0 %v4674_v33, %s5972_s18  ;;  %4328 = vst.msk [vmem:[#allocation4 + $0x60] sm:$0xff] %vm2382_vm13, %v4674_v33 }
 0x608   : > { %4534 = vrot.lane.b32.xlu1 %v4674_v33, %s5973_s19  ;;  %4591 = vst.msk [vmem:[#allocation4 + $0x20] sm:$0xff] %vm2382_vm13, %v4341_v35  ;;  %v4603_v19 = vld [vmem:[#allocation7 + $0x1c] sm:$0xff]  ;;  %v4263_v41 = vpop.f32.mrf.mxu0 }
 0x609   : > { %v4287_v42 = vmax.f32 %v4239_v36, 0.0 }
 0x60b   : > { %4301 = vst.msk [vmem:[#allocation7 + $0x28] sm:$0xff] %vm2382_vm13, %v4287_v42  ;;  %4628 = vrot.lane.b32.xlu0 %v4603_v19, %s5971_s25 }
 0x60c   : > { %4372 = vrot.lane.b32.xlu1 %v4341_v35, %s5971_s25  ;;  %v5578_v52 = vpop.f32.mrf.mxu1  ;;  %v5827_v35 = vpop.f32.mrf.mxu0 }
 0x60e   : > { %v5579_v46 = vpop.f32.mrf.mxu1  ;;  %v4273_v29 = vpop.f32.mrf.mxu0 }
 0x60f   : > { %v5580_v40 = vadd.f32 %v5579_v46, %v5578_v52 }
 0x610   : > { %4456 = vrot.lane.b32.xlu1 %v4603_v19, %s5972_s18 }
 0x611   : > { %v4109_v4 = vadd.f32 %v5580_v40, %v7901_v16 }
 0x612   : > { %v4794_v50 = vld [vmem:[#allocation7 + $0x24] sm:$0xff] }
 0x613   : > { %v4734_v25 = vld [vmem:[#allocation7 + $0x22] sm:$0xff]  ;;  %4804 = vst.msk [vmem:[#allocation4 + $0x10] sm:$0xff] %vm2382_vm13, %v4794_v50  ;;  %v4244_v51 = vadd.f32 %v4243_v43, %v4109_v4 }
 0x614   : > { %v4509_v34 = vld [vmem:[#allocation7 + $0x28] sm:$0xff]  ;;  %4754 = vrot.lane.b32.xlu0 %v4734_v25, %s5973_s19  ;;  %4592 = vst.msk [vmem:[#allocation4 + $0x38] sm:$0xff] %vm2382_vm13, %v4734_v25 }
 0x615   : > { %4536 = vrot.lane.b32.xlu1 %v4509_v34, %s5973_s19  ;;  %4329 = vst.msk [vmem:[#allocation4 + $0x78] sm:$0xff] %vm2382_vm13, %v4509_v34  ;;  %v4288_v27 = vmax.f32 %v4244_v51, 0.0 }
 0x617   : > { %4302 = vst.msk [vmem:[#allocation7 + $0x30] sm:$0xff] %vm2382_vm13, %v4288_v27 }
 0x618   : > { %4696 = vrot.lane.b32.xlu0 %v4509_v34, %s5972_s18 }
 0x619   : > { %4374 = vrot.lane.b32.xlu1 %v4734_v25, %s5971_s25 }
 0x61c   : > { %4630 = vrot.lane.b32.xlu0 %v4794_v50, %s5971_s25  ;;  %v5581_v31 = vpop.f32.mrf.mxu1 }
 0x61e   : > { %v4795_v53 = vld [vmem:[#allocation7 + $0x2c] sm:$0xff]  ;;  %v5582_v6 = vpop.f32.mrf.mxu1 }
 0x61f   : > { %v4510_v26 = vld [vmem:[#allocation7 + $0x30] sm:$0xff]  ;;  %4805 = vst.msk [vmem:[#allocation4 + $0x28] sm:$0xff] %vm2382_vm13, %v4795_v53  ;;  %v5583_v56 = vadd.f32 %v5582_v6, %v5581_v31 }
 0x620   : > { %v4735_v55 = vld [vmem:[#allocation7 + $0x2a] sm:$0xff]  ;;  %4458 = vrot.lane.b32.xlu0 %v4794_v50, %s5972_s18  ;;  %4538 = vrot.lane.b32.xlu1 %v4510_v26, %s5973_s19  ;;  %4330 = vst.msk [vmem:[#allocation4 + $0x90] sm:$0xff] %vm2382_vm13, %v4510_v26 }
 0x621   : > { %4593 = vst.msk [vmem:[#allocation4 + $0x50] sm:$0xff] %vm2382_vm13, %v4735_v55  ;;  %v4114_v58 = vadd.f32 %v5583_v56, %v7901_v16 }
 0x623   : > { %v4249_v62 = vadd.f32 %v5818_v45, %v4114_v58 }
 0x624   : > { %4756 = vrot.lane.b32.xlu0 %v4735_v55, %s5973_s19  ;;  %4376 = vrot.lane.b32.xlu1 %v4735_v55, %s5971_s25 }
 0x625   : > { %v4289_v57 = vmax.f32 %v4249_v62, 0.0 }
 0x627   : > { %4303 = vst.msk [vmem:[#allocation7 + $0x38] sm:$0xff] %vm2382_vm13, %v4289_v57 }
 0x628   : > { %4698 = vrot.lane.b32.xlu0 %v4510_v26, %s5972_s18 }
 0x62c   : > { %4632 = vrot.lane.b32.xlu0 %v4795_v53, %s5971_s25  ;;  %v5584_v59 = vpop.f32.mrf.mxu1 }
 0x62e   : > { %v4796_v60 = vld [vmem:[#allocation7 + $0x34] sm:$0xff]  ;;  %v5585_v61 = vpop.f32.mrf.mxu1 }
 0x62f   : > { %v4511_v12 = vld [vmem:[#allocation7 + $0x38] sm:$0xff]  ;;  %4806 = vst.msk [vmem:[#allocation4 + $0x40] sm:$0xff] %vm2382_vm13, %v4796_v60  ;;  %v5586_v1 = vadd.f32 %v5585_v61, %v5584_v59 }
 0x630   : > { %v4736_v38 = vld [vmem:[#allocation7 + $0x32] sm:$0xff]  ;;  %4460 = vrot.lane.b32.xlu0 %v4795_v53, %s5972_s18  ;;  %4540 = vrot.lane.b32.xlu1 %v4511_v12, %s5973_s19  ;;  %4331 = vst.msk [vmem:[#allocation4 + $0xa8] sm:$0xff] %vm2382_vm13, %v4511_v12 }
 0x631   : > { %4594 = vst.msk [vmem:[#allocation4 + $0x68] sm:$0xff] %vm2382_vm13, %v4736_v38  ;;  %v4119_v18 = vadd.f32 %v5586_v1, %v7901_v16 }
 0x633   : > { %v4254_v5 = vadd.f32 %v4253_v2, %v4119_v18  ;;  %v4851_v18 = vld [vmem:[#allocation4 + $0x128] sm:$0xff] }
 0x634   : > { %4758 = vrot.lane.b32.xlu0 %v4736_v38, %s5973_s19  ;;  %4378 = vrot.lane.b32.xlu1 %v4736_v38, %s5971_s25  ;;  %v5587_v3 = vpop.f32.mrf.mxu1 }
 0x635   : > { %v4290_v7 = vmax.f32 %v4254_v5, 0.0  ;;  %5065 = vmatprep.mubr.f32.mxu1 %v4851_v18 }
 0x636   : > { %v5588_v8 = vpop.f32.mrf.mxu1 }
 0x637   : > { %4304 = vst.msk [vmem:[#allocation7 + $0x40] sm:$0xff] %vm2382_vm13, %v4290_v7  ;;  %v5589_v9 = vadd.f32 %v5588_v8, %v5587_v3  ;;  %v8055_v7 = vld [vmem:[#allocation8 + $0x118] sm:$0xff] }
 0x638   : > { %4700 = vrot.lane.b32.xlu0 %v4511_v12, %s5972_s18  ;;  %4462 = vrot.lane.b32.xlu1 %v4796_v60, %s5972_s18  ;;  %v5590_v24 = vpop.f32.mrf.mxu1 }
 0x639   : > { %v4124_v10 = vadd.f32 %v5589_v9, %v7901_v16  ;;  %5828 = vmatprep.subr.mxu1 %v8055_v7 }
 0x63a   : > { %v5591_v11 = vpop.f32.mrf.mxu1 }
 0x63b   : > { %v4259_v30 = vadd.f32 %v5821_v54, %v4124_v10  ;;  %v5592_v13 = vadd.f32 %v5591_v11, %v5590_v24 }
 0x63c   : > { %4634 = vrot.lane.b32.xlu0 %v4796_v60, %s5971_s25  ;;  %v5593_v15 = vpop.f32.mrf.mxu1 }
 0x63d   : > { %v4291_v17 = vmax.f32 %v4259_v30, 0.0  ;;  %v4129_v39 = vadd.f32 %v5592_v13, %v7901_v16 }
 0x63e   : > { %v4797_v20 = vld [vmem:[#allocation7 + $0x3c] sm:$0xff]  ;;  %v5594_v21 = vpop.f32.mrf.mxu1 }
 0x63f   : > { %v4737_v23 = vld [vmem:[#allocation7 + $0x3a] sm:$0xff]  ;;  %4807 = vst.msk [vmem:[#allocation4 + $0x58] sm:$0xff] %vm2382_vm13, %v4797_v20  ;;  %4305 = vst.msk [vmem:[#allocation7 + $0x48] sm:$0xff] %vm2382_vm13, %v4291_v17  ;;  %v5595_v28 = vadd.f32 %v5594_v21, %v5593_v15  ;;  %v4264_v33 = vadd.f32 %v4263_v41, %v4129_v39 }
 0x640   : > { %v4512_v48 = vld [vmem:[#allocation7 + $0x40] sm:$0xff]  ;;  %4760 = vrot.lane.b32.xlu0 %v4737_v23, %s5973_s19  ;;  %4595 = vst.msk [vmem:[#allocation4 + $0x80] sm:$0xff] %vm2382_vm13, %v4737_v23  ;;  %v5596_v36 = vpop.f32.mrf.mxu1 }
 0x641   : > { %4542 = vrot.lane.b32.xlu1 %v4512_v48, %s5973_s19  ;;  %4332 = vst.msk [vmem:[#allocation4 + $0xc0] sm:$0xff] %vm2382_vm13, %v4512_v48  ;;  %v4367_v37 = vpop.permute.xlu1 %4366  ;;  %v4134_v32 = vadd.f32 %v5595_v28, %v7901_v16  ;;  %v4292_v42 = vmax.f32 %v4264_v33, 0.0 }
 0x642   : > { %4408 = vst.msk [vmem:[#allocation4] sm:$0xff] %vm2541_vm14, %v4367_v37  ;;  %v5597_v14 = vpop.f32.mrf.mxu1 }
 0x643   : > { %v4269_v19 = vadd.f32 %v5824_v22, %v4134_v32  ;;  %4306 = vst.msk [vmem:[#allocation7 + $0x50] sm:$0xff] %vm2382_vm13, %v4292_v42  ;;  %v5598_v63 = vadd.f32 %v5597_v14, %v5596_v36 }
 0x644   : > { %4702 = vrot.lane.b32.xlu0 %v4512_v48, %s5972_s18  ;;  %v5599_v52 = vpop.f32.mrf.mxu1 }
 0x645   : > { %4380 = vrot.lane.b32.xlu1 %v4737_v23, %s5971_s25  ;;  %v4451_v0 = vpop.permute.xlu1 %4450  ;;  %v4293_v44 = vmax.f32 %v4269_v19, 0.0  ;;  %v4139_v45 = vadd.f32 %v5598_v63, %v7901_v16 }
 0x646   : > { %4492 = vst.msk [vmem:[#allocation4] sm:$0xff] %vm2627_vm15, %v4451_v0  ;;  %v4798_v46 = vld [vmem:[#allocation7 + $0x44] sm:$0xff]  ;;  %v5600_v47 = vpop.f32.mrf.mxu1 }
 0x647   : > { %v4679_v40 = vld [vmem:[#allocation7 + $0x48] sm:$0xff]  ;;  %4808 = vst.msk [vmem:[#allocation4 + $0x70] sm:$0xff] %vm2382_vm13, %v4798_v46  ;;  %4307 = vst.msk [vmem:[#allocation7 + $0x58] sm:$0xff] %vm2382_vm13, %v4293_v44  ;;  %v5601_v4 = vadd.f32 %v5600_v47, %v5599_v52  ;;  %v4274_v43 = vadd.f32 %v4273_v29, %v4139_v45 }
 0x648   : > { %v4738_v49 = vld [vmem:[#allocation7 + $0x42] sm:$0xff]  ;;  %4636 = vrot.lane.b32.xlu0 %v4797_v20, %s5971_s25  ;;  %4333 = vst.msk [vmem:[#allocation4 + $0xd8] sm:$0xff] %vm2382_vm13, %v4679_v40 }
 0x649   : > { %4464 = vrot.lane.b32.xlu1 %v4797_v20, %s5972_s18  ;;  %4596 = vst.msk [vmem:[#allocation4 + $0x98] sm:$0xff] %vm2382_vm13, %v4738_v49  ;;  %v4144_v50 = vadd.f32 %v5601_v4, %v7901_v16  ;;  %v4294_v25 = vmax.f32 %v4274_v43, 0.0 }
 0x64a   : > { %v7994_v34 = vld [vmem:[#allocation7 + $0x4c] sm:$0xff] }
 0x64b   : > { %v4680_v51 = vld [vmem:[#allocation7 + $0x50] sm:$0xff]  ;;  %4809 = vst.msk [vmem:[#allocation4 + $0x88] sm:$0xff] %vm2382_vm13, %v7994_v34  ;;  %v4279_v31 = vadd.f32 %v5827_v35, %v4144_v50  ;;  %4308 = vst.msk [vmem:[#allocation7 + $0x60] sm:$0xff] %vm2382_vm13, %v4294_v25 }
 0x64c   : > { %v4739_v27 = vld [vmem:[#allocation7 + $0x4a] sm:$0xff]  ;;  %4704 = vrot.lane.b32.xlu0 %v4679_v40, %s5972_s18  ;;  %4334 = vst.msk [vmem:[#allocation4 + $0xf0] sm:$0xff] %vm2382_vm13, %v4680_v51 }
 0x64d   : > { %4762 = vrot.lane.b32.xlu1 %v4738_v49, %s5973_s19  ;;  %4597 = vst.msk [vmem:[#allocation4 + $0xb0] sm:$0xff] %vm2382_vm13, %v4739_v27  ;;  %v4295_v16 = vmax.f32 %v4279_v31, 0.0 }
 0x64e   : > { %v4800_v53 = vld [vmem:[#allocation7 + $0x54] sm:$0xff] }
 0x64f   : > { %v4740_v6 = vld [vmem:[#allocation7 + $0x52] sm:$0xff]  ;;  %4810 = vst.msk [vmem:[#allocation4 + $0xa0] sm:$0xff] %vm2382_vm13, %v4800_v53  ;;  %4309 = vst.msk [vmem:[#allocation7 + $0x68] sm:$0xff] %vm2382_vm13, %v4295_v16 }
 0x650   : > { %v4681_v26 = vld [vmem:[#allocation7 + $0x58] sm:$0xff]  ;;  %4638 = vrot.lane.b32.xlu0 %v4798_v46, %s5971_s25  ;;  %4598 = vst.msk [vmem:[#allocation4 + $0xc8] sm:$0xff] %vm2382_vm13, %v4740_v6 }
 0x651   : > { %4544 = vrot.lane.b32.xlu1 %v4679_v40, %s5973_s19  ;;  %4335 = vst.msk [vmem:[#allocation4 + $0x108] sm:$0xff] %vm2382_vm13, %v4681_v26 }
 0x652   : > { %v8009_v55 = vld [vmem:[#allocation7 + $0x5c] sm:$0xff] }
 0x653   : > { %v8011_v56 = vld [vmem:[#allocation7 + $0x5a] sm:$0xff]  ;;  %4811 = vst.msk [vmem:[#allocation4 + $0xb8] sm:$0xff] %vm2382_vm13, %v8009_v55 }
 0x654   : > { %v4682_v58 = vld [vmem:[#allocation7 + $0x60] sm:$0xff]  ;;  %4706 = vrot.lane.b32.xlu0 %v4680_v51, %s5972_s18  ;;  %4599 = vst.msk [vmem:[#allocation4 + $0xe0] sm:$0xff] %vm2382_vm13, %v8011_v56 }
 0x655   : > { %4382 = vrot.lane.b32.xlu1 %v4738_v49, %s5971_s25  ;;  %4336 = vst.msk [vmem:[#allocation4 + $0x120] sm:$0xff] %vm2382_vm13, %v4682_v58 }
 0x656   : > { %v4803_v62 = vld [vmem:[#allocation7 + $0x6c] sm:$0xf]  ;;  %v8020_v57 = vld [vmem:[#allocation7 + $0x64] sm:$0xff] }
 0x657   : > { %v4350_v59 = vld [vmem:[#allocation7 + $0x62] sm:$0xff]  ;;  %4813 = vst.msk [vmem:[#allocation4 + $0xe8] sm:$0xf] %vm2954_vm5, %v4803_v62  ;;  %v4589_v60 = vld [vmem:[#allocation7 + $0x6a] sm:$0x3f] }
 0x658   : > { %4812 = vst.msk [vmem:[#allocation4 + $0xd0] sm:$0xff] %vm2382_vm13, %v8020_v57  ;;  %4640 = vrot.lane.b32.xlu0 %v7994_v34, %s5971_s25  ;;  %v4517_v54 = vld [vmem:[#allocation7 + $0x68] sm:$0xff]  ;;  %4600 = vst.msk [vmem:[#allocation4 + $0xf8] sm:$0xff] %vm2382_vm13, %v4350_v59 }
 0x659   : > { %4466 = vrot.lane.b32.xlu1 %v4798_v46, %s5972_s18  ;;  %4337 = vst.msk [vmem:[#allocation4 + $0x138] sm:$0xff] %vm2382_vm13, %v4517_v54  ;;  %v4351_v38 = vld [vmem:[#allocation7 + $0x6a] sm:$0x3f] }
 0x65a   : > { %4601 = vst.msk [vmem:[#allocation4 + $0x110] sm:$0x3f] %vm2739_vm6, %v4589_v60  ;;  %v4435_v22 = vld [vmem:[#allocation7 + $0x6c] sm:$0xf] }
 0x65b   : > { %v4743_v39 = vld [vmem:[#allocation7 + $0x6a] sm:$0x3f] }
 0x65c   : > { %4766 = vrot.lane.b32.xlu0 %v4740_v6, %s5973_s19  ;;  %v4613_v33 = vld [vmem:[#allocation7 + $0x6c] sm:$0xf] }
 0x65d   : > { %4764 = vrot.lane.b32.xlu1 %v4739_v27, %s5973_s19 }
 0x660   : > { %4708 = vrot.lane.b32.xlu0 %v4681_v26, %s5972_s18 }
 0x661   : > { %4546 = vrot.lane.b32.xlu1 %v4680_v51, %s5973_s19  ;;  %v4531_v61 = vpop.permute.xlu1 %4530 }
 0x662   : > { %4566 = vst.msk [vmem:[#allocation4] sm:$0xff] %vm2703_vm0, %v4531_v61 }
 0x664   : > { %4642 = vrot.lane.b32.xlu0 %v4800_v53, %s5971_s25 }
 0x665   : > { %4390 = vrot.lane.b32.xlu1 %v4350_v59, %s5971_s25  ;;  %v4369_v12 = vpop.permute.xlu1 %4368 }
 0x666   : > { %4409 = vst.msk [vmem:[#allocation4 + $0x18] sm:$0xff] %vm2541_vm14, %v4369_v12 }
 0x668   : > { %4768 = vrot.lane.b32.xlu0 %v8011_v56, %s5973_s19 }
 0x669   : > { %4392 = vrot.lane.b32.xlu1 %v4351_v38, %s5971_s25  ;;  %v4453_v1 = vpop.permute.xlu1 %4452  ;;  %v4814_v23 = vld [vmem:[#allocation4] sm:$0xff] }
 0x66a   : > { %4493 = vst.msk [vmem:[#allocation4 + $0x18] sm:$0xff] %vm2627_vm15, %v4453_v1 }
 0x66c   : > { %4710 = vrot.lane.b32.xlu0 %v4682_v58, %s5972_s18 }
 0x66d   : > { %4384 = vrot.lane.b32.xlu1 %v4739_v27, %s5971_s25  ;;  %v4627_v2 = vpop.permute.xlu0 %4626 }
 0x66e   : > { %v4533_v5 = vpop.permute.xlu1 %4532  ;;  %4662 = vst.msk [vmem:[#allocation4 + $0x8] sm:$0xff] %vm2541_vm14, %v4627_v2 }
 0x66f   : > { %4567 = vst.msk [vmem:[#allocation4 + $0x18] sm:$0xff] %vm2703_vm0, %v4533_v5 }
 0x670   : > { %4644 = vrot.lane.b32.xlu0 %v8009_v55, %s5971_s25 }
 0x671   : > { %4468 = vrot.lane.b32.xlu1 %v7994_v34, %s5972_s18 }
 0x672   : > { %v4371_v3 = vpop.permute.xlu1 %4370 }
 0x673   : > { %4410 = vst.msk [vmem:[#allocation4 + $0x30] sm:$0xff] %vm2541_vm14, %v4371_v3 }
 0x674   : > { %4474 = vrot.lane.b32.xlu0 %v8020_v57, %s5972_s18 }
 0x675   : > { %4548 = vrot.lane.b32.xlu1 %v4681_v26, %s5973_s19 }
 0x676   : > { %v4455_v8 = vpop.permute.xlu1 %4454  ;;  %v4817_v14 = vld [vmem:[#allocation4 + $0x18] sm:$0xff] }
 0x677   : > { %4494 = vst.msk [vmem:[#allocation4 + $0x30] sm:$0xff] %vm2627_vm15, %v4455_v8 }
 0x678   : > { %4386 = vrot.lane.b32.xlu0 %v4740_v6, %s5971_s25 }
 0x679   : > { %4470 = vrot.lane.b32.xlu1 %v4800_v53, %s5972_s18  ;;  %v4695_v9 = vpop.permute.xlu0 %4694 }
 0x67a   : > { %v4535_v24 = vpop.permute.xlu1 %4534  ;;  %4724 = vst.msk [vmem:[#allocation4 + $0x8] sm:$0xff] %vm2627_vm15, %v4695_v9 }
 0x67b   : > { %4568 = vst.msk [vmem:[#allocation4 + $0x30] sm:$0xff] %vm2703_vm0, %v4535_v24 }
 0x67c   : > { %4476 = vrot.lane.b32.xlu0 %v4435_v22, %s5972_s18 }
 0x67d   : > { %4550 = vrot.lane.b32.xlu1 %v4682_v58, %s5973_s19  ;;  %v4629_v10 = vpop.permute.xlu0 %4628 }
 0x67e   : > { %v4373_v11 = vpop.permute.xlu1 %4372  ;;  %4663 = vst.msk [vmem:[#allocation4 + $0x20] sm:$0xff] %vm2541_vm14, %v4629_v10 }
 0x67f   : > { %4411 = vst.msk [vmem:[#allocation4 + $0x48] sm:$0xff] %vm2541_vm14, %v4373_v11 }
 0x680   : > { %4388 = vrot.lane.b32.xlu0 %v8011_v56, %s5971_s25 }
 0x681   : > { %4472 = vrot.lane.b32.xlu1 %v8009_v55, %s5972_s18 }
 0x682   : > { %v4457_v30 = vpop.permute.xlu1 %4456  ;;  %v4820_v47 = vld [vmem:[#allocation4 + $0x30] sm:$0xff] }
 0x683   : > { %4495 = vst.msk [vmem:[#allocation4 + $0x48] sm:$0xff] %vm2627_vm15, %v4457_v30 }
 0x684   : > { %4770 = vrot.lane.b32.xlu0 %v4350_v59, %s5973_s19 }
 0x685   : > { %4552 = vrot.lane.b32.xlu1 %v4517_v54, %s5973_s19 }
 0x686   : > { %v4755_v13 = vpop.permute.xlu0 %4754 }
 0x687   : > { %v4537_v15 = vpop.permute.xlu1 %4536  ;;  %4784 = vst.msk [vmem:[#allocation4 + $0x8] sm:$0xff] %vm2703_vm0, %v4755_v13 }
 0x688   : > { %4569 = vst.msk [vmem:[#allocation4 + $0x48] sm:$0xff] %vm2703_vm0, %v4537_v15  ;;  %4712 = vrot.lane.b32.xlu0 %v4517_v54, %s5972_s18 }
 0x68a   : > { %v4697_v41 = vpop.permute.xlu0 %4696 }
 0x68b   : > { %v4375_v17 = vpop.permute.xlu1 %4374  ;;  %4725 = vst.msk [vmem:[#allocation4 + $0x20] sm:$0xff] %vm2627_vm15, %v4697_v41 }
 0x68c   : > { %4412 = vst.msk [vmem:[#allocation4 + $0x60] sm:$0xff] %vm2541_vm14, %v4375_v17  ;;  %4772 = vrot.lane.b32.xlu0 %v4743_v39, %s5973_s19  ;;  %v4854_v17 = vld [vmem:[#allocation4 + $0x140] sm:$0xff] }
 0x68e   : > { %v4631_v20 = vpop.permute.xlu0 %4630  ;;  %v4815_v21 = vld [vmem:[#allocation4 + $0x8] sm:$0xff] }
 0x68f   : > { %4664 = vst.msk [vmem:[#allocation4 + $0x38] sm:$0xff] %vm2541_vm14, %v4631_v20  ;;  %5005 = vmatprep.mubr.f32.mxu0 %v4815_v21  ;;  %v4823_v51 = vld [vmem:[#allocation4 + $0x48] sm:$0xff] }
 0x690   : > { %4646 = vrot.lane.b32.xlu0 %v8020_v57, %s5971_s25  ;;  %5006 = vmatmul.mubr.f32.vlgmr.msra.gmra.mxu0 %v4814_v23  ;;  %v4890_v23 = vld [vmem:[#allocation8 + $0x110] sm:$0xff] }
 0x692   : > { %v4459_v48 = vpop.permute.xlu0 %4458  ;;  %v4539_v28 = vpop.permute.xlu1 %4538 }
 0x693   : > { %4496 = vst.msk [vmem:[#allocation4 + $0x60] sm:$0xff] %vm2627_vm15, %v4459_v48  ;;  %v4889_v48 = vld [vmem:[#allocation8 + $0x108] sm:$0xff] }
 0x694   : > { %4570 = vst.msk [vmem:[#allocation4 + $0x60] sm:$0xff] %vm2703_vm0, %v4539_v28  ;;  %4648 = vrot.lane.b32.xlu0 %v4613_v33, %s5971_s25 }
 0x696   : > { %v4757_v35 = vpop.permute.xlu0 %4756  ;;  %v4377_v36 = vpop.permute.xlu1 %4376 }
 0x697   : > { %4785 = vst.msk [vmem:[#allocation4 + $0x20] sm:$0xff] %vm2703_vm0, %v4757_v35  ;;  %v4888_v35 = vld [vmem:[#allocation8 + $0x100] sm:$0xff] }
 0x698   : > { %4413 = vst.msk [vmem:[#allocation4 + $0x78] sm:$0xff] %vm2541_vm14, %v4377_v36 }
 0x69a   : > { %v4699_v37 = vpop.permute.xlu0 %4698 }
 0x69b   : > { %4726 = vst.msk [vmem:[#allocation4 + $0x38] sm:$0xff] %vm2627_vm15, %v4699_v37  ;;  %v4826_v56 = vld [vmem:[#allocation4 + $0x60] sm:$0xff] }
 0x69e   : > { %v4633_v32 = vpop.permute.xlu0 %4632  ;;  %v4818_v42 = vld [vmem:[#allocation4 + $0x20] sm:$0xff] }
 0x69f   : > { %4665 = vst.msk [vmem:[#allocation4 + $0x50] sm:$0xff] %vm2541_vm14, %v4633_v32  ;;  %5010 = vmatprep.mubr.f32.mxu0 %v4818_v42 }
 0x6a0   : > { %5011 = vmatmul.mubr.f32.gmra.mxu0 %v4817_v14  ;;  %v4819_v14 = vld [vmem:[#allocation4 + $0x28] sm:$0xff] }
 0x6a2   : > { %v4461_v19 = vpop.permute.xlu0 %4460  ;;  %v4541_v63 = vpop.permute.xlu1 %4540 }
 0x6a3   : > { %4497 = vst.msk [vmem:[#allocation4 + $0x78] sm:$0xff] %vm2627_vm15, %v4461_v19  ;;  %v4822_v19 = vld [vmem:[#allocation4 + $0x40] sm:$0xff] }
 0x6a4   : > { %4571 = vst.msk [vmem:[#allocation4 + $0x78] sm:$0xff] %vm2703_vm0, %v4541_v63 }
 0x6a6   : > { %v4759_v29 = vpop.permute.xlu0 %4758  ;;  %v4379_v52 = vpop.permute.xlu1 %4378 }
 0x6a7   : > { %4786 = vst.msk [vmem:[#allocation4 + $0x38] sm:$0xff] %vm2703_vm0, %v4759_v29 }
 0x6a8   : > { %4414 = vst.msk [vmem:[#allocation4 + $0x90] sm:$0xff] %vm2541_vm14, %v4379_v52  ;;  %v4825_v52 = vld [vmem:[#allocation4 + $0x58] sm:$0xff] }
 0x6aa   : > { %v4701_v0 = vpop.permute.xlu0 %4700  ;;  %v4463_v44 = vpop.permute.xlu1 %4462 }
 0x6ab   : > { %4727 = vst.msk [vmem:[#allocation4 + $0x50] sm:$0xff] %vm2627_vm15, %v4701_v0  ;;  %4498 = vst.msk [vmem:[#allocation4 + $0x90] sm:$0xff] %vm2627_vm15, %v4463_v44  ;;  %v4829_v1 = vld [vmem:[#allocation4 + $0x78] sm:$0xff]  ;;  %v4828_v44 = vld [vmem:[#allocation4 + $0x70] sm:$0xff] }
 0x6ae   : > { %v4635_v45 = vpop.permute.xlu0 %4634  ;;  %v4821_v46 = vld [vmem:[#allocation4 + $0x38] sm:$0xff] }
 0x6af   : > { %4666 = vst.msk [vmem:[#allocation4 + $0x68] sm:$0xff] %vm2541_vm14, %v4635_v45  ;;  %5015 = vmatprep.mubr.f32.mxu0 %v4821_v46  ;;  %v4831_v46 = vld [vmem:[#allocation4 + $0x88] sm:$0xff] }
 0x6b0   : > { %5016 = vmatmul.mubr.f32.gmra.mxu0 %v4820_v47  ;;  %v4834_v47 = vld [vmem:[#allocation4 + $0xa0] sm:$0xff] }
 0x6b2   : > { %v4761_v40 = vpop.permute.xlu0 %4760 }
 0x6b3   : > { %v4543_v49 = vpop.permute.xlu1 %4542  ;;  %4787 = vst.msk [vmem:[#allocation4 + $0x50] sm:$0xff] %vm2703_vm0, %v4761_v40 }
 0x6b4   : > { %4572 = vst.msk [vmem:[#allocation4 + $0x90] sm:$0xff] %vm2703_vm0, %v4543_v49 }
 0x6b6   : > { %v4703_v4 = vpop.permute.xlu0 %4702 }
 0x6b7   : > { %v4381_v43 = vpop.permute.xlu1 %4380  ;;  %4728 = vst.msk [vmem:[#allocation4 + $0x68] sm:$0xff] %vm2627_vm15, %v4703_v4  ;;  %v4837_v4 = vld [vmem:[#allocation4 + $0xb8] sm:$0xff] }
 0x6b8   : > { %4415 = vst.msk [vmem:[#allocation4 + $0xa8] sm:$0xff] %vm2541_vm14, %v4381_v43 }
 0x6ba   : > { %v4637_v50 = vpop.permute.xlu0 %4636  ;;  %v4824_v34 = vld [vmem:[#allocation4 + $0x50] sm:$0xff] }
 0x6bb   : > { %v4465_v25 = vpop.permute.xlu1 %4464  ;;  %4667 = vst.msk [vmem:[#allocation4 + $0x80] sm:$0xff] %vm2541_vm14, %v4637_v50  ;;  %5020 = vmatprep.mubr.f32.mxu0 %v4824_v34  ;;  %v4832_v3 = vld [vmem:[#allocation4 + $0x90] sm:$0xff] }
 0x6bc   : > { %4499 = vst.msk [vmem:[#allocation4 + $0xa8] sm:$0xff] %vm2627_vm15, %v4465_v25  ;;  %5021 = vmatmul.mubr.f32.gmra.mxu0 %v4823_v51  ;;  %v4840_v50 = vld [vmem:[#allocation4 + $0xd0] sm:$0xff]  ;;  %v4846_v25 = vld [vmem:[#allocation4 + $0x100] sm:$0xff]  ;;  %v4843_v51 = vld [vmem:[#allocation4 + $0xe8] sm:$0xff] }
 0x6be   : > { %v4705_v27 = vpop.permute.xlu0 %4704 }
 0x6bf   : > { %v4763_v31 = vpop.permute.xlu1 %4762  ;;  %4729 = vst.msk [vmem:[#allocation4 + $0x80] sm:$0xff] %vm2627_vm15, %v4705_v27 }
 0x6c0   : > { %4788 = vst.msk [vmem:[#allocation4 + $0x68] sm:$0xff] %vm2703_vm0, %v4763_v31  ;;  %v4849_v31 = vld [vmem:[#allocation4 + $0x118] sm:$0xff] }
 0x6c2   : > { %v4639_v16 = vpop.permute.xlu0 %4638 }
 0x6c3   : > { %v4545_v53 = vpop.permute.xlu1 %4544  ;;  %4668 = vst.msk [vmem:[#allocation4 + $0x98] sm:$0xff] %vm2541_vm14, %v4639_v16  ;;  %v4852_v16 = vld [vmem:[#allocation4 + $0x130] sm:$0xff] }
 0x6c4   : > { %4573 = vst.msk [vmem:[#allocation4 + $0xa8] sm:$0xff] %vm2703_vm0, %v4545_v53 }
 0x6c6   : > { %v4707_v6 = vpop.permute.xlu0 %4706 }
 0x6c7   : > { %v4383_v26 = vpop.permute.xlu1 %4382  ;;  %v4827_v55 = vld [vmem:[#allocation4 + $0x68] sm:$0xff]  ;;  %4730 = vst.msk [vmem:[#allocation4 + $0x98] sm:$0xff] %vm2627_vm15, %v4707_v6 }
 0x6c8   : > { %4416 = vst.msk [vmem:[#allocation4 + $0xc0] sm:$0xff] %vm2541_vm14, %v4383_v26  ;;  %5025 = vmatprep.mubr.f32.mxu0 %v4827_v55  ;;  %v4855_v26 = vld [vmem:[#allocation4 + $0x148] sm:$0xff] }
 0x6c9   : > { %5026 = vmatmul.mubr.f32.gmra.mxu0 %v4826_v56 }
 0x6ca   : > { %v4641_v58 = vpop.permute.xlu0 %4640 }
 0x6cb   : > { %v4467_v62 = vpop.permute.xlu1 %4466  ;;  %4669 = vst.msk [vmem:[#allocation4 + $0xb0] sm:$0xff] %vm2541_vm14, %v4641_v58  ;;  %v4835_v11 = vld [vmem:[#allocation4 + $0xa8] sm:$0xff] }
 0x6cc   : > { %4500 = vst.msk [vmem:[#allocation4 + $0xc0] sm:$0xff] %vm2627_vm15, %v4467_v62 }
 0x6ce   : > { %v4767_v57 = vpop.permute.xlu0 %4766 }
 0x6cf   : > { %v4765_v59 = vpop.permute.xlu1 %4764  ;;  %4790 = vst.msk [vmem:[#allocation4 + $0x98] sm:$0xff] %vm2703_vm0, %v4767_v57 }
 0x6d0   : > { %4789 = vst.msk [vmem:[#allocation4 + $0x80] sm:$0xff] %vm2703_vm0, %v4765_v59 }
 0x6d2   : > { %v4709_v54 = vpop.permute.xlu0 %4708 }
 0x6d3   : > { %v4547_v60 = vpop.permute.xlu1 %4546  ;;  %4731 = vst.msk [vmem:[#allocation4 + $0xb0] sm:$0xff] %vm2627_vm15, %v4709_v54 }
 0x6d4   : > { %4574 = vst.msk [vmem:[#allocation4 + $0xc0] sm:$0xff] %vm2703_vm0, %v4547_v60 }
 0x6d6   : > { %v4643_v61 = vpop.permute.xlu0 %4642  ;;  %v4833_v18 = vld [vmem:[#allocation4 + $0x98] sm:$0xff] }
 0x6d7   : > { %v4391_v12 = vpop.permute.xlu1 %4390  ;;  %v4830_v38 = vld [vmem:[#allocation4 + $0x80] sm:$0xff]  ;;  %4670 = vst.msk [vmem:[#allocation4 + $0xc8] sm:$0xff] %vm2541_vm14, %v4643_v61 }
 0x6d8   : > { %4420 = vst.msk [vmem:[#allocation4 + $0x120] sm:$0xff] %vm2541_vm14, %v4391_v12  ;;  %5030 = vmatprep.mubr.f32.mxu0 %v4830_v38 }
 0x6d9   : > { %5031 = vmatmul.mubr.f32.gmra.mxu0 %v4829_v1 }
 0x6da   : > { %5035 = vmatprep.mubr.f32.mxu0 %v4833_v18  ;;  %v4769_v2 = vpop.permute.xlu0 %4768 }
 0x6db   : > { %v4393_v5 = vpop.permute.xlu1 %4392  ;;  %4791 = vst.msk [vmem:[#allocation4 + $0xb0] sm:$0xff] %vm2703_vm0, %v4769_v2  ;;  %v4838_v0 = vld [vmem:[#allocation4 + $0xc0] sm:$0xff] }
 0x6dc   : > { %4421 = vst.msk [vmem:[#allocation4 + $0x138] sm:$0x3f] %vm2555_vm11, %v4393_v5 }
 0x6dd   : > { %5036 = vmatmul.mubr.f32.gmra.mxu0 %v4832_v3 }
 0x6de   : > { %v4711_v8 = vpop.permute.xlu0 %4710 }
 0x6df   : > { %v4385_v9 = vpop.permute.xlu1 %4384  ;;  %4732 = vst.msk [vmem:[#allocation4 + $0xc8] sm:$0xff] %vm2627_vm15, %v4711_v8 }
 0x6e0   : > { %4417 = vst.msk [vmem:[#allocation4 + $0xd8] sm:$0xff] %vm2541_vm14, %v4385_v9 }
 0x6e2   : > { %v4645_v24 = vpop.permute.xlu0 %4644  ;;  %v4836_v10 = vld [vmem:[#allocation4 + $0xb0] sm:$0xff] }
 0x6e3   : > { %v4469_v22 = vpop.permute.xlu1 %4468  ;;  %4671 = vst.msk [vmem:[#allocation4 + $0xe0] sm:$0xff] %vm2541_vm14, %v4645_v24  ;;  %5040 = vmatprep.mubr.f32.mxu0 %v4836_v10  ;;  %v8161_v10 = vld [vmem:[%s8219_s8] ss:$0 sm:$0xff] }
 0x6e4   : > { %4501 = vst.msk [vmem:[#allocation4 + $0xd8] sm:$0xff] %vm2627_vm15, %v4469_v22  ;;  %5041 = vmatmul.mubr.f32.gmra.mxu0 %v4835_v11 }
 0x6e6   : > { %v4475_v30 = vpop.permute.xlu0 %4474 }
 0x6e7   : > { %v4549_v13 = vpop.permute.xlu1 %4548  ;;  %4504 = vst.msk [vmem:[#allocation4 + $0x120] sm:$0xff] %vm2627_vm15, %v4475_v30 }
 0x6e8   : > { %4575 = vst.msk [vmem:[#allocation4 + $0xd8] sm:$0xff] %vm2703_vm0, %v4549_v13 }
 0x6ea   : > { %v4387_v15 = vpop.permute.xlu0 %4386 }
 0x6eb   : > { %v4471_v41 = vpop.permute.xlu1 %4470  ;;  %4418 = vst.msk [vmem:[#allocation4 + $0xf0] sm:$0xff] %vm2541_vm14, %v4387_v15 }
 0x6ec   : > { %4502 = vst.msk [vmem:[#allocation4 + $0xf0] sm:$0xff] %vm2627_vm15, %v4471_v41 }
 0x6ee   : > { %v4477_v39 = vpop.permute.xlu0 %4476  ;;  %v4850_v21 = vld [vmem:[#allocation4 + $0x120] sm:$0xff] }
 0x6ef   : > { %v4551_v20 = vpop.permute.xlu1 %4550  ;;  %4505 = vst.msk [vmem:[#allocation4 + $0x138] sm:$0xf] %vm2641_vm12, %v4477_v39  ;;  %5066 = vmatmul.mubr.f32.vlgmr.msra.gmra.mxu1 %v4850_v21  ;;  %v4841_v43 = vld [vmem:[#allocation4 + $0xd8] sm:$0xff] }
 0x6f0   : > { %4576 = vst.msk [vmem:[#allocation4 + $0xf0] sm:$0xff] %vm2703_vm0, %v4551_v20  ;;  %5829 = vmatpush3.msra.mxu1 %v8055_v7  ;;  %5070 = vmatprep.mubr.f32.mxu1 %v4854_v17  ;;  %v4816_v7 = vld [vmem:[#allocation4 + $0x10] sm:$0xff] }
 0x6f1   : > { %5830 = vmatprep.subr.mxu1 %v4890_v23 }
 0x6f2   : > { %v4389_v28 = vpop.permute.xlu0 %4388  ;;  %5831 = vmatpush3.msra.mxu1 %v4890_v23 }
 0x6f3   : > { %v4473_v33 = vpop.permute.xlu1 %4472  ;;  %4419 = vst.msk [vmem:[#allocation4 + $0x108] sm:$0xff] %vm2541_vm14, %v4389_v28  ;;  %5832 = vmatprep.subr.mxu1 %v4889_v48 }
 0x6f4   : > { %4503 = vst.msk [vmem:[#allocation4 + $0x108] sm:$0xff] %vm2627_vm15, %v4473_v33  ;;  %5833 = vmatpush3.msra.mxu1 %v4889_v48 }
 0x6f5   : > { %5834 = vmatprep.subr.mxu1 %v4888_v35 }
 0x6f6   : > { %v4771_v36 = vpop.permute.xlu0 %4770  ;;  %v4853_v32 = vld [vmem:[#allocation4 + $0x138] sm:$0xff]  ;;  %5835 = vmatpush3.msra.mxu1 %v4888_v35 }
 0x6f7   : > { %v4553_v37 = vpop.permute.xlu1 %4552  ;;  %4792 = vst.msk [vmem:[#allocation4 + $0xc8] sm:$0xff] %vm2703_vm0, %v4771_v36  ;;  %5071 = vmatmul.mubr.f32.gmra.mxu1 %v4853_v32  ;;  %v4844_v27 = vld [vmem:[#allocation4 + $0xf0] sm:$0xff] }
 0x6f8   : > { %4577 = vst.msk [vmem:[#allocation4 + $0x108] sm:$0xff] %vm2703_vm0, %v4553_v37  ;;  %5836 = vmatprep.mubr.msk.f32.mxu1 %vm2382_vm13, %v4816_v7 }
 0x6fa   : > { %v4713_v42 = vpop.permute.xlu0 %4712 }
 0x6fb   : > { %4733 = vst.msk [vmem:[#allocation4 + $0xe0] sm:$0xff] %vm2627_vm15, %v4713_v42  ;;  %5837 = vmatmul.mubr.msk.f32.vlgmr.msra.gmra.mxu1 %vm2382_vm13, %v4819_v14 }
 0x6fc   : > { %5839 = vmatprep.mubr.msk.f32.mxu1 %vm2382_vm13, %v4822_v19 }
 0x6fe   : > { %v4773_v63 = vpop.permute.xlu0 %4772  ;;  %v4839_v29 = vld [vmem:[#allocation4 + $0xc8] sm:$0xff] }
 0x6ff   : > { %4793 = vst.msk [vmem:[#allocation4 + $0xe0] sm:$0x3f] %vm2933_vm7, %v4773_v63  ;;  %5045 = vmatprep.mubr.f32.mxu0 %v4839_v29  ;;  %5840 = vmatmul.mubr.msk.f32.gmra.mxu1 %vm2382_vm13, %v4825_v52  ;;  %v4847_v6 = vld [vmem:[#allocation4 + $0x108] sm:$0xff] }
 0x700   : > { %5046 = vmatmul.mubr.f32.gmra.mxu0 %v4838_v0  ;;  %5842 = vmatprep.mubr.msk.f32.mxu1 %vm2382_vm13, %v4828_v44 }
 0x702   : > { %v4647_v45 = vpop.permute.xlu0 %4646 }
 0x703   : > { %4672 = vst.msk [vmem:[#allocation4 + $0xf8] sm:$0xff] %vm2541_vm14, %v4647_v45  ;;  %5843 = vmatmul.mubr.msk.f32.gmra.mxu1 %vm2382_vm13, %v4831_v46 }
 0x704   : > { %5845 = vmatprep.mubr.msk.f32.mxu1 %vm2382_vm13, %v4834_v47 }
 0x706   : > { %v4649_v40 = vpop.permute.xlu0 %4648  ;;  %v4842_v49 = vld [vmem:[#allocation4 + $0xe0] sm:$0xff] }
 0x707   : > { %4673 = vst.msk [vmem:[#allocation4 + $0x110] sm:$0xf] %vm2812_vm8, %v4649_v40  ;;  %5050 = vmatprep.mubr.f32.mxu0 %v4842_v49  ;;  %5846 = vmatmul.mubr.msk.f32.gmra.mxu1 %vm2382_vm13, %v4837_v4 }
 0x708   : > { %5051 = vmatmul.mubr.f32.gmra.mxu0 %v4841_v43  ;;  %5848 = vmatprep.mubr.msk.f32.mxu1 %vm2382_vm13, %v4840_v50 }
 0x70a   : > { %v4845_v34 = vld [vmem:[#allocation4 + $0xf8] sm:$0xff] }
 0x70b   : > { %5055 = vmatprep.mubr.f32.mxu0 %v4845_v34  ;;  %5849 = vmatmul.mubr.msk.f32.gmra.mxu1 %vm2382_vm13, %v4843_v51 }
 0x70c   : > { %5056 = vmatmul.mubr.f32.gmra.mxu0 %v4844_v27  ;;  %5851 = vmatprep.mubr.msk.f32.mxu1 %vm2382_vm13, %v4846_v25 }
 0x70e   : > { %v4848_v53 = vld [vmem:[#allocation4 + $0x110] sm:$0xff] }
 0x70f   : > { %5060 = vmatprep.mubr.f32.mxu0 %v4848_v53  ;;  %5852 = vmatmul.mubr.msk.f32.gmra.mxu1 %vm2382_vm13, %v4849_v31 }
 0x710   : > { %5061 = vmatmul.mubr.f32.gmra.mxu0 %v4847_v6  ;;  %5854 = vmatprep.mubr.msk.f32.mxu1 %vm2382_vm13, %v4852_v16 }
 0x713   : > { %5855 = vmatmul.mubr.msk.f32.gmra.mxu1 %vm2382_vm13, %v4855_v26 }
 0x750   : > { %v5652_v55 = vpop.f32.mrf.mxu0 }
 0x752   : > { %v5653_v56 = vpop.f32.mrf.mxu0 }
 0x753   : > { %v5654_v9 = vadd.f32 %v5653_v56, %v5652_v55 }
 0x755   : > { %v5008_v39 = vadd.f32 %v5654_v9, %v8161_v10 }
 0x760   : > { %v5655_v58 = vpop.f32.mrf.mxu0 }
 0x762   : > { %v5656_v62 = vpop.f32.mrf.mxu0 }
 0x763   : > { %v5657_v3 = vadd.f32 %v5656_v62, %v5655_v58 }
 0x765   : > { %v5013_v30 = vadd.f32 %v5657_v3, %v8161_v10 }
 0x770   : > { %v5658_v57 = vpop.f32.mrf.mxu0 }
 0x772   : > { %v5659_v59 = vpop.f32.mrf.mxu0 }
 0x773   : > { %v5660_v41 = vadd.f32 %v5659_v59, %v5658_v57 }
 0x775   : > { %v5018_v7 = vadd.f32 %v5660_v41, %v8161_v10 }
 0x77c   : > { %v5661_v54 = vpop.f32.mrf.mxu0 }
 0x77e   : > { %v5662_v60 = vpop.f32.mrf.mxu0 }
 0x77f   : > { %v5663_v11 = vadd.f32 %v5662_v60, %v5661_v54 }
 0x781   : > { %v5023_v28 = vadd.f32 %v5663_v11, %v8161_v10 }
 0x789   : > { %v5664_v61 = vpop.f32.mrf.mxu0 }
 0x78b   : > { %v5665_v12 = vpop.f32.mrf.mxu0 }
 0x78c   : > { %v5666_v36 = vadd.f32 %v5665_v12, %v5664_v61 }
 0x78e   : > { %v5028_v47 = vadd.f32 %v5666_v36, %v8161_v10 }
 0x799   : > { %v5667_v38 = vpop.f32.mrf.mxu0 }
 0x79b   : > { %v5668_v1 = vpop.f32.mrf.mxu0 }
 0x79c   : > { %v5669_v21 = vadd.f32 %v5668_v1, %v5667_v38 }
 0x79d   : > { %v5670_v2 = vpop.f32.mrf.mxu0 }
 0x79e   : > { %v5033_v52 = vadd.f32 %v5669_v21, %v8161_v10 }
 0x79f   : > { %v5671_v24 = vpop.f32.mrf.mxu0 }
 0x7a0   : > { %v5672_v44 = vadd.f32 %v5671_v24, %v5670_v2 }
 0x7a2   : > { %v5038_v16 = vadd.f32 %v5672_v44, %v8161_v10 }
 0x7a4   : > { %v5673_v13 = vpop.f32.mrf.mxu0 }
 0x7a6   : > { %v5674_v33 = vpop.f32.mrf.mxu0 }
 0x7a7   : > { %v5675_v19 = vadd.f32 %v5674_v33, %v5673_v13 }
 0x7a9   : > { %v5043_v50 = vadd.f32 %v5675_v19, %v8161_v10 }
 0x7af   : > { %v8152_v18 = vpop.f32.mrf.mxu1 }
 0x7b1   : > { %v8154_v5 = vpop.f32.mrf.mxu1 }
 0x7b2   : > { %v5690_v9 = vadd.f32 %v8154_v5, %v8152_v18 }
 0x7b7   : > { %v8156_v8 = vpop.f32.mrf.mxu1 }
 0x7b9   : > { %v5692_v22 = vpop.f32.mrf.mxu1 }
 0x7ba   : > { %v5693_v61 = vadd.f32 %v5692_v22, %v8156_v8 }
 0x7bb   : > { %v5838_v15 = vpop.f32.mrf.mxu1 }
 0x7bc   : > { %v5148_v17 = vadd.f32 %v5838_v15, %v5013_v30  ;;  %v5073_v22 = vadd.f32 %v5693_v61, %v8161_v10 }
 0x7bd   : > { %v5142_v20 = vpop.f32.mrf.mxu1 }
 0x7be   : > { %v5212_v23 = vmax.f32 %v5148_v17, 0.0  ;;  %v5143_v48 = vadd.f32 %v5142_v20, %v5008_v39  ;;  %v5068_v39 = vadd.f32 %v5690_v9, %v8161_v10 }
 0x7bf   : > { %v5841_v35 = vpop.f32.mrf.mxu1 }
 0x7c0   : > { %5226 = vst.msk [vmem:[%s6063_s28 + $0x8] sm:$0xff] %vm2382_vm13, %v5212_v23  ;;  %v5211_v37 = vmax.f32 %v5143_v48, 0.0  ;;  %v5158_v32 = vadd.f32 %v5841_v35, %v5023_v28  ;;  %v5676_v42 = vpop.f32.mrf.mxu0 }
 0x7c1   : > { %v5152_v14 = vpop.f32.mrf.mxu1 }
 0x7c2   : > { %5225 = vst.msk [vmem:[%s6063_s28] sm:$0xff] %vm2382_vm13, %v5211_v37  ;;  %v5214_v63 = vmax.f32 %v5158_v32, 0.0  ;;  %v5153_v29 = vadd.f32 %v5152_v14, %v5018_v7  ;;  %v5677_v40 = vpop.f32.mrf.mxu0 }
 0x7c3   : > { %v5844_v0 = vpop.f32.mrf.mxu1  ;;  %v5678_v34 = vadd.f32 %v5677_v40, %v5676_v42 }
 0x7c4   : > { %5228 = vst.msk [vmem:[%s6063_s28 + $0x18] sm:$0xff] %vm2382_vm13, %v5214_v63  ;;  %v5213_v45 = vmax.f32 %v5153_v29, 0.0  ;;  %v5168_v46 = vadd.f32 %v5844_v0, %v5033_v52 }
 0x7c5   : > { %v5162_v49 = vpop.f32.mrf.mxu1  ;;  %v5048_v59 = vadd.f32 %v5678_v34, %v8161_v10 }
 0x7c6   : > { %5227 = vst.msk [vmem:[%s6063_s28 + $0x10] sm:$0xff] %vm2382_vm13, %v5213_v45  ;;  %v5216_v4 = vmax.f32 %v5168_v46, 0.0  ;;  %v5163_v43 = vadd.f32 %v5162_v49, %v5028_v47 }
 0x7c7   : > { %v5847_v25 = vpop.f32.mrf.mxu1 }
 0x7c8   : > { %5230 = vst.msk [vmem:[%s6063_s28 + $0x28] sm:$0xff] %vm2382_vm13, %v5216_v4  ;;  %v5215_v51 = vmax.f32 %v5163_v43, 0.0  ;;  %v5178_v27 = vadd.f32 %v5847_v25, %v5043_v50  ;;  %v5679_v31 = vpop.f32.mrf.mxu0 }
 0x7c9   : > { %v5172_v53 = vpop.f32.mrf.mxu1 }
 0x7ca   : > { %5229 = vst.msk [vmem:[%s6063_s28 + $0x20] sm:$0xff] %vm2382_vm13, %v5215_v51  ;;  %v5218_v6 = vmax.f32 %v5178_v27, 0.0  ;;  %v5173_v26 = vadd.f32 %v5172_v53, %v5038_v16  ;;  %v5680_v55 = vpop.f32.mrf.mxu0 }
 0x7cb   : > { %v5681_v56 = vadd.f32 %v5680_v55, %v5679_v31  ;;  %v5850_v58 = vpop.f32.mrf.mxu1 }
 0x7cc   : > { %5232 = vst.msk [vmem:[%s6063_s28 + $0x38] sm:$0xff] %vm2382_vm13, %v5218_v6  ;;  %v5217_v62 = vmax.f32 %v5173_v26, 0.0  ;;  %v5682_v57 = vpop.f32.mrf.mxu0 }
 0x7cd   : > { %v5053_v54 = vadd.f32 %v5681_v56, %v8161_v10  ;;  %v5182_v60 = vpop.f32.mrf.mxu1 }
 0x7ce   : > { %5231 = vst.msk [vmem:[%s6063_s28 + $0x30] sm:$0xff] %vm2382_vm13, %v5217_v62  ;;  %v5183_v12 = vadd.f32 %v5182_v60, %v5048_v59  ;;  %v5683_v38 = vpop.f32.mrf.mxu0 }
 0x7cf   : > { %v5188_v1 = vadd.f32 %v5850_v58, %v5053_v54  ;;  %v5684_v2 = vadd.f32 %v5683_v38, %v5682_v57  ;;  %v5853_v3 = vpop.f32.mrf.mxu1 }
 0x7d0   : > { %v5219_v24 = vmax.f32 %v5183_v12, 0.0  ;;  %v5685_v11 = vpop.f32.mrf.mxu0 }
 0x7d1   : > { %v5220_v30 = vmax.f32 %v5188_v1, 0.0  ;;  %v5058_v13 = vadd.f32 %v5684_v2, %v8161_v10  ;;  %v5192_v15 = vpop.f32.mrf.mxu1 }
 0x7d2   : > { %5233 = vst.msk [vmem:[%s6063_s28 + $0x40] sm:$0xff] %vm2382_vm13, %v5219_v24  ;;  %v5686_v8 = vpop.f32.mrf.mxu0 }
 0x7d3   : > { %5234 = vst.msk [vmem:[%s6063_s28 + $0x48] sm:$0xff] %vm2382_vm13, %v5220_v30  ;;  %v5193_v41 = vadd.f32 %v5192_v15, %v5058_v13  ;;  %v5687_v17 = vadd.f32 %v5686_v8, %v5685_v11  ;;  %v5856_v18 = vpop.f32.mrf.mxu1 }
 0x7d4   : > { %v5208_v5 = vadd.f32 %v5856_v18, %v5073_v22 }
 0x7d5   : > { %v5221_v20 = vmax.f32 %v5193_v41, 0.0  ;;  %v5063_v21 = vadd.f32 %v5687_v17, %v8161_v10  ;;  %v5202_v23 = vpop.f32.mrf.mxu1 }
 0x7d6   : > { %v5224_v48 = vmax.f32 %v5208_v5, 0.0  ;;  %v5203_v28 = vadd.f32 %v5202_v23, %v5068_v39 }
 0x7d7   : > { %5235 = vst.msk [vmem:[%s6063_s28 + $0x50] sm:$0xff] %vm2382_vm13, %v5221_v20  ;;  %v5198_v33 = vadd.f32 %v5853_v3, %v5063_v21 }
 0x7d8   : > { %5238 = vst.msk [vmem:[%s6063_s28 + $0x68] sm:$0xff] %vm2382_vm13, %v5224_v48  ;;  %v5223_v35 = vmax.f32 %v5203_v28, 0.0 }
 0x7d9   : > { %v5222_v36 = vmax.f32 %v5198_v33, 0.0 }
 0x7da   : > { %5237 = vst.msk [vmem:[%s6063_s28 + $0x60] sm:$0xff] %vm2382_vm13, %v5223_v35 }
 0x7db   : > { %5236 = vst.msk [vmem:[%s6063_s28 + $0x58] sm:$0xff] %vm2382_vm13, %v5222_v36 }
 0x7dc PF: > { %s20_s30 = sadd.s32 1, %s5958_s30  }
 0x7dd   : > { %p17_p3 = scmp.ge.s32.totalorder %s20_s30, 4  }
 0x7df   :  { %19 = sbr.rel (!%p17_p3) target bundleno = 1 (0x1), region = 95 }
 0x7e4   :  { %5261 = vsyncpa [#allocation9], 1 }
 0x7e5   :  { %5263 = vsyncpa [#allocation9 + $0x1], 1 }

</bundles_post_ra>
